<compile_context>
chip_gen: v6e
topology: v6e:2x2x1
jax: 0.10.0
libtpu: 0.0.40
codegen_flags: <defaults>
</compile_context>

<pallas_src>
import jax
import jax.numpy as jnp
from jax.experimental import pallas as pl
from jax.experimental.pallas import tpu as pltpu

_LANES = 128
_NEG_BIG = -1e30  # finite "-inf": padded action lanes get exp(...) == 0


def _round_up(x, m):
    return (x + m - 1) // m * m


def policy_net_kernel(x_ref, w1_ref, b1_ref, w2_ref, b2_ref, out_ref):
    # ---- hot path: two matmuls + bias + ReLU + numerically-stable softmax ----
    x = x_ref[...]                                              # [TB, in_size]
    # Linear 1 + ReLU (bias pre-broadcast to [1, H] in the wrapper).
    h = jnp.dot(x, w1_ref[...], preferred_element_type=jnp.float32) + b1_ref[...]
    h = jnp.maximum(h, 0.0)                                     # [TB, H]
    # Linear 2 into the lane-padded action dim (padded columns of w2 are 0 and
    # their bias is -1e30, so they contribute exactly 0 to the softmax).
    logits = jnp.dot(h, w2_ref[...], preferred_element_type=jnp.float32) + b2_ref[...]
    # Softmax over last axis, numerically stable.
    m = jnp.max(logits, axis=-1, keepdims=True)
    e = jnp.exp(logits - m)
    denom = jnp.sum(e, axis=-1, keepdims=True)
    # Fast reciprocal on the otherwise-idle EUP + one Newton step -> ~f32 exact.
    r = pl.reciprocal(denom, approx=True)
    r = r * (2.0 - denom * r)
    out_ref[...] = e * r                                        # [TB, A_pad]


def policy_network_forward(state, w1, b1, w2, b2, *, tb=1024):
    """softmax(relu(state @ w1 + b1) @ w2 + b2).

    state: [B, in_size] f32; w1: [in_size, H]; b1: [H]; w2: [H, A]; b2: [A].
    Returns [B, A] f32 action probabilities.
    """
    state = jnp.asarray(state, jnp.float32)
    B, in_size = state.shape
    H = w1.shape[1]
    A = w2.shape[1]

    # ---- lane-dense output: pad action dim up to a multiple of 128 lanes ----
    A_pad = _round_up(A, _LANES)
    w1 = w1.astype(jnp.float32)
    b1_2d = b1.astype(jnp.float32).reshape(1, H)
    w2_p = jnp.zeros((H, A_pad), jnp.float32).at[:, :A].set(w2.astype(jnp.float32))
    b2_p = jnp.full((1, A_pad), _NEG_BIG, jnp.float32).at[0, :A].set(
        b2.astype(jnp.float32))

    # ---- batch tiling: large blocks, padded to a whole number of tiles -------
    if B >= tb:
        B_pad = _round_up(B, tb)
    else:
        tb = _round_up(B, 8)          # tiny batch: single sublane-aligned block
        B_pad = tb
    if B_pad != B:
        state = jnp.pad(state, ((0, B_pad - B), (0, 0)))
    grid = (B_pad // tb,)

    # Per-step VMEM (double-buffered) at tb=1024 is ~1.1 MiB, far below the
    # 32 MiB scoped limit on every generation (incl. v7x's 64 MiB physical).
    out = pl.pallas_call(
        policy_net_kernel,
        out_shape=jax.ShapeDtypeStruct((B_pad, A_pad), jnp.float32),
        grid_spec=pltpu.PrefetchScalarGridSpec(
            num_scalar_prefetch=0,
            grid=grid,
            in_specs=[
                # activations: one (tb, in_size) tile per grid step
                pl.BlockSpec((tb, in_size), lambda i: (i, 0)),
                # weights / biases: constant index map => grid-invariant, kept
                # resident in VMEM, not re-DMA'd each step
                pl.BlockSpec((in_size, H), lambda i: (0, 0)),
                pl.BlockSpec((1, H), lambda i: (0, 0)),
                pl.BlockSpec((H, A_pad), lambda i: (0, 0)),
                pl.BlockSpec((1, A_pad), lambda i: (0, 0)),
            ],
            out_specs=pl.BlockSpec((tb, A_pad), lambda i: (i, 0)),
        ),
        compiler_params=pltpu.CompilerParams(
            # batch axis is embarrassingly parallel -> shards across the two
            # TensorCores on v7x; harmless on single-TC v5e/v6e.
            dimension_semantics=("parallel",),
        ),
    )(state, w1, b1_2d, w2_p, b2_p)

    # Drop padded batch rows and padded action lanes.
    return out[:B, :A]


def init_params(key, in_size, hidden, num_actions):
    """Deterministic synthetic init (PyTorch-like uniform fan-in scaling)."""
    k1, k2, k3, k4 = jax.random.split(key, 4)
    bound1 = 1.0 / jnp.sqrt(in_size)
    bound2 = 1.0 / jnp.sqrt(hidden)
    w1 = jax.random.uniform(k1, (in_size, hidden), jnp.float32, -bound1, bound1)
    b1 = jax.random.uniform(k2, (hidden,), jnp.float32, -bound1, bound1)
    w2 = jax.random.uniform(k3, (hidden, num_actions), jnp.float32, -bound2, bound2)
    b2 = jax.random.uniform(k4, (num_actions,), jnp.float32, -bound2, bound2)
    return w1, b1, w2, b2


if __name__ == "__main__":
    IN_SIZE = 4      # observation size (e.g. CartPole-like env)
    HIDDEN = 32      # fixed by the module
    NUM_ACTIONS = 8  # env.action_space.n

    key = jax.random.PRNGKey(0)
    k_state, k_params, k_small = jax.random.split(key, 3)
    w1, b1, w2, b2 = init_params(k_params, IN_SIZE, HIDDEN, NUM_ACTIONS)

    def reference(x):
        h = jnp.maximum(x @ w1 + b1, 0.0)
        return jax.nn.softmax(h @ w2 + b2, axis=-1)

    # Batched case: 2 grid steps of 1024-row tiles (pipelined / parallel path).
    B = 2048
    state = jax.random.normal(k_state, (B, IN_SIZE), dtype=jnp.float32)
    probs = jax.block_until_ready(policy_network_forward(state, w1, b1, w2, b2))
    assert probs.shape == (B, NUM_ACTIONS)
    assert jnp.allclose(probs, reference(state), atol=1e-4, rtol=1e-4)
    assert jnp.allclose(jnp.sum(probs, axis=-1), 1.0, atol=1e-4)

    # Tiny batch (single padded block) -- the "B ~ 2 env-step" case; per the
    # perf review real deployments should stack many states into one call.
    state_small = jax.random.normal(k_small, (2, IN_SIZE), dtype=jnp.float32)
    probs_small = jax.block_until_ready(
        policy_network_forward(state_small, w1, b1, w2, b2))
    assert probs_small.shape == (2, NUM_ACTIONS)
    assert jnp.allclose(probs_small, reference(state_small), atol=1e-4, rtol=1e-4)

    # TODO(synk): get_action's np.random.choice sampling is host-side policy
    # logic, not part of the nn.Module forward, so it is not implemented here.
    print("KERNEL_OK")
</pallas_src>

<mosaic_0001>
module attributes {stable_mosaic.version = 11 : i64} {
  func.func @policy_net_kernel(%arg0: i32, %arg1: memref<1024x4xf32, #tpu.memory_space<vmem>>, %arg2: memref<4x32xf32, #tpu.memory_space<vmem>>, %arg3: memref<1x32xf32, #tpu.memory_space<vmem>>, %arg4: memref<32x128xf32, #tpu.memory_space<vmem>>, %arg5: memref<1x128xf32, #tpu.memory_space<vmem>>, %arg6: memref<1024x128xf32, #tpu.memory_space<vmem>>) attributes {dimension_semantics = [#tpu.dimension_semantics<parallel>], iteration_bounds = array<i64: 2>, scalar_prefetch = 0 : i64, scratch_operands = 0 : i64, tpu.core_type = #tpu.core_type<tc>, window_params = [{transform_indices = @transform_0, window_bounds = array<i64: 1024, 4>}, {pipeline_mode = #tpu.pipeline_mode<synchronous>, transform_indices = @transform_1, window_bounds = array<i64: 4, 32>}, {pipeline_mode = #tpu.pipeline_mode<synchronous>, transform_indices = @transform_2, window_bounds = array<i64: 1, 32>}, {pipeline_mode = #tpu.pipeline_mode<synchronous>, transform_indices = @transform_3, window_bounds = array<i64: 32, 128>}, {pipeline_mode = #tpu.pipeline_mode<synchronous>, transform_indices = @transform_4, window_bounds = array<i64: 1, 128>}, {transform_indices = @transform_5, window_bounds = array<i64: 1024, 128>}]} {
    %c0 = arith.constant 0 : index
    %c0_0 = arith.constant 0 : index
    %0 = vector.load %arg1[%c0, %c0_0] : memref<1024x4xf32, #tpu.memory_space<vmem>>, vector<1024x4xf32>
    %c0_1 = arith.constant 0 : index
    %c0_2 = arith.constant 0 : index
    %1 = vector.load %arg2[%c0_1, %c0_2] : memref<4x32xf32, #tpu.memory_space<vmem>>, vector<4x32xf32>
    %cst = arith.constant dense<0.000000e+00> : vector<1024x32xf32>
    %2 = tpu.matmul %0, %1, %cst {dimension_numbers = #tpu.dot_dimension_numbers<[1], [0], [0], [1], [0, 0, 1, 1], [], []>} : vector<1024x4xf32>, vector<4x32xf32>, vector<1024x32xf32> -> vector<1024x32xf32>
    %c0_3 = arith.constant 0 : index
    %c0_4 = arith.constant 0 : index
    %3 = vector.load %arg3[%c0_3, %c0_4] : memref<1x32xf32, #tpu.memory_space<vmem>>, vector<1x32xf32>
    %4 = vector.broadcast %3 : vector<1x32xf32> to vector<1024x32xf32>
    %5 = arith.addf %2, %4 : vector<1024x32xf32>
    %cst_5 = arith.constant 0.000000e+00 : f32
    %6 = vector.broadcast %cst_5 : f32 to vector<1024x32xf32>
    %7 = arith.maximumf %5, %6 : vector<1024x32xf32>
    %c0_6 = arith.constant 0 : index
    %c0_7 = arith.constant 0 : index
    %8 = vector.load %arg4[%c0_6, %c0_7] : memref<32x128xf32, #tpu.memory_space<vmem>>, vector<32x128xf32>
    %cst_8 = arith.constant dense<0.000000e+00> : vector<1024x128xf32>
    %9 = tpu.matmul %7, %8, %cst_8 {dimension_numbers = #tpu.dot_dimension_numbers<[1], [0], [0], [1], [0, 0, 1, 1], [], []>} : vector<1024x32xf32>, vector<32x128xf32>, vector<1024x128xf32> -> vector<1024x128xf32>
    %c0_9 = arith.constant 0 : index
    %c0_10 = arith.constant 0 : index
    %10 = vector.load %arg5[%c0_9, %c0_10] : memref<1x128xf32, #tpu.memory_space<vmem>>, vector<1x128xf32>
    %11 = vector.broadcast %10 : vector<1x128xf32> to vector<1024x128xf32>
    %12 = arith.addf %9, %11 : vector<1024x128xf32>
    %cst_11 = arith.constant dense<0xFF800000> : vector<1024xf32>
    %13 = vector.multi_reduction <maximumf>, %12, %cst_11 [1] : vector<1024x128xf32> to vector<1024xf32>
    %14 = vector.shape_cast %13 : vector<1024xf32> to vector<1024x1xf32>
    %15 = vector.broadcast %14 : vector<1024x1xf32> to vector<1024x128xf32>
    %16 = arith.subf %12, %15 : vector<1024x128xf32>
    %17 = math.exp %16 : vector<1024x128xf32>
    %cst_12 = arith.constant dense<0.000000e+00> : vector<1024xf32>
    %18 = vector.multi_reduction <add>, %17, %cst_12 [1] : vector<1024x128xf32> to vector<1024xf32>
    %19 = vector.shape_cast %18 : vector<1024xf32> to vector<1024x1xf32>
    %20 = tpu.reciprocal %19 {approx = true} : vector<1024x1xf32> -> vector<1024x1xf32>
    %21 = arith.mulf %19, %20 : vector<1024x1xf32>
    %cst_13 = arith.constant 2.000000e+00 : f32
    %22 = vector.broadcast %cst_13 : f32 to vector<1024x1xf32>
    %23 = arith.subf %22, %21 : vector<1024x1xf32>
    %24 = arith.mulf %20, %23 : vector<1024x1xf32>
    %25 = vector.broadcast %24 : vector<1024x1xf32> to vector<1024x128xf32>
    %26 = arith.mulf %17, %25 : vector<1024x128xf32>
    %c0_14 = arith.constant 0 : index
    %c0_15 = arith.constant 0 : index
    %27 = vector.load %arg6[%c0_14, %c0_15] : memref<1024x128xf32, #tpu.memory_space<vmem>>, vector<1024x128xf32>
    tpu.vector_store %arg6[%c0_14, %c0_15], %26 {strides = array<i32>} : memref<1024x128xf32, #tpu.memory_space<vmem>>, vector<1024x128xf32>,
    return
  }
  func.func @transform_0(%arg0: i32) -> (i32, i32) {
    %c0_i32 = arith.constant 0 : i32
    %c0_i32_0 = arith.constant 0 : i32
    return %arg0, %c0_i32 : i32, i32
  }
  func.func @transform_1(%arg0: i32) -> (i32, i32) {
    %c0_i32 = arith.constant 0 : i32
    %c0_i32_0 = arith.constant 0 : i32
    %c0_i32_1 = arith.constant 0 : i32
    return %c0_i32, %c0_i32_0 : i32, i32
  }
  func.func @transform_2(%arg0: i32) -> (i32, i32) {
    %c0_i32 = arith.constant 0 : i32
    %c0_i32_0 = arith.constant 0 : i32
    %c0_i32_1 = arith.constant 0 : i32
    return %c0_i32, %c0_i32_0 : i32, i32
  }
  func.func @transform_3(%arg0: i32) -> (i32, i32) {
    %c0_i32 = arith.constant 0 : i32
    %c0_i32_0 = arith.constant 0 : i32
    %c0_i32_1 = arith.constant 0 : i32
    return %c0_i32, %c0_i32_0 : i32, i32
  }
  func.func @transform_4(%arg0: i32) -> (i32, i32) {
    %c0_i32 = arith.constant 0 : i32
    %c0_i32_0 = arith.constant 0 : i32
    %c0_i32_1 = arith.constant 0 : i32
    return %c0_i32, %c0_i32_0 : i32, i32
  }
  func.func @transform_5(%arg0: i32) -> (i32, i32) {
    %c0_i32 = arith.constant 0 : i32
    %c0_i32_0 = arith.constant 0 : i32
    return %arg0, %c0_i32 : i32, i32
  }
}

</mosaic_0001>

<bundles_post_ra>
// kernel: tpu_custom_call.1
= control target key start
LH: loop header
LB: loop body
LE: loop exit
PB: predicated region body
PF: predicated region fallthrough
CT: control target
= control target key end

     0   :  { %10 = vsyncpa [#allocation3], 0  ;;  %s8461_s0 = inlined_call_operand.vmem [shape: f32[2048,4], index: 0, kind: input, shape index: {}]   ;;  %s8462_s1 = inlined_call_operand.vmem [shape: f32[4,32], index: 1, kind: input, shape index: {}]   ;;  %s8463_s2 = inlined_call_operand.vmem [shape: f32[1,32], index: 2, kind: input, shape index: {}]   ;;  %s8464_s3 = inlined_call_operand.vmem [shape: f32[32,128], index: 3, kind: input, shape index: {}]   ;;  %s8465_s4 = inlined_call_operand.vmem [shape: f32[1,128], index: 4, kind: input, shape index: {}]   ;;  %s8466_s5 = inlined_call_operand.hbm [shape: f32[2048,128], index: 5, kind: output, shape index: {}]  }
   0x1   :  { %12 = vsyncpa [#allocation3 + $0x1], 0  ;;  %s6002_s18 = smov 0   ;;  %s6004_s19 = smov 0  }
   0x2   :  { %s6006_s20 = smov 0   ;;  %s6008_s21 = smov 0  }
   0x3 LB: > { %s6023_s22 = sadd.s32 4294967295, %s5967_s21   ;;  %s4425_s23 = sadd.s32 4294967294, %s5967_s21   ;;  %s5967_s21 = sphi %s6008_s21, %s8964_s21   ;;  %s5963_s20 = sphi %s6006_s20, %s8963_s20   ;;  %s5959_s19 = sphi %s6004_s19, %s8962_s19   ;;  %s5955_s18 = sphi %s6002_s18, %s8961_s18  }
   0x4   : > { %s6027_s24 = sadd.s32 1, %s5967_s21   ;;  %s135_s25 = sadd.s32 1, %s5963_s20 }
   0x5   : > { %s132_s26 = ssub.s32 %s5967_s21, %s6027_s24  ;;  %p145_p0 = scmp.ne.s32.totalorder %s5963_s20, %s5959_s19 }
   0x6   : > { %p133_p1 = scmp.eq.s32.totalorder %s132_s26, 0  ;;  %p146_p2 = scmp.eq.s32.totalorder %s6023_s22, 1 }
   0x7   : > { %p151_p3 = scmp.ne.s32.totalorder %s5959_s19, %s5955_s18  ;;  %p152_p4 = scmp.eq.s32.totalorder %s4425_s23, 1 }
   0x8   : > { %s6038_s27 = scalar_select %p133_p1, %s5963_s20, %s135_s25  }
   0x9   : > { %p6040_p5 = por %p146_p2, %p145_p0  ;;  %p6044_p6 = por %p152_p4, %p151_p3 }
   0xa   : > { %p4428_p7 = scmp.ge.s32.totalorder %s5967_s21, 1  ;;  %p191_p8 = scmp.lt.s32.totalorder %s5967_s21, 3 }
   0xc   : > { %p192_p9 = pnand %p4428_p7, %p191_p8 }
   0xe   : > { %195 = sbr.rel (%p192_p9) target bundleno = 1108 (0x454), region = 40 }
  0x13   : > { %v354_v0 = vld [vmem:[%s8462_s1] sm:$0xf]  ;;  %vm747_vm0 = vcmask 1043456   ;;  %s4430_s7 = sshll.u32 %s6023_s22, 7  ;;  %vm362_vm1 = vcmask 31744   ;;  %v1587_v36 = vld [vmem:[%s8464_s3 + $0x18] sm:$0xff] }
  0x14   : > { %4958 = vmatprep.subr.msk.mxu0 %vm747_vm0, %v354_v0  ;;  %p220_p10 = scmp.lt.s32.totalorder %s4430_s7, 255  ;;  %5152 = vmatprep.subr.mxu1 %v1587_v36  ;;  %v1586_v38 = vld [vmem:[%s8464_s3 + $0x10] sm:$0xff]  ;;  %v1585_v40 = vld [vmem:[%s8464_s3 + $0x8] sm:$0xff]  ;;  %v1584_v42 = vld [vmem:[%s8464_s3] sm:$0xff]  ;;  %vm1595_vm2 = vcmask 261120   ;;  %s216_s12 = sand.u32 1, %s5959_s19  }
  0x15   : > { %4959 = vmatpush3.msk.msra.mxu0 %vm747_vm0, %v354_v0  ;;  %5153 = vmatpush3.msra.mxu1 %v1587_v36  ;;  %s4429_s13 = sshll.u32 %s216_s12, 10  ;;  %s4696_s15 = sshll.u32 %s6023_s22, 14 }
  0x16   : > { %s8966_s7 = smov (!%p220_p10, %s4430_s7), 255  ;;  %5154 = vmatprep.subr.mxu1 %v1586_v38  ;;  %s7446_s14 = scalar_lea.vmem [#allocation2], %s4429_s13 }
  0x17   : > { %s4431_s8 = sshll.u32 %s8966_s7, 3  ;;  %5155 = vmatpush3.msra.mxu1 %v1586_v38  ;;  %s4363_s16 = sshll.u32 %s7446_s14, 4  ;;  %s8414_s16 = int_to_ptr.vmem [resolvable:$true] %s4363_s16 }
  0x18   : > { %s6057_s11 = scalar_lea.vmem %s8461_s0, %s4431_s8  ;;  %5156 = vmatprep.subr.mxu1 %v1585_v40  ;;  %s8412_s25 = scalar_lea.hbm %s8466_s5, %s4696_s15 }
  0x19   : > { %v226_v1 = vld [vmem:[%s6057_s11] sm:$0xff]  ;;  %v227_v2 = vld [vmem:[%s6057_s11 + $0x8] sm:$0xff]  ;;  %v228_v3 = vld [vmem:[%s6057_s11 + $0x10] sm:$0xff]  ;;  %5157 = vmatpush3.msra.mxu1 %v1585_v40  ;;  %s8421_s22 = scalar_lea.sflag [#allocation3], %s216_s12  ;;  %s5907_s26 = scalar_lea.vmem %s8414_s16, 16384 }
  0x1a   : > { %4960 = vmatprep.mubr.msk.f32.mxu0 %vm362_vm1, %v226_v1  ;;  %v229_v4 = vld [vmem:[%s6057_s11 + $0x18] sm:$0xff]  ;;  %v230_v5 = vld [vmem:[%s6057_s11 + $0x20] sm:$0xff]  ;;  %v231_v6 = vld [vmem:[%s6057_s11 + $0x28] sm:$0xff]  ;;  %5158 = vmatprep.subr.mxu1 %v1584_v42  ;;  %p5908_p11 = scmp.ne.s32.totalorder %s8414_s16, %s5907_s26  ;;  %s5969_s30 = smov [#allocation2]  }
  0x1b   : > { %4961 = vmatmul.mubr.msk.f32.vlgmr.msra.gmra.mxu0 %vm362_vm1, %v227_v2  ;;  %v232_v7 = vld [vmem:[%s6057_s11 + $0x30] sm:$0xff]  ;;  %v233_v8 = vld [vmem:[%s6057_s11 + $0x38] sm:$0xff]  ;;  %v234_v9 = vld [vmem:[%s6057_s11 + $0x40] sm:$0xff]  ;;  %5159 = vmatpush3.msra.mxu1 %v1584_v42  ;;  %s5911_s6 = sshll.u32 %s5969_s30, 4  ;;  %s5912_s6 = int_to_ptr.vmem [resolvable:$false] %s5911_s6 }
  0x1c   : > { %4963 = vmatprep.mubr.msk.f32.mxu0 %vm362_vm1, %v228_v3  ;;  %v235_v10 = vld [vmem:[%s6057_s11 + $0x48] sm:$0xff]  ;;  %v236_v11 = vld [vmem:[%s6057_s11 + $0x50] sm:$0xff]  ;;  %v237_v12 = vld [vmem:[%s6057_s11 + $0x58] sm:$0xff]  ;;  %p5909_p12 = pnand %p5908_p11, %p6040_p5  ;;  %s5913_s7 = scalar_lea.vmem %s5912_s6, 32768 }
  0x1d   : > { %v238_v13 = vld [vmem:[%s6057_s11 + $0x60] sm:$0xff]  ;;  %v239_v14 = vld [vmem:[%s6057_s11 + $0x68] sm:$0xff]  ;;  %v240_v15 = vld [vmem:[%s6057_s11 + $0x70] sm:$0xff]  ;;  %p5914_p0 = scmp.lt.s32.totalorder %s8414_s16, %s5912_s6  ;;  %p5915_p1 = scmp.lt.s32.totalorder %s5913_s7, %s5907_s26 }
  0x1e   : > { %v241_v16 = vld [vmem:[%s6057_s11 + $0x78] sm:$0xff]  ;;  %v242_v17 = vld [vmem:[%s6057_s11 + $0x80] sm:$0xff]  ;;  %v243_v18 = vld [vmem:[%s6057_s11 + $0x88] sm:$0xff]  ;;  %p5910_p13 = pneg %p5909_p12 }
  0x1f   : > { %4964 = vmatmul.mubr.msk.f32.gmra.mxu0 %vm362_vm1, %v229_v4  ;;  %v244_v19 = vld [vmem:[%s6057_s11 + $0x90] sm:$0xff]  ;;  %v245_v20 = vld [vmem:[%s6057_s11 + $0x98] sm:$0xff]  ;;  %v246_v21 = vld [vmem:[%s6057_s11 + $0xa0] sm:$0xff]  ;;  %p5916_p2 = por %p5915_p1, %p5914_p0 }
  0x20   : > { %4966 = vmatprep.mubr.msk.f32.mxu0 %vm362_vm1, %v230_v5  ;;  %v247_v22 = vld [vmem:[%s6057_s11 + $0xa8] sm:$0xff]  ;;  %v248_v23 = vld [vmem:[%s6057_s11 + $0xb0] sm:$0xff]  ;;  %v249_v24 = vld [vmem:[%s6057_s11 + $0xb8] sm:$0xff] }
  0x21   : > { %v250_v25 = vld [vmem:[%s6057_s11 + $0xc0] sm:$0xff]  ;;  %v251_v26 = vld [vmem:[%s6057_s11 + $0xc8] sm:$0xff]  ;;  %v252_v27 = vld [vmem:[%s6057_s11 + $0xd0] sm:$0xff]  ;;  %p5917_p3 = pnand %p5916_p2, %p5910_p13 }
  0x22   : > { %v253_v28 = vld [vmem:[%s6057_s11 + $0xd8] sm:$0xff]  ;;  %v254_v29 = vld [vmem:[%s6057_s11 + $0xe0] sm:$0xff]  ;;  %v255_v30 = vld [vmem:[%s6057_s11 + $0xe8] sm:$0xff] }
  0x23   : > { %4967 = vmatmul.mubr.msk.f32.gmra.mxu0 %vm362_vm1, %v231_v6  ;;  %v256_v31 = vld [vmem:[%s6057_s11 + $0xf0] sm:$0xff]  ;;  %v257_v32 = vld [vmem:[%s6057_s11 + $0xf8] sm:$0xff]  ;;  %v258_v33 = vld [vmem:[%s6057_s11 + $0x100] sm:$0xff] }
  0x24   : > { %4969 = vmatprep.mubr.msk.f32.mxu0 %vm362_vm1, %v232_v7  ;;  %v259_v34 = vld [vmem:[%s6057_s11 + $0x108] sm:$0xff]  ;;  %v260_v35 = vld [vmem:[%s6057_s11 + $0x110] sm:$0xff]  ;;  %v261_v37 = vld [vmem:[%s6057_s11 + $0x118] sm:$0xff] }
  0x25   : > { %v262_v39 = vld [vmem:[%s6057_s11 + $0x120] sm:$0xff]  ;;  %v263_v41 = vld [vmem:[%s6057_s11 + $0x128] sm:$0xff]  ;;  %v264_v43 = vld [vmem:[%s6057_s11 + $0x130] sm:$0xff] }
  0x26   : > { %v265_v44 = vld [vmem:[%s6057_s11 + $0x138] sm:$0xff]  ;;  %v266_v45 = vld [vmem:[%s6057_s11 + $0x140] sm:$0xff]  ;;  %v267_v46 = vld [vmem:[%s6057_s11 + $0x148] sm:$0xff] }
  0x27   : > { %4970 = vmatmul.mubr.msk.f32.gmra.mxu0 %vm362_vm1, %v233_v8  ;;  %v268_v47 = vld [vmem:[%s6057_s11 + $0x150] sm:$0xff]  ;;  %v269_v48 = vld [vmem:[%s6057_s11 + $0x158] sm:$0xff]  ;;  %v270_v49 = vld [vmem:[%s6057_s11 + $0x160] sm:$0xff] }
  0x28   : > { %4972 = vmatprep.mubr.msk.f32.mxu0 %vm362_vm1, %v234_v9  ;;  %v271_v50 = vld [vmem:[%s6057_s11 + $0x168] sm:$0xff]  ;;  %v272_v51 = vld [vmem:[%s6057_s11 + $0x170] sm:$0xff]  ;;  %v273_v52 = vld [vmem:[%s6057_s11 + $0x178] sm:$0xff] }
  0x29   : > { %v274_v53 = vld [vmem:[%s6057_s11 + $0x180] sm:$0xff]  ;;  %v275_v54 = vld [vmem:[%s6057_s11 + $0x188] sm:$0xff]  ;;  %v276_v55 = vld [vmem:[%s6057_s11 + $0x190] sm:$0xff] }
  0x2a   : > { %v277_v56 = vld [vmem:[%s6057_s11 + $0x198] sm:$0xff]  ;;  %v278_v57 = vld [vmem:[%s6057_s11 + $0x1a0] sm:$0xff]  ;;  %v279_v58 = vld [vmem:[%s6057_s11 + $0x1a8] sm:$0xff] }
  0x2b   : > { %4973 = vmatmul.mubr.msk.f32.gmra.mxu0 %vm362_vm1, %v235_v10  ;;  %v280_v59 = vld [vmem:[%s6057_s11 + $0x1b0] sm:$0xff]  ;;  %v281_v60 = vld [vmem:[%s6057_s11 + $0x1b8] sm:$0xff]  ;;  %v282_v61 = vld [vmem:[%s6057_s11 + $0x1c0] sm:$0xff] }
  0x2c   : > { %4975 = vmatprep.mubr.msk.f32.mxu0 %vm362_vm1, %v236_v11  ;;  %v283_v62 = vld [vmem:[%s6057_s11 + $0x1c8] sm:$0xff]  ;;  %v284_v63 = vld [vmem:[%s6057_s11 + $0x1d0] sm:$0xff]  ;;  %v285_v0 = vld [vmem:[%s6057_s11 + $0x1d8] sm:$0xff] }
  0x2d   : > { %v286_v1 = vld [vmem:[%s6057_s11 + $0x1e0] sm:$0xff]  ;;  %v287_v2 = vld [vmem:[%s6057_s11 + $0x1e8] sm:$0xff]  ;;  %v288_v3 = vld [vmem:[%s6057_s11 + $0x1f0] sm:$0xff] }
  0x2e   : > { %v289_v4 = vld [vmem:[%s6057_s11 + $0x1f8] sm:$0xff]  ;;  %v290_v5 = vld [vmem:[%s6057_s11 + $0x200] sm:$0xff]  ;;  %v291_v6 = vld [vmem:[%s6057_s11 + $0x208] sm:$0xff] }
  0x2f   : > { %4976 = vmatmul.mubr.msk.f32.gmra.mxu0 %vm362_vm1, %v237_v12  ;;  %v292_v7 = vld [vmem:[%s6057_s11 + $0x210] sm:$0xff]  ;;  %v293_v8 = vld [vmem:[%s6057_s11 + $0x218] sm:$0xff]  ;;  %v294_v9 = vld [vmem:[%s6057_s11 + $0x220] sm:$0xff] }
  0x30   : > { %4978 = vmatprep.mubr.msk.f32.mxu0 %vm362_vm1, %v238_v13  ;;  %v295_v10 = vld [vmem:[%s6057_s11 + $0x228] sm:$0xff]  ;;  %v296_v11 = vld [vmem:[%s6057_s11 + $0x230] sm:$0xff]  ;;  %v297_v12 = vld [vmem:[%s6057_s11 + $0x238] sm:$0xff] }
  0x31   : > { %v298_v13 = vld [vmem:[%s6057_s11 + $0x240] sm:$0xff]  ;;  %v321_v36 = vld [vmem:[%s6057_s11 + $0x2f8] sm:$0xff]  ;;  %v323_v38 = vld [vmem:[%s6057_s11 + $0x308] sm:$0xff] }
  0x32   : > { %v6270_v40 = vld [vmem:[%s8463_s2] ss:$0 sm:$0xff]  ;;  %v325_v42 = vld [vmem:[%s6057_s11 + $0x318] sm:$0xff] }
  0x33   : > { %4979 = vmatmul.mubr.msk.f32.gmra.mxu0 %vm362_vm1, %v239_v14  ;;  %v299_v14 = vld [vmem:[%s6057_s11 + $0x248] sm:$0xff] }
  0x34   : > { %4981 = vmatprep.mubr.msk.f32.mxu0 %vm362_vm1, %v240_v15  ;;  %v300_v15 = vld [vmem:[%s6057_s11 + $0x250] sm:$0xff] }
  0x37   : > { %4982 = vmatmul.mubr.msk.f32.gmra.mxu0 %vm362_vm1, %v241_v16  ;;  %v301_v16 = vld [vmem:[%s6057_s11 + $0x258] sm:$0xff] }
  0x38   : > { %4984 = vmatprep.mubr.msk.f32.mxu0 %vm362_vm1, %v242_v17  ;;  %v302_v17 = vld [vmem:[%s6057_s11 + $0x260] sm:$0xff] }
  0x3b   : > { %4985 = vmatmul.mubr.msk.f32.gmra.mxu0 %vm362_vm1, %v243_v18  ;;  %v303_v18 = vld [vmem:[%s6057_s11 + $0x268] sm:$0xff] }
  0x3c   : > { %4987 = vmatprep.mubr.msk.f32.mxu0 %vm362_vm1, %v244_v19  ;;  %v304_v19 = vld [vmem:[%s6057_s11 + $0x270] sm:$0xff] }
  0x3f   : > { %4988 = vmatmul.mubr.msk.f32.gmra.mxu0 %vm362_vm1, %v245_v20  ;;  %v305_v20 = vld [vmem:[%s6057_s11 + $0x278] sm:$0xff] }
  0x40   : > { %4990 = vmatprep.mubr.msk.f32.mxu0 %vm362_vm1, %v246_v21  ;;  %v306_v21 = vld [vmem:[%s6057_s11 + $0x280] sm:$0xff] }
  0x43   : > { %4991 = vmatmul.mubr.msk.f32.gmra.mxu0 %vm362_vm1, %v247_v22  ;;  %v307_v22 = vld [vmem:[%s6057_s11 + $0x288] sm:$0xff] }
  0x44   : > { %4993 = vmatprep.mubr.msk.f32.mxu0 %vm362_vm1, %v248_v23  ;;  %v308_v23 = vld [vmem:[%s6057_s11 + $0x290] sm:$0xff] }
  0x47   : > { %4994 = vmatmul.mubr.msk.f32.gmra.mxu0 %vm362_vm1, %v249_v24  ;;  %v309_v24 = vld [vmem:[%s6057_s11 + $0x298] sm:$0xff] }
  0x48   : > { %4996 = vmatprep.mubr.msk.f32.mxu0 %vm362_vm1, %v250_v25  ;;  %v310_v25 = vld [vmem:[%s6057_s11 + $0x2a0] sm:$0xff] }
  0x4b   : > { %4997 = vmatmul.mubr.msk.f32.gmra.mxu0 %vm362_vm1, %v251_v26  ;;  %v311_v26 = vld [vmem:[%s6057_s11 + $0x2a8] sm:$0xff] }
  0x4c   : > { %4999 = vmatprep.mubr.msk.f32.mxu0 %vm362_vm1, %v252_v27  ;;  %v312_v27 = vld [vmem:[%s6057_s11 + $0x2b0] sm:$0xff] }
  0x4f   : > { %5000 = vmatmul.mubr.msk.f32.gmra.mxu0 %vm362_vm1, %v253_v28  ;;  %v313_v28 = vld [vmem:[%s6057_s11 + $0x2b8] sm:$0xff] }
  0x50   : > { %5002 = vmatprep.mubr.msk.f32.mxu0 %vm362_vm1, %v254_v29  ;;  %v314_v29 = vld [vmem:[%s6057_s11 + $0x2c0] sm:$0xff] }
  0x53   : > { %5003 = vmatmul.mubr.msk.f32.gmra.mxu0 %vm362_vm1, %v255_v30  ;;  %v315_v30 = vld [vmem:[%s6057_s11 + $0x2c8] sm:$0xff] }
  0x54   : > { %5005 = vmatprep.mubr.msk.f32.mxu0 %vm362_vm1, %v256_v31  ;;  %v316_v31 = vld [vmem:[%s6057_s11 + $0x2d0] sm:$0xff] }
  0x57   : > { %5006 = vmatmul.mubr.msk.f32.gmra.mxu0 %vm362_vm1, %v257_v32  ;;  %v317_v32 = vld [vmem:[%s6057_s11 + $0x2d8] sm:$0xff] }
  0x58   : > { %5008 = vmatprep.mubr.msk.f32.mxu0 %vm362_vm1, %v258_v33  ;;  %v318_v33 = vld [vmem:[%s6057_s11 + $0x2e0] sm:$0xff] }
  0x5b   : > { %5009 = vmatmul.mubr.msk.f32.gmra.mxu0 %vm362_vm1, %v259_v34  ;;  %v319_v34 = vld [vmem:[%s6057_s11 + $0x2e8] sm:$0xff] }
  0x5c   : > { %5011 = vmatprep.mubr.msk.f32.mxu0 %vm362_vm1, %v260_v35  ;;  %v320_v35 = vld [vmem:[%s6057_s11 + $0x2f0] sm:$0xff] }
  0x5f   : > { %5012 = vmatmul.mubr.msk.f32.gmra.mxu0 %vm362_vm1, %v261_v37  ;;  %v322_v37 = vld [vmem:[%s6057_s11 + $0x300] sm:$0xff] }
  0x60   : > { %5014 = vmatprep.mubr.msk.f32.mxu0 %vm362_vm1, %v262_v39  ;;  %v324_v39 = vld [vmem:[%s6057_s11 + $0x310] sm:$0xff] }
  0x63   : > { %5015 = vmatmul.mubr.msk.f32.gmra.mxu0 %vm362_vm1, %v263_v41 }
  0x64   : > { %5017 = vmatprep.mubr.msk.f32.mxu0 %vm362_vm1, %v264_v43 }
  0x67   : > { %5018 = vmatmul.mubr.msk.f32.gmra.mxu0 %vm362_vm1, %v265_v44 }
  0x68   : > { %5020 = vmatprep.mubr.msk.f32.mxu0 %vm362_vm1, %v266_v45  ;;  %v326_v45 = vld [vmem:[%s6057_s11 + $0x320] sm:$0xff] }
  0x6b   : > { %5021 = vmatmul.mubr.msk.f32.gmra.mxu0 %vm362_vm1, %v267_v46 }
  0x6c   : > { %5023 = vmatprep.mubr.msk.f32.mxu0 %vm362_vm1, %v268_v47 }
  0x6f   : > { %5024 = vmatmul.mubr.msk.f32.gmra.mxu0 %vm362_vm1, %v269_v48 }
  0x70   : > { %5026 = vmatprep.mubr.msk.f32.mxu0 %vm362_vm1, %v270_v49  ;;  %v327_v49 = vld [vmem:[%s6057_s11 + $0x328] sm:$0xff] }
  0x73   : > { %5027 = vmatmul.mubr.msk.f32.gmra.mxu0 %vm362_vm1, %v271_v50 }
  0x74   : > { %5029 = vmatprep.mubr.msk.f32.mxu0 %vm362_vm1, %v272_v51 }
  0x77   : > { %5030 = vmatmul.mubr.msk.f32.gmra.mxu0 %vm362_vm1, %v273_v52 }
  0x78   : > { %5032 = vmatprep.mubr.msk.f32.mxu0 %vm362_vm1, %v274_v53  ;;  %v328_v53 = vld [vmem:[%s6057_s11 + $0x330] sm:$0xff] }
  0x7b   : > { %5033 = vmatmul.mubr.msk.f32.gmra.mxu0 %vm362_vm1, %v275_v54 }
  0x7c   : > { %5035 = vmatprep.mubr.msk.f32.mxu0 %vm362_vm1, %v276_v55 }
  0x7f   : > { %5036 = vmatmul.mubr.msk.f32.gmra.mxu0 %vm362_vm1, %v277_v56 }
  0x80   : > { %5038 = vmatprep.mubr.msk.f32.mxu0 %vm362_vm1, %v278_v57 }
  0x83   : > { %5039 = vmatmul.mubr.msk.f32.gmra.mxu0 %vm362_vm1, %v279_v58  ;;  %v329_v58 = vld [vmem:[%s6057_s11 + $0x338] sm:$0xff] }
  0x84   : > { %5041 = vmatprep.mubr.msk.f32.mxu0 %vm362_vm1, %v280_v59 }
  0x87   : > { %5042 = vmatmul.mubr.msk.f32.gmra.mxu0 %vm362_vm1, %v281_v60 }
  0x88   : > { %5044 = vmatprep.mubr.msk.f32.mxu0 %vm362_vm1, %v282_v61  ;;  %v330_v61 = vld [vmem:[%s6057_s11 + $0x340] sm:$0xff] }
  0x8b   : > { %5045 = vmatmul.mubr.msk.f32.gmra.mxu0 %vm362_vm1, %v283_v62 }
  0x8c   : > { %5047 = vmatprep.mubr.msk.f32.mxu0 %vm362_vm1, %v284_v63 }
  0x8f   : > { %5048 = vmatmul.mubr.msk.f32.gmra.mxu0 %vm362_vm1, %v285_v0 }
  0x90   : > { %5050 = vmatprep.mubr.msk.f32.mxu0 %vm362_vm1, %v286_v1 }
  0x93   : > { %5051 = vmatmul.mubr.msk.f32.gmra.mxu0 %vm362_vm1, %v287_v2 }
  0x94   : > { %5053 = vmatprep.mubr.msk.f32.mxu0 %vm362_vm1, %v288_v3  ;;  %v331_v3 = vld [vmem:[%s6057_s11 + $0x348] sm:$0xff] }
  0x97   : > { %5054 = vmatmul.mubr.msk.f32.gmra.mxu0 %vm362_vm1, %v289_v4 }
  0x98   : > { %5056 = vmatprep.mubr.msk.f32.mxu0 %vm362_vm1, %v290_v5  ;;  %v332_v5 = vld [vmem:[%s6057_s11 + $0x350] sm:$0xff] }
  0x9b   : > { %5057 = vmatmul.mubr.msk.f32.gmra.mxu0 %vm362_vm1, %v291_v6 }
  0x9c   : > { %5059 = vmatprep.mubr.msk.f32.mxu0 %vm362_vm1, %v292_v7 }
  0x9f   : > { %5060 = vmatmul.mubr.msk.f32.gmra.mxu0 %vm362_vm1, %v293_v8 }
  0xa0   : > { %5062 = vmatprep.mubr.msk.f32.mxu0 %vm362_vm1, %v294_v9 }
  0xa3   : > { %5063 = vmatmul.mubr.msk.f32.gmra.mxu0 %vm362_vm1, %v295_v10 }
  0xa4   : > { %5065 = vmatprep.mubr.msk.f32.mxu0 %vm362_vm1, %v296_v11  ;;  %v333_v11 = vld [vmem:[%s6057_s11 + $0x358] sm:$0xff] }
  0xa7   : > { %5066 = vmatmul.mubr.msk.f32.gmra.mxu0 %vm362_vm1, %v297_v12 }
  0xa8   : > { %5068 = vmatprep.mubr.msk.f32.mxu0 %vm362_vm1, %v298_v13  ;;  %v334_v13 = vld [vmem:[%s6057_s11 + $0x360] sm:$0xff] }
  0xab   : > { %5069 = vmatmul.mubr.msk.f32.gmra.mxu0 %vm362_vm1, %v299_v14 }
  0xac   : > { %5071 = vmatprep.mubr.msk.f32.mxu0 %vm362_vm1, %v300_v15 }
  0xaf   : > { %5072 = vmatmul.mubr.msk.f32.gmra.mxu0 %vm362_vm1, %v301_v16 }
  0xb0   : > { %5074 = vmatprep.mubr.msk.f32.mxu0 %vm362_vm1, %v302_v17 }
  0xb3   : > { %5075 = vmatmul.mubr.msk.f32.gmra.mxu0 %vm362_vm1, %v303_v18 }
  0xb4   : > { %5077 = vmatprep.mubr.msk.f32.mxu0 %vm362_vm1, %v304_v19  ;;  %v335_v19 = vld [vmem:[%s6057_s11 + $0x368] sm:$0xff] }
  0xb7   : > { %5078 = vmatmul.mubr.msk.f32.gmra.mxu0 %vm362_vm1, %v305_v20 }
  0xb8   : > { %5080 = vmatprep.mubr.msk.f32.mxu0 %vm362_vm1, %v306_v21  ;;  %v336_v21 = vld [vmem:[%s6057_s11 + $0x370] sm:$0xff] }
  0xbb   : > { %5081 = vmatmul.mubr.msk.f32.gmra.mxu0 %vm362_vm1, %v307_v22 }
  0xbc   : > { %5083 = vmatprep.mubr.msk.f32.mxu0 %vm362_vm1, %v308_v23 }
  0xbf   : > { %5084 = vmatmul.mubr.msk.f32.gmra.mxu0 %vm362_vm1, %v309_v24 }
  0xc0   : > { %5086 = vmatprep.mubr.msk.f32.mxu0 %vm362_vm1, %v310_v25 }
  0xc3   : > { %5087 = vmatmul.mubr.msk.f32.gmra.mxu0 %vm362_vm1, %v311_v26 }
  0xc4   : > { %5089 = vmatprep.mubr.msk.f32.mxu0 %vm362_vm1, %v312_v27  ;;  %v337_v27 = vld [vmem:[%s6057_s11 + $0x378] sm:$0xff] }
  0xc7   : > { %5090 = vmatmul.mubr.msk.f32.gmra.mxu0 %vm362_vm1, %v313_v28 }
  0xc8   : > { %5092 = vmatprep.mubr.msk.f32.mxu0 %vm362_vm1, %v314_v29  ;;  %v338_v29 = vld [vmem:[%s6057_s11 + $0x380] sm:$0xff] }
  0xcb   : > { %5093 = vmatmul.mubr.msk.f32.gmra.mxu0 %vm362_vm1, %v315_v30 }
  0xcc   : > { %5095 = vmatprep.mubr.msk.f32.mxu0 %vm362_vm1, %v316_v31 }
  0xcf   : > { %5096 = vmatmul.mubr.msk.f32.gmra.mxu0 %vm362_vm1, %v317_v32 }
  0xd0   : > { %5098 = vmatprep.mubr.msk.f32.mxu0 %vm362_vm1, %v318_v33 }
  0xd3   : > { %5099 = vmatmul.mubr.msk.f32.gmra.mxu0 %vm362_vm1, %v319_v34 }
  0xd4   : > { %5101 = vmatprep.mubr.msk.f32.mxu0 %vm362_vm1, %v320_v35  ;;  %v339_v35 = vld [vmem:[%s6057_s11 + $0x388] sm:$0xff] }
  0xd7   : > { %5102 = vmatmul.mubr.msk.f32.gmra.mxu0 %vm362_vm1, %v321_v36 }
  0xd8   : > { %5104 = vmatprep.mubr.msk.f32.mxu0 %vm362_vm1, %v322_v37  ;;  %v340_v37 = vld [vmem:[%s6057_s11 + $0x390] sm:$0xff] }
  0xdb   : > { %v4962_v41 = vpop.f32.mrf.mxu0  ;;  %5105 = vmatmul.mubr.msk.f32.gmra.mxu0 %vm362_vm1, %v323_v38 }
  0xdc   : > { %5107 = vmatprep.mubr.msk.f32.mxu0 %vm362_vm1, %v324_v39  ;;  %v823_v43 = vadd.f32 %v4962_v41, %v6270_v40 }
  0xdd   : > { %v817_v44 = vpop.f32.mrf.mxu0 }
  0xde   : > { %v818_v46 = vadd.f32 %v6270_v40, %v817_v44  ;;  %v1457_v50 = vmax.f32 %v823_v43, 0.0  ;;  %v341_v44 = vld [vmem:[%s6057_s11 + $0x398] sm:$0xff] }
  0xdf   : > { %v4965_v47 = vpop.f32.mrf.mxu0  ;;  %5108 = vmatmul.mubr.msk.f32.gmra.mxu0 %vm362_vm1, %v325_v42 }
  0xe0   : > { %v1456_v48 = vmax.f32 %v818_v46, 0.0  ;;  %5110 = vmatprep.mubr.msk.f32.mxu0 %vm362_vm1, %v326_v45  ;;  %v833_v51 = vadd.f32 %v4965_v47, %v6270_v40  ;;  %v342_v46 = vld [vmem:[%s6057_s11 + $0x3a0] sm:$0xff] }
  0xe1   : > { %v827_v52 = vpop.f32.mrf.mxu0 }
  0xe2   : > { %v828_v54 = vadd.f32 %v6270_v40, %v827_v52  ;;  %5160 = vmatprep.mubr.msk.f32.mxu1 %vm1595_vm2, %v1456_v48  ;;  %v1459_v59 = vmax.f32 %v833_v51, 0.0  ;;  %v343_v52 = vld [vmem:[%s6057_s11 + $0x3a8] sm:$0xff] }
  0xe3   : > { %v4968_v55 = vpop.f32.mrf.mxu0  ;;  %5161 = vmatmul.mubr.msk.f32.vlgmr.msra.gmra.mxu1 %vm1595_vm2, %v1457_v50  ;;  %5111 = vmatmul.mubr.msk.f32.gmra.mxu0 %vm362_vm1, %v327_v49 }
  0xe4   : > { %v1458_v56 = vmax.f32 %v828_v54, 0.0  ;;  %v843_v57 = vadd.f32 %v4968_v55, %v6270_v40  ;;  %5113 = vmatprep.mubr.msk.f32.mxu0 %vm362_vm1, %v328_v53  ;;  %v344_v54 = vld [vmem:[%s6057_s11 + $0x3b0] sm:$0xff] }
  0xe5   : > { %v837_v60 = vpop.f32.mrf.mxu0 }
  0xe6   : > { %v838_v62 = vadd.f32 %v6270_v40, %v837_v60  ;;  %5163 = vmatprep.mubr.msk.f32.mxu1 %vm1595_vm2, %v1458_v56  ;;  %v1461_v63 = vmax.f32 %v843_v57, 0.0  ;;  %v345_v60 = vld [vmem:[%s6057_s11 + $0x3b8] sm:$0xff] }
  0xe7   : > { %v4971_v0 = vpop.f32.mrf.mxu0  ;;  %5164 = vmatmul.mubr.msk.f32.gmra.mxu1 %vm1595_vm2, %v1459_v59  ;;  %5114 = vmatmul.mubr.msk.f32.gmra.mxu0 %vm362_vm1, %v329_v58 }
  0xe8   : > { %v1460_v1 = vmax.f32 %v838_v62, 0.0  ;;  %v853_v2 = vadd.f32 %v4971_v0, %v6270_v40  ;;  %5116 = vmatprep.mubr.msk.f32.mxu0 %vm362_vm1, %v330_v61  ;;  %v346_v62 = vld [vmem:[%s6057_s11 + $0x3c0] sm:$0xff] }
  0xe9   : > { %v847_v4 = vpop.f32.mrf.mxu0 }
  0xea   : > { %v848_v6 = vadd.f32 %v6270_v40, %v847_v4  ;;  %5166 = vmatprep.mubr.msk.f32.mxu1 %vm1595_vm2, %v1460_v1  ;;  %v1463_v7 = vmax.f32 %v853_v2, 0.0  ;;  %v347_v4 = vld [vmem:[%s6057_s11 + $0x3c8] sm:$0xff] }
  0xeb   : > { %v4974_v8 = vpop.f32.mrf.mxu0  ;;  %5167 = vmatmul.mubr.msk.f32.gmra.mxu1 %vm1595_vm2, %v1461_v63  ;;  %5117 = vmatmul.mubr.msk.f32.gmra.mxu0 %vm362_vm1, %v331_v3 }
  0xec   : > { %v1462_v9 = vmax.f32 %v848_v6, 0.0  ;;  %v863_v10 = vadd.f32 %v4974_v8, %v6270_v40  ;;  %5119 = vmatprep.mubr.msk.f32.mxu0 %vm362_vm1, %v332_v5  ;;  %v348_v6 = vld [vmem:[%s6057_s11 + $0x3d0] sm:$0xff] }
  0xed   : > { %v857_v12 = vpop.f32.mrf.mxu0 }
  0xee   : > { %v858_v14 = vadd.f32 %v6270_v40, %v857_v12  ;;  %5169 = vmatprep.mubr.msk.f32.mxu1 %vm1595_vm2, %v1462_v9  ;;  %v1465_v15 = vmax.f32 %v863_v10, 0.0  ;;  %v349_v12 = vld [vmem:[%s6057_s11 + $0x3d8] sm:$0xff] }
  0xef   : > { %v4977_v16 = vpop.f32.mrf.mxu0  ;;  %5170 = vmatmul.mubr.msk.f32.gmra.mxu1 %vm1595_vm2, %v1463_v7  ;;  %5120 = vmatmul.mubr.msk.f32.gmra.mxu0 %vm362_vm1, %v333_v11 }
  0xf0   : > { %v1464_v17 = vmax.f32 %v858_v14, 0.0  ;;  %v873_v18 = vadd.f32 %v4977_v16, %v6270_v40  ;;  %5122 = vmatprep.mubr.msk.f32.mxu0 %vm362_vm1, %v334_v13  ;;  %v350_v14 = vld [vmem:[%s6057_s11 + $0x3e0] sm:$0xff] }
  0xf1   : > { %v867_v20 = vpop.f32.mrf.mxu0 }
  0xf2   : > { %v868_v22 = vadd.f32 %v6270_v40, %v867_v20  ;;  %5172 = vmatprep.mubr.msk.f32.mxu1 %vm1595_vm2, %v1464_v17  ;;  %v1467_v23 = vmax.f32 %v873_v18, 0.0  ;;  %v351_v20 = vld [vmem:[%s6057_s11 + $0x3e8] sm:$0xff] }
  0xf3   : > { %v4980_v24 = vpop.f32.mrf.mxu0  ;;  %5173 = vmatmul.mubr.msk.f32.gmra.mxu1 %vm1595_vm2, %v1465_v15  ;;  %5123 = vmatmul.mubr.msk.f32.gmra.mxu0 %vm362_vm1, %v335_v19 }
  0xf4   : > { %v1466_v25 = vmax.f32 %v868_v22, 0.0  ;;  %v883_v26 = vadd.f32 %v4980_v24, %v6270_v40  ;;  %5125 = vmatprep.mubr.msk.f32.mxu0 %vm362_vm1, %v336_v21  ;;  %v352_v22 = vld [vmem:[%s6057_s11 + $0x3f0] sm:$0xff] }
  0xf5   : > { %v877_v28 = vpop.f32.mrf.mxu0 }
  0xf6   : > { %v878_v30 = vadd.f32 %v6270_v40, %v877_v28  ;;  %5175 = vmatprep.mubr.msk.f32.mxu1 %vm1595_vm2, %v1466_v25  ;;  %v1469_v31 = vmax.f32 %v883_v26, 0.0  ;;  %v353_v28 = vld [vmem:[%s6057_s11 + $0x3f8] sm:$0xff] }
  0xf7   : > { %v4983_v32 = vpop.f32.mrf.mxu0  ;;  %5176 = vmatmul.mubr.msk.f32.gmra.mxu1 %vm1595_vm2, %v1467_v23  ;;  %5126 = vmatmul.mubr.msk.f32.gmra.mxu0 %vm362_vm1, %v337_v27 }
  0xf8   : > { %v1468_v33 = vmax.f32 %v878_v30, 0.0  ;;  %v893_v34 = vadd.f32 %v4983_v32, %v6270_v40  ;;  %5128 = vmatprep.mubr.msk.f32.mxu0 %vm362_vm1, %v338_v29 }
  0xf9   : > { %v887_v36 = vpop.f32.mrf.mxu0 }
  0xfa   : > { %v888_v38 = vadd.f32 %v6270_v40, %v887_v36  ;;  %5178 = vmatprep.mubr.msk.f32.mxu1 %vm1595_vm2, %v1468_v33  ;;  %v1471_v39 = vmax.f32 %v893_v34, 0.0 }
  0xfb   : > { %v4986_v41 = vpop.f32.mrf.mxu0  ;;  %5179 = vmatmul.mubr.msk.f32.gmra.mxu1 %vm1595_vm2, %v1469_v31  ;;  %5129 = vmatmul.mubr.msk.f32.gmra.mxu0 %vm362_vm1, %v339_v35 }
  0xfc   : > { %v1470_v42 = vmax.f32 %v888_v38, 0.0  ;;  %v903_v43 = vadd.f32 %v4986_v41, %v6270_v40  ;;  %5131 = vmatprep.mubr.msk.f32.mxu0 %vm362_vm1, %v340_v37 }
  0xfd   : > { %v897_v45 = vpop.f32.mrf.mxu0 }
  0xfe   : > { %v898_v47 = vadd.f32 %v6270_v40, %v897_v45  ;;  %5181 = vmatprep.mubr.msk.f32.mxu1 %vm1595_vm2, %v1470_v42  ;;  %v1473_v48 = vmax.f32 %v903_v43, 0.0 }
  0xff   : > { %v4989_v49 = vpop.f32.mrf.mxu0  ;;  %5182 = vmatmul.mubr.msk.f32.gmra.mxu1 %vm1595_vm2, %v1471_v39  ;;  %5132 = vmatmul.mubr.msk.f32.gmra.mxu0 %vm362_vm1, %v341_v44 }
 0x100   : > { %v1472_v50 = vmax.f32 %v898_v47, 0.0  ;;  %v913_v51 = vadd.f32 %v4989_v49, %v6270_v40  ;;  %5134 = vmatprep.mubr.msk.f32.mxu0 %vm362_vm1, %v342_v46 }
 0x101   : > { %v907_v53 = vpop.f32.mrf.mxu0 }
 0x102   : > { %v908_v55 = vadd.f32 %v6270_v40, %v907_v53  ;;  %5184 = vmatprep.mubr.msk.f32.mxu1 %vm1595_vm2, %v1472_v50  ;;  %v1475_v56 = vmax.f32 %v913_v51, 0.0 }
 0x103   : > { %v4992_v57 = vpop.f32.mrf.mxu0  ;;  %5185 = vmatmul.mubr.msk.f32.gmra.mxu1 %vm1595_vm2, %v1473_v48  ;;  %5135 = vmatmul.mubr.msk.f32.gmra.mxu0 %vm362_vm1, %v343_v52 }
 0x104   : > { %v1474_v58 = vmax.f32 %v908_v55, 0.0  ;;  %v923_v59 = vadd.f32 %v4992_v57, %v6270_v40  ;;  %5137 = vmatprep.mubr.msk.f32.mxu0 %vm362_vm1, %v344_v54 }
 0x105   : > { %v917_v61 = vpop.f32.mrf.mxu0 }
 0x106   : > { %v918_v63 = vadd.f32 %v6270_v40, %v917_v61  ;;  %5187 = vmatprep.mubr.msk.f32.mxu1 %vm1595_vm2, %v1474_v58  ;;  %v1477_v0 = vmax.f32 %v923_v59, 0.0 }
 0x107   : > { %v4995_v1 = vpop.f32.mrf.mxu0  ;;  %5188 = vmatmul.mubr.msk.f32.gmra.mxu1 %vm1595_vm2, %v1475_v56  ;;  %5138 = vmatmul.mubr.msk.f32.gmra.mxu0 %vm362_vm1, %v345_v60 }
 0x108   : > { %v1476_v2 = vmax.f32 %v918_v63, 0.0  ;;  %v933_v3 = vadd.f32 %v4995_v1, %v6270_v40  ;;  %5140 = vmatprep.mubr.msk.f32.mxu0 %vm362_vm1, %v346_v62 }
 0x109   : > { %v927_v5 = vpop.f32.mrf.mxu0 }
 0x10a   : > { %v928_v7 = vadd.f32 %v6270_v40, %v927_v5  ;;  %5190 = vmatprep.mubr.msk.f32.mxu1 %vm1595_vm2, %v1476_v2  ;;  %v1479_v8 = vmax.f32 %v933_v3, 0.0 }
 0x10b   : > { %v4998_v9 = vpop.f32.mrf.mxu0  ;;  %5191 = vmatmul.mubr.msk.f32.gmra.mxu1 %vm1595_vm2, %v1477_v0  ;;  %5141 = vmatmul.mubr.msk.f32.gmra.mxu0 %vm362_vm1, %v347_v4 }
 0x10c   : > { %v1478_v10 = vmax.f32 %v928_v7, 0.0  ;;  %v943_v11 = vadd.f32 %v4998_v9, %v6270_v40  ;;  %5143 = vmatprep.mubr.msk.f32.mxu0 %vm362_vm1, %v348_v6 }
 0x10d   : > { %v937_v13 = vpop.f32.mrf.mxu0 }
 0x10e   : > { %v938_v15 = vadd.f32 %v6270_v40, %v937_v13  ;;  %5193 = vmatprep.mubr.msk.f32.mxu1 %vm1595_vm2, %v1478_v10  ;;  %v1481_v16 = vmax.f32 %v943_v11, 0.0 }
 0x10f   : > { %v5001_v17 = vpop.f32.mrf.mxu0  ;;  %5194 = vmatmul.mubr.msk.f32.gmra.mxu1 %vm1595_vm2, %v1479_v8  ;;  %5144 = vmatmul.mubr.msk.f32.gmra.mxu0 %vm362_vm1, %v349_v12 }
 0x110   : > { %v1480_v18 = vmax.f32 %v938_v15, 0.0  ;;  %v953_v19 = vadd.f32 %v5001_v17, %v6270_v40  ;;  %5146 = vmatprep.mubr.msk.f32.mxu0 %vm362_vm1, %v350_v14 }
 0x111   : > { %v947_v21 = vpop.f32.mrf.mxu0 }
 0x112   : > { %v948_v23 = vadd.f32 %v6270_v40, %v947_v21  ;;  %5196 = vmatprep.mubr.msk.f32.mxu1 %vm1595_vm2, %v1480_v18  ;;  %v1483_v24 = vmax.f32 %v953_v19, 0.0 }
 0x113   : > { %v5004_v25 = vpop.f32.mrf.mxu0  ;;  %5197 = vmatmul.mubr.msk.f32.gmra.mxu1 %vm1595_vm2, %v1481_v16  ;;  %5147 = vmatmul.mubr.msk.f32.gmra.mxu0 %vm362_vm1, %v351_v20 }
 0x114   : > { %v1482_v26 = vmax.f32 %v948_v23, 0.0  ;;  %v963_v27 = vadd.f32 %v5004_v25, %v6270_v40  ;;  %5149 = vmatprep.mubr.msk.f32.mxu0 %vm362_vm1, %v352_v22 }
 0x115   : > { %v957_v29 = vpop.f32.mrf.mxu0 }
 0x116   : > { %v958_v30 = vadd.f32 %v6270_v40, %v957_v29  ;;  %5199 = vmatprep.mubr.msk.f32.mxu1 %vm1595_vm2, %v1482_v26  ;;  %v1485_v31 = vmax.f32 %v963_v27, 0.0 }
 0x117   : > { %v5007_v32 = vpop.f32.mrf.mxu0  ;;  %5200 = vmatmul.mubr.msk.f32.gmra.mxu1 %vm1595_vm2, %v1483_v24  ;;  %5150 = vmatmul.mubr.msk.f32.gmra.mxu0 %vm362_vm1, %v353_v28 }
 0x118   : > { %v1484_v33 = vmax.f32 %v958_v30, 0.0  ;;  %v973_v34 = vadd.f32 %v5007_v32, %v6270_v40 }
 0x119   : > { %v967_v35 = vpop.f32.mrf.mxu0 }
 0x11a   : > { %v968_v36 = vadd.f32 %v6270_v40, %v967_v35  ;;  %5202 = vmatprep.mubr.msk.f32.mxu1 %vm1595_vm2, %v1484_v33  ;;  %v1487_v37 = vmax.f32 %v973_v34, 0.0 }
 0x11b   : > { %v5010_v38 = vpop.f32.mrf.mxu0  ;;  %5203 = vmatmul.mubr.msk.f32.gmra.mxu1 %vm1595_vm2, %v1485_v31 }
 0x11c   : > { %v1486_v39 = vmax.f32 %v968_v36, 0.0  ;;  %v983_v41 = vadd.f32 %v5010_v38, %v6270_v40 }
 0x11d   : > { %v977_v42 = vpop.f32.mrf.mxu0 }
 0x11e   : > { %v978_v43 = vadd.f32 %v6270_v40, %v977_v42  ;;  %5205 = vmatprep.mubr.msk.f32.mxu1 %vm1595_vm2, %v1486_v39  ;;  %v1489_v44 = vmax.f32 %v983_v41, 0.0 }
 0x11f   : > { %v5013_v45 = vpop.f32.mrf.mxu0  ;;  %5206 = vmatmul.mubr.msk.f32.gmra.mxu1 %vm1595_vm2, %v1487_v37 }
 0x120   : > { %v1488_v46 = vmax.f32 %v978_v43, 0.0  ;;  %v993_v47 = vadd.f32 %v5013_v45, %v6270_v40 }
 0x121   : > { %v987_v48 = vpop.f32.mrf.mxu0 }
 0x122   : > { %v988_v49 = vadd.f32 %v6270_v40, %v987_v48  ;;  %5208 = vmatprep.mubr.msk.f32.mxu1 %vm1595_vm2, %v1488_v46  ;;  %v1491_v50 = vmax.f32 %v993_v47, 0.0 }
 0x123   : > { %v5016_v51 = vpop.f32.mrf.mxu0  ;;  %5209 = vmatmul.mubr.msk.f32.gmra.mxu1 %vm1595_vm2, %v1489_v44 }
 0x124   : > { %v1490_v52 = vmax.f32 %v988_v49, 0.0  ;;  %v1003_v53 = vadd.f32 %v5016_v51, %v6270_v40 }
 0x125   : > { %v997_v54 = vpop.f32.mrf.mxu0 }
 0x126   : > { %v998_v55 = vadd.f32 %v6270_v40, %v997_v54  ;;  %5211 = vmatprep.mubr.msk.f32.mxu1 %vm1595_vm2, %v1490_v52  ;;  %v1493_v56 = vmax.f32 %v1003_v53, 0.0 }
 0x127   : > { %v5019_v57 = vpop.f32.mrf.mxu0  ;;  %5212 = vmatmul.mubr.msk.f32.gmra.mxu1 %vm1595_vm2, %v1491_v50 }
 0x128   : > { %v1492_v58 = vmax.f32 %v998_v55, 0.0  ;;  %v1013_v59 = vadd.f32 %v5019_v57, %v6270_v40 }
 0x129   : > { %v1007_v60 = vpop.f32.mrf.mxu0 }
 0x12a   : > { %v1008_v61 = vadd.f32 %v6270_v40, %v1007_v60  ;;  %5214 = vmatprep.mubr.msk.f32.mxu1 %vm1595_vm2, %v1492_v58  ;;  %v1495_v62 = vmax.f32 %v1013_v59, 0.0 }
 0x12b   : > { %v5022_v63 = vpop.f32.mrf.mxu0  ;;  %5215 = vmatmul.mubr.msk.f32.gmra.mxu1 %vm1595_vm2, %v1493_v56 }
 0x12c   : > { %v1494_v0 = vmax.f32 %v1008_v61, 0.0  ;;  %v1023_v1 = vadd.f32 %v5022_v63, %v6270_v40 }
 0x12d   : > { %v1017_v2 = vpop.f32.mrf.mxu0 }
 0x12e   : > { %v1018_v3 = vadd.f32 %v6270_v40, %v1017_v2  ;;  %5217 = vmatprep.mubr.msk.f32.mxu1 %vm1595_vm2, %v1494_v0  ;;  %v1497_v4 = vmax.f32 %v1023_v1, 0.0 }
 0x12f   : > { %v5025_v5 = vpop.f32.mrf.mxu0  ;;  %5218 = vmatmul.mubr.msk.f32.gmra.mxu1 %vm1595_vm2, %v1495_v62 }
 0x130   : > { %v1496_v6 = vmax.f32 %v1018_v3, 0.0  ;;  %v1033_v7 = vadd.f32 %v5025_v5, %v6270_v40 }
 0x131   : > { %v1027_v8 = vpop.f32.mrf.mxu0 }
 0x132   : > { %v1028_v9 = vadd.f32 %v6270_v40, %v1027_v8  ;;  %5220 = vmatprep.mubr.msk.f32.mxu1 %vm1595_vm2, %v1496_v6  ;;  %v1499_v10 = vmax.f32 %v1033_v7, 0.0 }
 0x133   : > { %v5028_v11 = vpop.f32.mrf.mxu0  ;;  %5221 = vmatmul.mubr.msk.f32.gmra.mxu1 %vm1595_vm2, %v1497_v4 }
 0x134   : > { %v1498_v12 = vmax.f32 %v1028_v9, 0.0  ;;  %v1043_v13 = vadd.f32 %v5028_v11, %v6270_v40 }
 0x135   : > { %v1037_v14 = vpop.f32.mrf.mxu0 }
 0x136   : > { %v1038_v15 = vadd.f32 %v6270_v40, %v1037_v14  ;;  %5223 = vmatprep.mubr.msk.f32.mxu1 %vm1595_vm2, %v1498_v12  ;;  %v1501_v16 = vmax.f32 %v1043_v13, 0.0 }
 0x137   : > { %v5031_v17 = vpop.f32.mrf.mxu0  ;;  %5224 = vmatmul.mubr.msk.f32.gmra.mxu1 %vm1595_vm2, %v1499_v10 }
 0x138   : > { %v1500_v18 = vmax.f32 %v1038_v15, 0.0  ;;  %v1053_v19 = vadd.f32 %v5031_v17, %v6270_v40 }
 0x139   : > { %v1047_v20 = vpop.f32.mrf.mxu0 }
 0x13a   : > { %v1048_v21 = vadd.f32 %v6270_v40, %v1047_v20  ;;  %5226 = vmatprep.mubr.msk.f32.mxu1 %vm1595_vm2, %v1500_v18  ;;  %v1503_v22 = vmax.f32 %v1053_v19, 0.0 }
 0x13b   : > { %v5034_v23 = vpop.f32.mrf.mxu0  ;;  %5227 = vmatmul.mubr.msk.f32.gmra.mxu1 %vm1595_vm2, %v1501_v16 }
 0x13c   : > { %v1502_v24 = vmax.f32 %v1048_v21, 0.0  ;;  %v1063_v25 = vadd.f32 %v5034_v23, %v6270_v40 }
 0x13d   : > { %v1057_v26 = vpop.f32.mrf.mxu0 }
 0x13e   : > { %v1058_v27 = vadd.f32 %v6270_v40, %v1057_v26  ;;  %5229 = vmatprep.mubr.msk.f32.mxu1 %vm1595_vm2, %v1502_v24  ;;  %v1505_v28 = vmax.f32 %v1063_v25, 0.0 }
 0x13f   : > { %v5037_v29 = vpop.f32.mrf.mxu0  ;;  %5230 = vmatmul.mubr.msk.f32.gmra.mxu1 %vm1595_vm2, %v1503_v22 }
 0x140   : > { %v1504_v30 = vmax.f32 %v1058_v27, 0.0  ;;  %v1073_v31 = vadd.f32 %v5037_v29, %v6270_v40 }
 0x141   : > { %v1067_v32 = vpop.f32.mrf.mxu0 }
 0x142   : > { %v1068_v33 = vadd.f32 %v6270_v40, %v1067_v32  ;;  %5232 = vmatprep.mubr.msk.f32.mxu1 %vm1595_vm2, %v1504_v30  ;;  %v1507_v34 = vmax.f32 %v1073_v31, 0.0 }
 0x143   : > { %v5040_v35 = vpop.f32.mrf.mxu0  ;;  %5233 = vmatmul.mubr.msk.f32.gmra.mxu1 %vm1595_vm2, %v1505_v28 }
 0x144   : > { %v1506_v36 = vmax.f32 %v1068_v33, 0.0  ;;  %v1083_v37 = vadd.f32 %v5040_v35, %v6270_v40 }
 0x145   : > { %v1077_v38 = vpop.f32.mrf.mxu0 }
 0x146   : > { %v1078_v39 = vadd.f32 %v6270_v40, %v1077_v38  ;;  %5235 = vmatprep.mubr.msk.f32.mxu1 %vm1595_vm2, %v1506_v36  ;;  %v1509_v41 = vmax.f32 %v1083_v37, 0.0 }
 0x147   : > { %v5043_v42 = vpop.f32.mrf.mxu0  ;;  %5236 = vmatmul.mubr.msk.f32.gmra.mxu1 %vm1595_vm2, %v1507_v34 }
 0x148   : > { %v1508_v43 = vmax.f32 %v1078_v39, 0.0  ;;  %v1093_v44 = vadd.f32 %v5043_v42, %v6270_v40 }
 0x149   : > { %v1087_v45 = vpop.f32.mrf.mxu0 }
 0x14a   : > { %v1088_v46 = vadd.f32 %v6270_v40, %v1087_v45  ;;  %5238 = vmatprep.mubr.msk.f32.mxu1 %vm1595_vm2, %v1508_v43  ;;  %v1511_v47 = vmax.f32 %v1093_v44, 0.0 }
 0x14b   : > { %v5046_v48 = vpop.f32.mrf.mxu0  ;;  %5239 = vmatmul.mubr.msk.f32.gmra.mxu1 %vm1595_vm2, %v1509_v41 }
 0x14c   : > { %v1510_v49 = vmax.f32 %v1088_v46, 0.0  ;;  %v1103_v50 = vadd.f32 %v5046_v48, %v6270_v40 }
 0x14d   : > { %v1097_v51 = vpop.f32.mrf.mxu0 }
 0x14e   : > { %v1098_v52 = vadd.f32 %v6270_v40, %v1097_v51  ;;  %5241 = vmatprep.mubr.msk.f32.mxu1 %vm1595_vm2, %v1510_v49  ;;  %v1513_v53 = vmax.f32 %v1103_v50, 0.0 }
 0x14f   : > { %v5049_v54 = vpop.f32.mrf.mxu0  ;;  %5242 = vmatmul.mubr.msk.f32.gmra.mxu1 %vm1595_vm2, %v1511_v47 }
 0x150   : > { %v1512_v55 = vmax.f32 %v1098_v52, 0.0  ;;  %v1113_v56 = vadd.f32 %v5049_v54, %v6270_v40 }
 0x151   : > { %v1107_v57 = vpop.f32.mrf.mxu0 }
 0x152   : > { %v1108_v58 = vadd.f32 %v6270_v40, %v1107_v57  ;;  %5244 = vmatprep.mubr.msk.f32.mxu1 %vm1595_vm2, %v1512_v55  ;;  %v1515_v59 = vmax.f32 %v1113_v56, 0.0 }
 0x153   : > { %v5052_v60 = vpop.f32.mrf.mxu0  ;;  %5245 = vmatmul.mubr.msk.f32.gmra.mxu1 %vm1595_vm2, %v1513_v53 }
 0x154   : > { %v1514_v61 = vmax.f32 %v1108_v58, 0.0  ;;  %v1123_v62 = vadd.f32 %v5052_v60, %v6270_v40 }
 0x155   : > { %v1117_v63 = vpop.f32.mrf.mxu0 }
 0x156   : > { %v1118_v0 = vadd.f32 %v6270_v40, %v1117_v63  ;;  %5247 = vmatprep.mubr.msk.f32.mxu1 %vm1595_vm2, %v1514_v61  ;;  %v1517_v1 = vmax.f32 %v1123_v62, 0.0 }
 0x157   : > { %v5055_v2 = vpop.f32.mrf.mxu0  ;;  %5248 = vmatmul.mubr.msk.f32.gmra.mxu1 %vm1595_vm2, %v1515_v59 }
 0x158   : > { %v1516_v3 = vmax.f32 %v1118_v0, 0.0  ;;  %v1133_v4 = vadd.f32 %v5055_v2, %v6270_v40 }
 0x159   : > { %v1127_v5 = vpop.f32.mrf.mxu0 }
 0x15a   : > { %v1128_v6 = vadd.f32 %v6270_v40, %v1127_v5  ;;  %5250 = vmatprep.mubr.msk.f32.mxu1 %vm1595_vm2, %v1516_v3  ;;  %v1519_v7 = vmax.f32 %v1133_v4, 0.0 }
 0x15b   : > { %v5058_v8 = vpop.f32.mrf.mxu0  ;;  %5251 = vmatmul.mubr.msk.f32.gmra.mxu1 %vm1595_vm2, %v1517_v1 }
 0x15c   : > { %v1518_v9 = vmax.f32 %v1128_v6, 0.0  ;;  %v1143_v10 = vadd.f32 %v5058_v8, %v6270_v40 }
 0x15d   : > { %v1137_v11 = vpop.f32.mrf.mxu0 }
 0x15e   : > { %v1138_v12 = vadd.f32 %v6270_v40, %v1137_v11  ;;  %5253 = vmatprep.mubr.msk.f32.mxu1 %vm1595_vm2, %v1518_v9  ;;  %v1521_v13 = vmax.f32 %v1143_v10, 0.0 }
 0x15f   : > { %v5061_v14 = vpop.f32.mrf.mxu0  ;;  %5254 = vmatmul.mubr.msk.f32.gmra.mxu1 %vm1595_vm2, %v1519_v7 }
 0x160   : > { %v1520_v15 = vmax.f32 %v1138_v12, 0.0  ;;  %v1153_v16 = vadd.f32 %v5061_v14, %v6270_v40 }
 0x161   : > { %v1147_v17 = vpop.f32.mrf.mxu0 }
 0x162   : > { %v1148_v18 = vadd.f32 %v6270_v40, %v1147_v17  ;;  %5256 = vmatprep.mubr.msk.f32.mxu1 %vm1595_vm2, %v1520_v15  ;;  %v1523_v19 = vmax.f32 %v1153_v16, 0.0 }
 0x163   : > { %v5064_v20 = vpop.f32.mrf.mxu0  ;;  %5257 = vmatmul.mubr.msk.f32.gmra.mxu1 %vm1595_vm2, %v1521_v13 }
 0x164   : > { %v1522_v21 = vmax.f32 %v1148_v18, 0.0  ;;  %v1163_v22 = vadd.f32 %v5064_v20, %v6270_v40 }
 0x165   : > { %v1157_v23 = vpop.f32.mrf.mxu0 }
 0x166   : > { %v1158_v24 = vadd.f32 %v6270_v40, %v1157_v23  ;;  %5259 = vmatprep.mubr.msk.f32.mxu1 %vm1595_vm2, %v1522_v21  ;;  %v1525_v25 = vmax.f32 %v1163_v22, 0.0 }
 0x167   : > { %v5067_v26 = vpop.f32.mrf.mxu0  ;;  %5260 = vmatmul.mubr.msk.f32.gmra.mxu1 %vm1595_vm2, %v1523_v19 }
 0x168   : > { %v1524_v27 = vmax.f32 %v1158_v24, 0.0  ;;  %v1173_v28 = vadd.f32 %v5067_v26, %v6270_v40 }
 0x169   : > { %v1167_v29 = vpop.f32.mrf.mxu0 }
 0x16a   : > { %v1168_v30 = vadd.f32 %v6270_v40, %v1167_v29  ;;  %5262 = vmatprep.mubr.msk.f32.mxu1 %vm1595_vm2, %v1524_v27  ;;  %v1527_v31 = vmax.f32 %v1173_v28, 0.0 }
 0x16b   : > { %v5070_v32 = vpop.f32.mrf.mxu0  ;;  %5263 = vmatmul.mubr.msk.f32.gmra.mxu1 %vm1595_vm2, %v1525_v25 }
 0x16c   : > { %v1526_v33 = vmax.f32 %v1168_v30, 0.0  ;;  %v1183_v34 = vadd.f32 %v5070_v32, %v6270_v40 }
 0x16d   : > { %v1177_v35 = vpop.f32.mrf.mxu0 }
 0x16e   : > { %v1178_v36 = vadd.f32 %v6270_v40, %v1177_v35  ;;  %5265 = vmatprep.mubr.msk.f32.mxu1 %vm1595_vm2, %v1526_v33  ;;  %v1529_v37 = vmax.f32 %v1183_v34, 0.0 }
 0x16f   : > { %v5073_v38 = vpop.f32.mrf.mxu0  ;;  %5266 = vmatmul.mubr.msk.f32.gmra.mxu1 %vm1595_vm2, %v1527_v31 }
 0x170   : > { %v1528_v39 = vmax.f32 %v1178_v36, 0.0  ;;  %v1193_v41 = vadd.f32 %v5073_v38, %v6270_v40 }
 0x171   : > { %v1187_v42 = vpop.f32.mrf.mxu0 }
 0x172   : > { %v1188_v43 = vadd.f32 %v6270_v40, %v1187_v42  ;;  %5268 = vmatprep.mubr.msk.f32.mxu1 %vm1595_vm2, %v1528_v39  ;;  %v1531_v44 = vmax.f32 %v1193_v41, 0.0 }
 0x173   : > { %v5076_v45 = vpop.f32.mrf.mxu0  ;;  %5269 = vmatmul.mubr.msk.f32.gmra.mxu1 %vm1595_vm2, %v1529_v37 }
 0x174   : > { %v1530_v46 = vmax.f32 %v1188_v43, 0.0  ;;  %v1203_v47 = vadd.f32 %v5076_v45, %v6270_v40 }
 0x175   : > { %v1197_v48 = vpop.f32.mrf.mxu0 }
 0x176   : > { %v1198_v49 = vadd.f32 %v6270_v40, %v1197_v48  ;;  %5271 = vmatprep.mubr.msk.f32.mxu1 %vm1595_vm2, %v1530_v46  ;;  %v1533_v50 = vmax.f32 %v1203_v47, 0.0 }
 0x177   : > { %v5079_v51 = vpop.f32.mrf.mxu0  ;;  %5272 = vmatmul.mubr.msk.f32.gmra.mxu1 %vm1595_vm2, %v1531_v44 }
 0x178   : > { %v1532_v52 = vmax.f32 %v1198_v49, 0.0  ;;  %v1213_v53 = vadd.f32 %v5079_v51, %v6270_v40  ;;  %v6530_v51 = vld [vmem:[%s8465_s4] ss:$0 sm:$0xff] }
 0x179   : > { %v1207_v54 = vpop.f32.mrf.mxu0 }
 0x17a   : > { %v1208_v55 = vadd.f32 %v6270_v40, %v1207_v54  ;;  %5274 = vmatprep.mubr.msk.f32.mxu1 %vm1595_vm2, %v1532_v52  ;;  %v1535_v56 = vmax.f32 %v1213_v53, 0.0 }
 0x17b   : > { %5275 = vmatmul.mubr.msk.f32.gmra.mxu1 %vm1595_vm2, %v1533_v50  ;;  %v5082_v57 = vpop.f32.mrf.mxu0 }
 0x17c   : > { %v1534_v58 = vmax.f32 %v1208_v55, 0.0  ;;  %v1223_v59 = vadd.f32 %v5082_v57, %v6270_v40 }
 0x17d   : > { %v1217_v60 = vpop.f32.mrf.mxu0 }
 0x17e   : > { %v1218_v61 = vadd.f32 %v6270_v40, %v1217_v60  ;;  %5277 = vmatprep.mubr.msk.f32.mxu1 %vm1595_vm2, %v1534_v58  ;;  %v1537_v62 = vmax.f32 %v1223_v59, 0.0 }
 0x17f   : > { %5278 = vmatmul.mubr.msk.f32.gmra.mxu1 %vm1595_vm2, %v1535_v56  ;;  %v5085_v63 = vpop.f32.mrf.mxu0 }
 0x180   : > { %v1536_v0 = vmax.f32 %v1218_v61, 0.0  ;;  %v1233_v1 = vadd.f32 %v5085_v63, %v6270_v40 }
 0x181   : > { %v1227_v2 = vpop.f32.mrf.mxu0 }
 0x182   : > { %5280 = vmatprep.mubr.msk.f32.mxu1 %vm1595_vm2, %v1536_v0  ;;  %v1228_v3 = vadd.f32 %v6270_v40, %v1227_v2  ;;  %v1539_v4 = vmax.f32 %v1233_v1, 0.0 }
 0x183   : > { %5281 = vmatmul.mubr.msk.f32.gmra.mxu1 %vm1595_vm2, %v1537_v62  ;;  %v5088_v5 = vpop.f32.mrf.mxu0 }
 0x184   : > { %v1538_v6 = vmax.f32 %v1228_v3, 0.0  ;;  %v1243_v7 = vadd.f32 %v5088_v5, %v6270_v40 }
 0x185   : > { %v1237_v8 = vpop.f32.mrf.mxu0 }
 0x186   : > { %5283 = vmatprep.mubr.msk.f32.mxu1 %vm1595_vm2, %v1538_v6  ;;  %v1238_v9 = vadd.f32 %v6270_v40, %v1237_v8  ;;  %v1541_v10 = vmax.f32 %v1243_v7, 0.0 }
 0x187   : > { %5284 = vmatmul.mubr.msk.f32.gmra.mxu1 %vm1595_vm2, %v1539_v4  ;;  %v5091_v11 = vpop.f32.mrf.mxu0 }
 0x188   : > { %v1540_v12 = vmax.f32 %v1238_v9, 0.0  ;;  %v1253_v13 = vadd.f32 %v5091_v11, %v6270_v40 }
 0x189   : > { %v1247_v14 = vpop.f32.mrf.mxu0 }
 0x18a   : > { %5286 = vmatprep.mubr.msk.f32.mxu1 %vm1595_vm2, %v1540_v12  ;;  %v1248_v15 = vadd.f32 %v6270_v40, %v1247_v14  ;;  %v1543_v16 = vmax.f32 %v1253_v13, 0.0 }
 0x18b   : > { %5287 = vmatmul.mubr.msk.f32.gmra.mxu1 %vm1595_vm2, %v1541_v10  ;;  %v5094_v17 = vpop.f32.mrf.mxu0 }
 0x18c   : > { %v1542_v18 = vmax.f32 %v1248_v15, 0.0  ;;  %v1263_v19 = vadd.f32 %v5094_v17, %v6270_v40 }
 0x18d   : > { %v1257_v20 = vpop.f32.mrf.mxu0 }
 0x18e   : > { %5289 = vmatprep.mubr.msk.f32.mxu1 %vm1595_vm2, %v1542_v18  ;;  %v1258_v21 = vadd.f32 %v6270_v40, %v1257_v20  ;;  %v1545_v22 = vmax.f32 %v1263_v19, 0.0 }
 0x18f   : > { %5290 = vmatmul.mubr.msk.f32.gmra.mxu1 %vm1595_vm2, %v1543_v16  ;;  %v5097_v23 = vpop.f32.mrf.mxu0 }
 0x190   : > { %v1544_v24 = vmax.f32 %v1258_v21, 0.0  ;;  %v1273_v25 = vadd.f32 %v5097_v23, %v6270_v40 }
 0x191   : > { %v1267_v26 = vpop.f32.mrf.mxu0 }
 0x192   : > { %5292 = vmatprep.mubr.msk.f32.mxu1 %vm1595_vm2, %v1544_v24  ;;  %v1268_v27 = vadd.f32 %v6270_v40, %v1267_v26  ;;  %v1547_v28 = vmax.f32 %v1273_v25, 0.0 }
 0x193   : > { %5293 = vmatmul.mubr.msk.f32.gmra.mxu1 %vm1595_vm2, %v1545_v22  ;;  %v5100_v29 = vpop.f32.mrf.mxu0 }
 0x194   : > { %v1546_v30 = vmax.f32 %v1268_v27, 0.0  ;;  %v1283_v31 = vadd.f32 %v5100_v29, %v6270_v40 }
 0x195   : > { %v1277_v32 = vpop.f32.mrf.mxu0 }
 0x196   : > { %5295 = vmatprep.mubr.msk.f32.mxu1 %vm1595_vm2, %v1546_v30  ;;  %v1278_v33 = vadd.f32 %v6270_v40, %v1277_v32  ;;  %v1549_v34 = vmax.f32 %v1283_v31, 0.0 }
 0x197   : > { %5296 = vmatmul.mubr.msk.f32.gmra.mxu1 %vm1595_vm2, %v1547_v28  ;;  %v5103_v35 = vpop.f32.mrf.mxu0 }
 0x198   : > { %v1548_v36 = vmax.f32 %v1278_v33, 0.0  ;;  %v1293_v37 = vadd.f32 %v5103_v35, %v6270_v40 }
 0x199   : > { %v1287_v38 = vpop.f32.mrf.mxu0 }
 0x19a   : > { %5298 = vmatprep.mubr.msk.f32.mxu1 %vm1595_vm2, %v1548_v36  ;;  %v1288_v39 = vadd.f32 %v6270_v40, %v1287_v38  ;;  %v1551_v41 = vmax.f32 %v1293_v37, 0.0 }
 0x19b   : > { %5299 = vmatmul.mubr.msk.f32.gmra.mxu1 %vm1595_vm2, %v1549_v34  ;;  %v5106_v42 = vpop.f32.mrf.mxu0  ;;  %v6585_v34 = vld [vmem:[%s8463_s2] ss:$0 sm:$0xff] }
 0x19c   : > { %v1550_v43 = vmax.f32 %v1288_v39, 0.0  ;;  %v1303_v44 = vadd.f32 %v5106_v42, %v6270_v40 }
 0x19d   : > { %v1297_v45 = vpop.f32.mrf.mxu0 }
 0x19e   : > { %5301 = vmatprep.mubr.msk.f32.mxu1 %vm1595_vm2, %v1550_v43  ;;  %v1298_v46 = vadd.f32 %v6270_v40, %v1297_v45  ;;  %v1553_v47 = vmax.f32 %v1303_v44, 0.0 }
 0x19f   : > { %5302 = vmatmul.mubr.msk.f32.gmra.mxu1 %vm1595_vm2, %v1551_v41  ;;  %v5109_v48 = vpop.f32.mrf.mxu0 }
 0x1a0   : > { %v1552_v49 = vmax.f32 %v1298_v46, 0.0  ;;  %v1313_v50 = vadd.f32 %v5109_v48, %v6270_v40 }
 0x1a1   : > { %v1307_v52 = vpop.f32.mrf.mxu0 }
 0x1a2   : > { %5304 = vmatprep.mubr.msk.f32.mxu1 %vm1595_vm2, %v1552_v49  ;;  %v1308_v53 = vadd.f32 %v6270_v40, %v1307_v52  ;;  %v1555_v55 = vmax.f32 %v1313_v50, 0.0 }
 0x1a3   : > { %v5162_v54 = vpop.f32.mrf.mxu1  ;;  %5305 = vmatmul.mubr.msk.f32.gmra.mxu1 %vm1595_vm2, %v1553_v47  ;;  %v5112_v56 = vpop.f32.mrf.mxu0 }
 0x1a4   : > { %v6536_v57 = vadd.f32 %v5162_v54, %v6530_v51  ;;  %v1554_v58 = vmax.f32 %v1308_v53, 0.0  ;;  %v1323_v59 = vadd.f32 %v5112_v56, %v6270_v40 }
 0x1a5   : > { %v2046_v60 = vpop.f32.mrf.mxu1  ;;  %v1317_v61 = vpop.f32.mrf.mxu0 }
 0x1a6   : > { %2687 = vmax.xlane.f32.xlu0 %v6536_v57  ;;  %5307 = vmatprep.mubr.msk.f32.mxu1 %vm1595_vm2, %v1554_v58  ;;  %v1318_v62 = vadd.f32 %v6270_v40, %v1317_v61  ;;  %v6543_v0 = vadd.f32 %v6530_v51, %v2046_v60  ;;  %v1557_v3 = vmax.f32 %v1323_v59, 0.0 }
 0x1a7   : > { %v5165_v63 = vpop.f32.mrf.mxu1  ;;  %5308 = vmatmul.mubr.msk.f32.gmra.mxu1 %vm1595_vm2, %v1555_v55  ;;  %v5115_v1 = vpop.f32.mrf.mxu0 }
 0x1a8   : > { %v6547_v2 = vadd.f32 %v5165_v63, %v6530_v51  ;;  %v1556_v4 = vmax.f32 %v1318_v62, 0.0  ;;  %v1333_v5 = vadd.f32 %v5115_v1, %v6270_v40 }
 0x1a9   : > { %v2056_v6 = vpop.f32.mrf.mxu1  ;;  %v1327_v7 = vpop.f32.mrf.mxu0 }
 0x1aa   : > { %2691 = vmax.xlane.f32.xlu1 %v6547_v2  ;;  %2685 = vmax.xlane.f32.xlu0 %v6543_v0  ;;  %v1328_v8 = vadd.f32 %v6270_v40, %v1327_v7  ;;  %v6555_v11 = vadd.f32 %v6530_v51, %v2056_v6  ;;  %v1559_v12 = vmax.f32 %v1333_v5, 0.0 }
 0x1ab   : > { %v5168_v9 = vpop.f32.mrf.mxu1  ;;  %5310 = vmatprep.mubr.msk.f32.mxu1 %vm1595_vm2, %v1556_v4  ;;  %v5118_v10 = vpop.f32.mrf.mxu0 }
 0x1ac   : > { %5311 = vmatmul.mubr.msk.f32.gmra.mxu1 %vm1595_vm2, %v1557_v3  ;;  %v1558_v13 = vmax.f32 %v1328_v8, 0.0  ;;  %v1343_v14 = vadd.f32 %v5118_v10, %v6270_v40  ;;  %v6566_v21 = vadd.f32 %v5168_v9, %v6530_v51 }
 0x1ad   : > { %v2066_v15 = vpop.f32.mrf.mxu1  ;;  %v1337_v16 = vpop.f32.mrf.mxu0 }
 0x1ae   : > { %2689 = vmax.xlane.f32.xlu1 %v6555_v11  ;;  %v6561_v17 = vadd.f32 %v6530_v51, %v2066_v15  ;;  %5313 = vmatprep.mubr.msk.f32.mxu1 %vm1595_vm2, %v1558_v13  ;;  %v1338_v18 = vadd.f32 %v6270_v40, %v1337_v16  ;;  %v1561_v22 = vmax.f32 %v1343_v14, 0.0 }
 0x1af   : > { %v5171_v19 = vpop.f32.mrf.mxu1  ;;  %v5121_v20 = vpop.f32.mrf.mxu0 }
 0x1b0   : > { %2693 = vmax.xlane.f32.xlu0 %v6561_v17  ;;  %5314 = vmatmul.mubr.msk.f32.gmra.mxu1 %vm1595_vm2, %v1559_v12  ;;  %v1560_v23 = vmax.f32 %v1338_v18, 0.0  ;;  %v1353_v24 = vadd.f32 %v5121_v20, %v6270_v40  ;;  %v6578_v31 = vadd.f32 %v5171_v19, %v6530_v51 }
 0x1b1   : > { %v2076_v25 = vpop.f32.mrf.mxu1  ;;  %v1347_v26 = vpop.f32.mrf.mxu0 }
 0x1b2   : > { %2695 = vmax.xlane.f32.xlu1 %v6566_v21  ;;  %v6573_v27 = vadd.f32 %v6530_v51, %v2076_v25  ;;  %5316 = vmatprep.mubr.msk.f32.mxu1 %vm1595_vm2, %v1560_v23  ;;  %v1348_v28 = vadd.f32 %v6270_v40, %v1347_v26  ;;  %v1563_v32 = vmax.f32 %v1353_v24, 0.0 }
 0x1b3   : > { %v5174_v29 = vpop.f32.mrf.mxu1  ;;  %v5124_v30 = vpop.f32.mrf.mxu0 }
 0x1b4   : > { %2697 = vmax.xlane.f32.xlu0 %v6573_v27  ;;  %5317 = vmatmul.mubr.msk.f32.gmra.mxu1 %vm1595_vm2, %v1561_v22  ;;  %v1562_v33 = vmax.f32 %v1348_v28, 0.0  ;;  %v1363_v35 = vadd.f32 %v6585_v34, %v5124_v30  ;;  %v6595_v42 = vadd.f32 %v5174_v29, %v6530_v51 }
 0x1b5   : > { %v2086_v36 = vpop.f32.mrf.mxu1  ;;  %v1357_v40 = vpop.f32.mrf.mxu0 }
 0x1b6   : > { %2699 = vmax.xlane.f32.xlu1 %v6578_v31  ;;  %v6590_v37 = vadd.f32 %v6530_v51, %v2086_v36  ;;  %5319 = vmatprep.mubr.msk.f32.mxu1 %vm1595_vm2, %v1562_v33  ;;  %v1358_v38 = vadd.f32 %v6585_v34, %v1357_v40  ;;  %v1565_v43 = vmax.f32 %v1363_v35, 0.0 }
 0x1b7   : > { %v5177_v39 = vpop.f32.mrf.mxu1  ;;  %v5127_v41 = vpop.f32.mrf.mxu0 }
 0x1b8   : > { %2701 = vmax.xlane.f32.xlu0 %v6590_v37  ;;  %5320 = vmatmul.mubr.msk.f32.gmra.mxu1 %vm1595_vm2, %v1563_v32  ;;  %v1564_v44 = vmax.f32 %v1358_v38, 0.0  ;;  %v1373_v45 = vadd.f32 %v6585_v34, %v5127_v41  ;;  %v6607_v53 = vadd.f32 %v5177_v39, %v6530_v51 }
 0x1b9   : > { %v2096_v46 = vpop.f32.mrf.mxu1  ;;  %v1367_v47 = vpop.f32.mrf.mxu0 }
 0x1ba   : > { %2703 = vmax.xlane.f32.xlu1 %v6595_v42  ;;  %v6602_v48 = vadd.f32 %v6530_v51, %v2096_v46  ;;  %5322 = vmatprep.mubr.msk.f32.mxu1 %vm1595_vm2, %v1564_v44  ;;  %v1368_v49 = vadd.f32 %v6585_v34, %v1367_v47  ;;  %v1567_v54 = vmax.f32 %v1373_v45, 0.0 }
 0x1bb   : > { %v5180_v50 = vpop.f32.mrf.mxu1  ;;  %v5130_v52 = vpop.f32.mrf.mxu0 }
 0x1bc   : > { %2705 = vmax.xlane.f32.xlu0 %v6602_v48  ;;  %5323 = vmatmul.mubr.msk.f32.gmra.mxu1 %vm1595_vm2, %v1565_v43  ;;  %v1566_v55 = vmax.f32 %v1368_v49, 0.0  ;;  %v1383_v56 = vadd.f32 %v6585_v34, %v5130_v52  ;;  %v6619_v1 = vadd.f32 %v5180_v50, %v6530_v51 }
 0x1bd   : > { %v2106_v58 = vpop.f32.mrf.mxu1  ;;  %v1377_v59 = vpop.f32.mrf.mxu0 }
 0x1be   : > { %2707 = vmax.xlane.f32.xlu1 %v6607_v53  ;;  %v6614_v60 = vadd.f32 %v6530_v51, %v2106_v58  ;;  %5325 = vmatprep.mubr.msk.f32.mxu1 %vm1595_vm2, %v1566_v55  ;;  %v1378_v61 = vadd.f32 %v6585_v34, %v1377_v59  ;;  %v1569_v3 = vmax.f32 %v1383_v56, 0.0 }
 0x1bf   : > { %v5183_v62 = vpop.f32.mrf.mxu1  ;;  %v5133_v63 = vpop.f32.mrf.mxu0 }
 0x1c0   : > { %2709 = vmax.xlane.f32.xlu0 %v6614_v60  ;;  %5326 = vmatmul.mubr.msk.f32.gmra.mxu1 %vm1595_vm2, %v1567_v54  ;;  %v1568_v4 = vmax.f32 %v1378_v61, 0.0  ;;  %v1393_v5 = vadd.f32 %v6585_v34, %v5133_v63  ;;  %v6631_v13 = vadd.f32 %v5183_v62, %v6530_v51 }
 0x1c1   : > { %v2116_v6 = vpop.f32.mrf.mxu1  ;;  %v1387_v7 = vpop.f32.mrf.mxu0 }
 0x1c2   : > { %2711 = vmax.xlane.f32.xlu1 %v6619_v1  ;;  %v6626_v8 = vadd.f32 %v6530_v51, %v2116_v6  ;;  %5328 = vmatprep.mubr.msk.f32.mxu1 %vm1595_vm2, %v1568_v4  ;;  %v1388_v9 = vadd.f32 %v6585_v34, %v1387_v7  ;;  %v1571_v14 = vmax.f32 %v1393_v5, 0.0 }
 0x1c3   : > { %v5186_v10 = vpop.f32.mrf.mxu1  ;;  %v5136_v12 = vpop.f32.mrf.mxu0 }
 0x1c4   : > { %2713 = vmax.xlane.f32.xlu0 %v6626_v8  ;;  %5329 = vmatmul.mubr.msk.f32.gmra.mxu1 %vm1595_vm2, %v1569_v3  ;;  %v1570_v15 = vmax.f32 %v1388_v9, 0.0  ;;  %v1403_v16 = vadd.f32 %v6585_v34, %v5136_v12  ;;  %v6643_v25 = vadd.f32 %v5186_v10, %v6530_v51 }
 0x1c5   : > { %v2126_v18 = vpop.f32.mrf.mxu1  ;;  %v1397_v19 = vpop.f32.mrf.mxu0 }
 0x1c6   : > { %v6637_v20 = vadd.f32 %v6530_v51, %v2126_v18  ;;  %2715 = vmax.xlane.f32.xlu1 %v6631_v13  ;;  %5331 = vmatprep.mubr.msk.f32.mxu1 %vm1595_vm2, %v1570_v15  ;;  %v1398_v22 = vadd.f32 %v6585_v34, %v1397_v19  ;;  %v1573_v26 = vmax.f32 %v1403_v16, 0.0 }
 0x1c7   : > { %v5189_v23 = vpop.f32.mrf.mxu1  ;;  %v5139_v24 = vpop.f32.mrf.mxu0 }
 0x1c8   : > { %2717 = vmax.xlane.f32.xlu0 %v6637_v20  ;;  %5332 = vmatmul.mubr.msk.f32.gmra.mxu1 %vm1595_vm2, %v1571_v14  ;;  %v1572_v28 = vmax.f32 %v1398_v22, 0.0  ;;  %v1413_v29 = vadd.f32 %v6585_v34, %v5139_v24  ;;  %v6655_v38 = vadd.f32 %v5189_v23, %v6530_v51 }
 0x1c9   : > { %v2136_v30 = vpop.f32.mrf.mxu1  ;;  %v1407_v32 = vpop.f32.mrf.mxu0 }
 0x1ca   : > { %v6649_v33 = vadd.f32 %v6530_v51, %v2136_v30  ;;  %2719 = vmax.xlane.f32.xlu1 %v6643_v25  ;;  %5334 = vmatprep.mubr.msk.f32.mxu1 %vm1595_vm2, %v1572_v28  ;;  %v1408_v35 = vadd.f32 %v6585_v34, %v1407_v32  ;;  %v1575_v39 = vmax.f32 %v1413_v29, 0.0 }
 0x1cb   : > { %v5192_v36 = vpop.f32.mrf.mxu1  ;;  %v5142_v40 = vpop.f32.mrf.mxu0 }
 0x1cc   : > { %2721 = vmax.xlane.f32.xlu0 %v6649_v33  ;;  %5335 = vmatmul.mubr.msk.f32.gmra.mxu1 %vm1595_vm2, %v1573_v26  ;;  %v1574_v41 = vmax.f32 %v1408_v35, 0.0  ;;  %v1423_v43 = vadd.f32 %v6585_v34, %v5142_v40  ;;  %v6667_v52 = vadd.f32 %v5192_v36, %v6530_v51 }
 0x1cd   : > { %v2146_v44 = vpop.f32.mrf.mxu1  ;;  %v1417_v45 = vpop.f32.mrf.mxu0 }
 0x1ce   : > { %v6661_v46 = vadd.f32 %v6530_v51, %v2146_v44  ;;  %2723 = vmax.xlane.f32.xlu1 %v6655_v38  ;;  %5337 = vmatprep.mubr.msk.f32.mxu1 %vm1595_vm2, %v1574_v41  ;;  %v1418_v47 = vadd.f32 %v6585_v34, %v1417_v45  ;;  %v1577_v54 = vmax.f32 %v1423_v43, 0.0 }
 0x1cf   : > { %v5195_v49 = vpop.f32.mrf.mxu1  ;;  %v5145_v50 = vpop.f32.mrf.mxu0 }
 0x1d0   : > { %2725 = vmax.xlane.f32.xlu0 %v6661_v46  ;;  %5338 = vmatmul.mubr.msk.f32.gmra.mxu1 %vm1595_vm2, %v1575_v39  ;;  %v1576_v55 = vmax.f32 %v1418_v47, 0.0  ;;  %v1433_v56 = vadd.f32 %v6585_v34, %v5145_v50  ;;  %v6679_v4 = vadd.f32 %v5195_v49, %v6530_v51 }
 0x1d1   : > { %v2156_v58 = vpop.f32.mrf.mxu1  ;;  %v1427_v59 = vpop.f32.mrf.mxu0 }
 0x1d2   : > { %v6673_v61 = vadd.f32 %v6530_v51, %v2156_v58  ;;  %2727 = vmax.xlane.f32.xlu1 %v6667_v52  ;;  %5340 = vmatprep.mubr.msk.f32.mxu1 %vm1595_vm2, %v1576_v55  ;;  %v1428_v62 = vadd.f32 %v6585_v34, %v1427_v59  ;;  %v1579_v5 = vmax.f32 %v1433_v56, 0.0 }
 0x1d3   : > { %v5198_v63 = vpop.f32.mrf.mxu1  ;;  %v5148_v3 = vpop.f32.mrf.mxu0 }
 0x1d4   : > { %2729 = vmax.xlane.f32.xlu0 %v6673_v61  ;;  %5341 = vmatmul.mubr.msk.f32.gmra.mxu1 %vm1595_vm2, %v1577_v54  ;;  %v1578_v6 = vmax.f32 %v1428_v62, 0.0  ;;  %v1443_v7 = vadd.f32 %v6585_v34, %v5148_v3  ;;  %v6691_v18 = vadd.f32 %v5198_v63, %v6530_v51 }
 0x1d5   : > { %v2166_v9 = vpop.f32.mrf.mxu1  ;;  %v1437_v10 = vpop.f32.mrf.mxu0 }
 0x1d6   : > { %v6685_v12 = vadd.f32 %v6530_v51, %v2166_v9  ;;  %2731 = vmax.xlane.f32.xlu1 %v6679_v4  ;;  %5343 = vmatprep.mubr.msk.f32.mxu1 %vm1595_vm2, %v1578_v6  ;;  %v1438_v14 = vadd.f32 %v6585_v34, %v1437_v10  ;;  %v1581_v19 = vmax.f32 %v1443_v7, 0.0 }
 0x1d7   : > { %v5201_v15 = vpop.f32.mrf.mxu1  ;;  %v5151_v16 = vpop.f32.mrf.mxu0 }
 0x1d8   : > { %2733 = vmax.xlane.f32.xlu0 %v6685_v12  ;;  %5344 = vmatmul.mubr.msk.f32.gmra.mxu1 %vm1595_vm2, %v1579_v5  ;;  %v1580_v22 = vmax.f32 %v1438_v14, 0.0  ;;  %v1453_v23 = vadd.f32 %v6585_v34, %v5151_v16  ;;  %v6703_v32 = vadd.f32 %v5201_v15, %v6530_v51 }
 0x1d9   : > { %v2176_v24 = vpop.f32.mrf.mxu1  ;;  %v1447_v26 = vpop.f32.mrf.mxu0 }
 0x1da   : > { %v6697_v28 = vadd.f32 %v6530_v51, %v2176_v24  ;;  %2735 = vmax.xlane.f32.xlu1 %v6691_v18  ;;  %5346 = vmatprep.mubr.msk.f32.mxu1 %vm1595_vm2, %v1580_v22  ;;  %v1448_v29 = vadd.f32 %v6585_v34, %v1447_v26  ;;  %v1583_v35 = vmax.f32 %v1453_v23, 0.0 }
 0x1db   : > { %v5204_v30 = vpop.f32.mrf.mxu1 }
 0x1dc   : > { %2737 = vmax.xlane.f32.xlu0 %v6697_v28  ;;  %5347 = vmatmul.mubr.msk.f32.gmra.mxu1 %vm1595_vm2, %v1581_v19  ;;  %v1582_v36 = vmax.f32 %v1448_v29, 0.0  ;;  %v6713_v34 = vadd.f32 %v5204_v30, %v6530_v51 }
 0x1dd   : > { %v2186_v40 = vpop.f32.mrf.mxu1 }
 0x1de   : > { %v6708_v39 = vadd.f32 %v6530_v51, %v2186_v40  ;;  %2739 = vmax.xlane.f32.xlu1 %v6703_v32  ;;  %5349 = vmatprep.mubr.msk.f32.mxu1 %vm1595_vm2, %v1582_v36 }
 0x1df   : > { %v5207_v41 = vpop.f32.mrf.mxu1 }
 0x1e0   : > { %2741 = vmax.xlane.f32.xlu0 %v6708_v39  ;;  %5350 = vmatmul.mubr.msk.f32.gmra.mxu1 %vm1595_vm2, %v1583_v35  ;;  %v6722_v47 = vadd.f32 %v5207_v41, %v6530_v51 }
 0x1e1   : > { %v2196_v43 = vpop.f32.mrf.mxu1 }
 0x1e2   : > { %v6718_v44 = vadd.f32 %v6530_v51, %v2196_v43  ;;  %2743 = vmax.xlane.f32.xlu1 %v6713_v34 }
 0x1e3   : > { %v5210_v45 = vpop.f32.mrf.mxu1 }
 0x1e4   : > { %2745 = vmax.xlane.f32.xlu0 %v6718_v44  ;;  %v6730_v55 = vadd.f32 %v5210_v45, %v6530_v51 }
 0x1e5   : > { %v2206_v49 = vpop.f32.mrf.mxu1 }
 0x1e6   : > { %v6726_v50 = vadd.f32 %v6530_v51, %v2206_v49  ;;  %2747 = vmax.xlane.f32.xlu1 %v6722_v47 }
 0x1e7   : > { %v5213_v54 = vpop.f32.mrf.mxu1 }
 0x1e8   : > { %2749 = vmax.xlane.f32.xlu0 %v6726_v50  ;;  %v6738_v62 = vadd.f32 %v5213_v54, %v6530_v51 }
 0x1e9   : > { %v2216_v56 = vpop.f32.mrf.mxu1 }
 0x1ea   : > { %v6734_v58 = vadd.f32 %v6530_v51, %v2216_v56  ;;  %2751 = vmax.xlane.f32.xlu1 %v6730_v55 }
 0x1eb   : > { %v5216_v59 = vpop.f32.mrf.mxu1 }
 0x1ec   : > { %2753 = vmax.xlane.f32.xlu0 %v6734_v58  ;;  %v6746_v6 = vadd.f32 %v5216_v59, %v6530_v51 }
 0x1ed   : > { %v2226_v63 = vpop.f32.mrf.mxu1 }
 0x1ee   : > { %v6742_v3 = vadd.f32 %v6530_v51, %v2226_v63  ;;  %2755 = vmax.xlane.f32.xlu1 %v6738_v62 }
 0x1ef   : > { %v5219_v5 = vpop.f32.mrf.mxu1 }
 0x1f0   : > { %2757 = vmax.xlane.f32.xlu0 %v6742_v3  ;;  %v6754_v14 = vadd.f32 %v5219_v5, %v6530_v51 }
 0x1f1   : > { %v2236_v7 = vpop.f32.mrf.mxu1 }
 0x1f2   : > { %v6750_v9 = vadd.f32 %v6530_v51, %v2236_v7  ;;  %2759 = vmax.xlane.f32.xlu1 %v6746_v6 }
 0x1f3   : > { %v5222_v10 = vpop.f32.mrf.mxu1 }
 0x1f4   : > { %2761 = vmax.xlane.f32.xlu0 %v6750_v9  ;;  %v6762_v22 = vadd.f32 %v5222_v10, %v6530_v51 }
 0x1f5   : > { %v2246_v15 = vpop.f32.mrf.mxu1 }
 0x1f6   : > { %v6758_v16 = vadd.f32 %v6530_v51, %v2246_v15  ;;  %2763 = vmax.xlane.f32.xlu1 %v6754_v14 }
 0x1f7   : > { %v5225_v19 = vpop.f32.mrf.mxu1 }
 0x1f8   : > { %2765 = vmax.xlane.f32.xlu0 %v6758_v16  ;;  %v6770_v29 = vadd.f32 %v5225_v19, %v6530_v51 }
 0x1f9   : > { %v2256_v23 = vpop.f32.mrf.mxu1 }
 0x1fa   : > { %v6766_v24 = vadd.f32 %v6530_v51, %v2256_v23  ;;  %2767 = vmax.xlane.f32.xlu1 %v6762_v22 }
 0x1fb   : > { %v5228_v26 = vpop.f32.mrf.mxu1 }
 0x1fc   : > { %2769 = vmax.xlane.f32.xlu0 %v6766_v24  ;;  %v6778_v40 = vadd.f32 %v5228_v26, %v6530_v51 }
 0x1fd   : > { %v2266_v30 = vpop.f32.mrf.mxu1 }
 0x1fe   : > { %v6774_v35 = vadd.f32 %v6530_v51, %v2266_v30  ;;  %2771 = vmax.xlane.f32.xlu1 %v6770_v29 }
 0x1ff   : > { %v5231_v36 = vpop.f32.mrf.mxu1 }
 0x200   : > { %2773 = vmax.xlane.f32.xlu0 %v6774_v35  ;;  %v6786_v49 = vadd.f32 %v5231_v36, %v6530_v51 }
 0x201   : > { %v2276_v41 = vpop.f32.mrf.mxu1 }
 0x202   : > { %v6782_v43 = vadd.f32 %v6530_v51, %v2276_v41  ;;  %2775 = vmax.xlane.f32.xlu1 %v6778_v40 }
 0x203   : > { %v5234_v45 = vpop.f32.mrf.mxu1 }
 0x204   : > { %2777 = vmax.xlane.f32.xlu0 %v6782_v43  ;;  %v6794_v63 = vadd.f32 %v5234_v45, %v6530_v51 }
 0x205   : > { %v2286_v54 = vpop.f32.mrf.mxu1 }
 0x206   : > { %v6790_v56 = vadd.f32 %v6530_v51, %v2286_v54  ;;  %2779 = vmax.xlane.f32.xlu1 %v6786_v49  ;;  %8632 = vst [vmem:[#allocation6_spill] sm:$0xff] %v6794_v63 }
 0x207   : > { %v5237_v59 = vpop.f32.mrf.mxu1 }
 0x208   : > { %8631 = vst [vmem:[#allocation5_spill] sm:$0xff] %v6790_v56  ;;  %2781 = vmax.xlane.f32.xlu0 %v6790_v56  ;;  %v6802_v15 = vadd.f32 %v5237_v59, %v6530_v51 }
 0x209   : > { %v2296_v5 = vpop.f32.mrf.mxu1 }
 0x20a   : > { %v6798_v7 = vadd.f32 %v6530_v51, %v2296_v5  ;;  %2783 = vmax.xlane.f32.xlu1 %v6794_v63  ;;  %8634 = vst [vmem:[#allocation8_spill] sm:$0xff] %v6802_v15 }
 0x20b   : > { %v5240_v10 = vpop.f32.mrf.mxu1 }
 0x20c   : > { %8633 = vst [vmem:[#allocation7_spill] sm:$0xff] %v6798_v7  ;;  %2785 = vmax.xlane.f32.xlu0 %v6798_v7  ;;  %v6810_v30 = vadd.f32 %v5240_v10, %v6530_v51 }
 0x20d   : > { %v2306_v19 = vpop.f32.mrf.mxu1 }
 0x20e   : > { %v6806_v23 = vadd.f32 %v6530_v51, %v2306_v19  ;;  %2787 = vmax.xlane.f32.xlu1 %v6802_v15  ;;  %8636 = vst [vmem:[#allocation10_spill] sm:$0xff] %v6810_v30 }
 0x20f   : > { %v5243_v26 = vpop.f32.mrf.mxu1 }
 0x210   : > { %8635 = vst [vmem:[#allocation9_spill] sm:$0xff] %v6806_v23  ;;  %2789 = vmax.xlane.f32.xlu0 %v6806_v23  ;;  %v6818_v54 = vadd.f32 %v5243_v26, %v6530_v51 }
 0x211   : > { %v2316_v36 = vpop.f32.mrf.mxu1 }
 0x212   : > { %v6814_v41 = vadd.f32 %v6530_v51, %v2316_v36  ;;  %2791 = vmax.xlane.f32.xlu1 %v6810_v30  ;;  %8638 = vst [vmem:[#allocation12_spill] sm:$0xff] %v6818_v54 }
 0x213   : > { %v5246_v45 = vpop.f32.mrf.mxu1 }
 0x214   : > { %8637 = vst [vmem:[#allocation11_spill] sm:$0xff] %v6814_v41  ;;  %2793 = vmax.xlane.f32.xlu0 %v6814_v41  ;;  %v6826_v19 = vadd.f32 %v5246_v45, %v6530_v51 }
 0x215   : > { %v2326_v59 = vpop.f32.mrf.mxu1 }
 0x216   : > { %v6822_v5 = vadd.f32 %v6530_v51, %v2326_v59  ;;  %2795 = vmax.xlane.f32.xlu1 %v6818_v54  ;;  %8640 = vst [vmem:[#allocation14_spill] sm:$0xff] %v6826_v19 }
 0x217   : > { %v5249_v10 = vpop.f32.mrf.mxu1 }
 0x218   : > { %8639 = vst [vmem:[#allocation13_spill] sm:$0xff] %v6822_v5  ;;  %2797 = vmax.xlane.f32.xlu0 %v6822_v5  ;;  %v6834_v41 = vadd.f32 %v5249_v10, %v6530_v51 }
 0x219   : > { %v2336_v36 = vpop.f32.mrf.mxu1 }
 0x21a   : > { %v6830_v30 = vadd.f32 %v6530_v51, %v2336_v36  ;;  %2799 = vmax.xlane.f32.xlu1 %v6826_v19  ;;  %8642 = vst [vmem:[#allocation16_spill] sm:$0xff] %v6834_v41 }
 0x21b   : > { %v5252_v26 = vpop.f32.mrf.mxu1 }
 0x21c   : > { %8641 = vst [vmem:[#allocation15_spill] sm:$0xff] %v6830_v30  ;;  %2801 = vmax.xlane.f32.xlu0 %v6830_v30  ;;  %v6842_v5 = vadd.f32 %v5252_v26, %v6530_v51 }
 0x21d   : > { %v2346_v59 = vpop.f32.mrf.mxu1 }
 0x21e   : > { %v6838_v54 = vadd.f32 %v6530_v51, %v2346_v59  ;;  %2803 = vmax.xlane.f32.xlu1 %v6834_v41  ;;  %8644 = vst [vmem:[#allocation18_spill] sm:$0xff] %v6842_v5 }
 0x21f   : > { %v5255_v45 = vpop.f32.mrf.mxu1 }
 0x220   : > { %8643 = vst [vmem:[#allocation17_spill] sm:$0xff] %v6838_v54  ;;  %2805 = vmax.xlane.f32.xlu0 %v6838_v54  ;;  %v6850_v30 = vadd.f32 %v5255_v45, %v6530_v51 }
 0x221   : > { %v2356_v36 = vpop.f32.mrf.mxu1 }
 0x222   : > { %v6846_v19 = vadd.f32 %v6530_v51, %v2356_v36  ;;  %2807 = vmax.xlane.f32.xlu1 %v6842_v5  ;;  %8646 = vst [vmem:[#allocation20_spill] sm:$0xff] %v6850_v30 }
 0x223   : > { %v5258_v10 = vpop.f32.mrf.mxu1 }
 0x224   : > { %8645 = vst [vmem:[#allocation19_spill] sm:$0xff] %v6846_v19  ;;  %2809 = vmax.xlane.f32.xlu0 %v6846_v19  ;;  %v6858_v54 = vadd.f32 %v5258_v10, %v6530_v51 }
 0x225   : > { %v2366_v59 = vpop.f32.mrf.mxu1 }
 0x226   : > { %v6854_v41 = vadd.f32 %v6530_v51, %v2366_v59  ;;  %2811 = vmax.xlane.f32.xlu1 %v6850_v30  ;;  %8648 = vst [vmem:[#allocation22_spill] sm:$0xff] %v6858_v54 }
 0x227   : > { %v5261_v26 = vpop.f32.mrf.mxu1 }
 0x228   : > { %8647 = vst [vmem:[#allocation21_spill] sm:$0xff] %v6854_v41  ;;  %2813 = vmax.xlane.f32.xlu0 %v6854_v41  ;;  %v6866_v19 = vadd.f32 %v5261_v26, %v6530_v51 }
 0x229   : > { %v2376_v36 = vpop.f32.mrf.mxu1 }
 0x22a   : > { %v6862_v5 = vadd.f32 %v6530_v51, %v2376_v36  ;;  %2815 = vmax.xlane.f32.xlu1 %v6858_v54  ;;  %8650 = vst [vmem:[#allocation24_spill] sm:$0xff] %v6866_v19 }
 0x22b   : > { %v5264_v45 = vpop.f32.mrf.mxu1 }
 0x22c   : > { %8649 = vst [vmem:[#allocation23_spill] sm:$0xff] %v6862_v5  ;;  %2817 = vmax.xlane.f32.xlu0 %v6862_v5  ;;  %v6874_v23 = vadd.f32 %v5264_v45, %v6530_v51 }
 0x22d   : > { %v2386_v59 = vpop.f32.mrf.mxu1 }
 0x22e   : > { %v6870_v30 = vadd.f32 %v6530_v51, %v2386_v59  ;;  %2819 = vmax.xlane.f32.xlu1 %v6866_v19  ;;  %8652 = vst [vmem:[#allocation26_spill] sm:$0xff] %v6874_v23 }
 0x22f   : > { %v2688_v10 = vpop.xlane.xlu0 %2687  ;;  %v5267_v41 = vpop.f32.mrf.mxu1 }
 0x230   : > { %8651 = vst [vmem:[#allocation25_spill] sm:$0xff] %v6870_v30  ;;  %2821 = vmax.xlane.f32.xlu0 %v6870_v30  ;;  %v2942_v59 = vsub.f32 %v6536_v57, %v2688_v10  ;;  %v6883_v15 = vadd.f32 %v5267_v41, %v6530_v51 }
 0x231   : > { %v2396_v36 = vpop.f32.mrf.mxu1 }
 0x232   : > { %v6878_v54 = vadd.f32 %v6530_v51, %v2396_v36  ;;  %2823 = vmax.xlane.f32.xlu1 %v6874_v23  ;;  %8654 = vst [vmem:[#allocation28_spill] sm:$0xff] %v6883_v15  ;;  %v3071_v56 = vmul.f32 1.442695, %v2942_v59 }
 0x233   : > { %v2692_v26 = vpop.xlane.xlu1 %2691  ;;  %v5270_v5 = vpop.f32.mrf.mxu1 }
 0x234   : > { %8653 = vst [vmem:[#allocation27_spill] sm:$0xff] %v6878_v54  ;;  %v2686_v19 = vpop.xlane.xlu0 %2685  ;;  %2825 = vmax.xlane.f32.xlu0 %v6878_v54  ;;  %v6892_v57 = vadd.f32 %v5270_v5, %v6530_v51  ;;  %v2944_v59 = vsub.f32 %v6547_v2, %v2692_v26 }
 0x235   : > { %v2941_v45 = vsub.f32 %v6543_v0, %v2686_v19  ;;  %v2406_v7 = vpop.f32.mrf.mxu1 }
 0x236   : > { %v6888_v30 = vadd.f32 %v6530_v51, %v2406_v7  ;;  %2827 = vmax.xlane.f32.xlu1 %v6883_v15  ;;  %8656 = vst [vmem:[#allocation30_spill] sm:$0xff] %v6892_v57 }
 0x237   : > { %v3069_v36 = vmul.f32 1.442695, %v2941_v45  ;;  %v5273_v23 = vpop.f32.mrf.mxu1  ;;  %v2690_v63 = vpop.xlane.xlu1 %2689 }
 0x238   : > { %8655 = vst [vmem:[#allocation29_spill] sm:$0xff] %v6888_v30  ;;  %2829 = vmax.xlane.f32.xlu0 %v6888_v30  ;;  %v2943_v0 = vsub.f32 %v6555_v11, %v2690_v63  ;;  %v6902_v5 = vadd.f32 %v5273_v23, %v6530_v51 }
 0x239   : > { %v2416_v41 = vpop.f32.mrf.mxu1  ;;  %v2694_v10 = vpop.xlane.xlu0 %2693  ;;  %5393 = vpow2.f32 %v3069_v36 }
 0x23a   : > { %v6897_v19 = vadd.f32 %v6530_v51, %v2416_v41  ;;  %2831 = vmax.xlane.f32.xlu1 %v6892_v57  ;;  %5395 = vpow2.f32 %v3071_v56  ;;  %8658 = vst [vmem:[#allocation32_spill] sm:$0xff] %v6902_v5  ;;  %v3073_v36 = vmul.f32 1.442695, %v2943_v0  ;;  %v3075_v57 = vmul.f32 1.442695, %v2944_v59 }
 0x23b   : > { %v5276_v7 = vpop.f32.mrf.mxu1  ;;  %v2696_v45 = vpop.xlane.xlu1 %2695  ;;  %v2945_v26 = vsub.f32 %v6561_v17, %v2694_v10 }
 0x23c   : > { %8657 = vst [vmem:[#allocation31_spill] sm:$0xff] %v6897_v19  ;;  %2833 = vmax.xlane.f32.xlu0 %v6897_v19  ;;  %v6910_v56 = vadd.f32 %v5276_v7, %v6530_v51  ;;  %5397 = vpow2.f32 %v3073_v36  ;;  %v2946_v59 = vsub.f32 %v6566_v21, %v2696_v45 }
 0x23d   : > { %v2426_v30 = vpop.f32.mrf.mxu1  ;;  %v2698_v15 = vpop.xlane.xlu0 %2697  ;;  %5399 = vpow2.f32 %v3075_v57  ;;  %v3077_v19 = vmul.f32 1.442695, %v2945_v26 }
 0x23e   : > { %v6906_v11 = vadd.f32 %v6530_v51, %v2426_v30  ;;  %2835 = vmax.xlane.f32.xlu1 %v6902_v5  ;;  %8660 = vst [vmem:[#allocation34_spill] sm:$0xff] %v6910_v56  ;;  %v2947_v21 = vsub.f32 %v6573_v27, %v2698_v15 }
 0x23f   : > { %v5279_v63 = vpop.f32.mrf.mxu1  ;;  %v2700_v41 = vpop.xlane.xlu1 %2699  ;;  %5401 = vpow2.f32 %v3077_v19 }
 0x240   : > { %8659 = vst [vmem:[#allocation33_spill] sm:$0xff] %v6906_v11  ;;  %2837 = vmax.xlane.f32.xlu0 %v6906_v11  ;;  %v6920_v7 = vadd.f32 %v5279_v63, %v6530_v51  ;;  %v3081_v19 = vmul.f32 1.442695, %v2947_v21 }
 0x241   : > { %v2436_v2 = vpop.f32.mrf.mxu1  ;;  %v2702_v23 = vpop.xlane.xlu0 %2701 }
 0x242   : > { %v6915_v0 = vadd.f32 %v6530_v51, %v2436_v2  ;;  %2839 = vmax.xlane.f32.xlu1 %v6910_v56  ;;  %8662 = vst [vmem:[#allocation36_spill] sm:$0xff] %v6920_v7  ;;  %v3079_v2 = vmul.f32 1.442695, %v2946_v59  ;;  %v2948_v59 = vsub.f32 %v6578_v31, %v2700_v41 }
 0x243   : > { %v2704_v30 = vpop.xlane.xlu1 %2703  ;;  %v5282_v5 = vpop.f32.mrf.mxu1 }
 0x244   : > { %8661 = vst [vmem:[#allocation35_spill] sm:$0xff] %v6915_v0  ;;  %2841 = vmax.xlane.f32.xlu0 %v6915_v0  ;;  %5403 = vpow2.f32 %v3079_v2  ;;  %v3083_v54 = vmul.f32 1.442695, %v2948_v59  ;;  %v2950_v59 = vsub.f32 %v6595_v42, %v2704_v30 }
 0x245   : > { %v2706_v11 = vpop.xlane.xlu0 %2705  ;;  %v2446_v10 = vpop.f32.mrf.mxu1  ;;  %5405 = vpow2.f32 %v3081_v19 }
 0x246   : > { %2843 = vmax.xlane.f32.xlu1 %v6920_v7  ;;  %v6924_v17 = vpop.eup %5393  ;;  %v6933_v45 = vadd.f32 %v6530_v51, %v2446_v10  ;;  %v6940_v7 = vadd.f32 %v5282_v5, %v6530_v51  ;;  %v2949_v5 = vsub.f32 %v6590_v37, %v2702_v23  ;;  %5407 = vpow2.f32 %v3083_v54 }
 0x247   : > { %v2708_v36 = vpop.xlane.xlu1 %2707  ;;  %v6927_v56 = vpop.eup %5395  ;;  %v2951_v30 = vsub.f32 %v6602_v48, %v2706_v11 }
 0x248   : > { %3325 = vadd.xlane.f32.xlu0 %v6924_v17  ;;  %8663 = vst [vmem:[#allocation37_spill] sm:$0xff] %v6933_v45  ;;  %v5285_v26 = vpop.f32.mrf.mxu1  ;;  %8664 = vst [vmem:[#allocation38_spill] sm:$0xff] %v6940_v7  ;;  %v3085_v19 = vmul.f32 1.442695, %v2949_v5 }
 0x249   : > { %v6929_v57 = vpop.xlane.xlu0 %2709  ;;  %v6946_v27 = vpop.eup %5397 }
 0x24a   : > { %3327 = vadd.xlane.f32.xlu1 %v6927_v56  ;;  %8665 = vst [vmem:[#allocation39_spill] sm:$0xff] %v6946_v27  ;;  %v2456_v15 = vpop.f32.mrf.mxu1  ;;  %v6951_v2 = vpop.eup %5399  ;;  %5409 = vpow2.f32 %v3085_v19  ;;  %v3089_v19 = vmul.f32 1.442695, %v2951_v30 }
 0x24b   : > { %v6936_v63 = vpop.xlane.xlu1 %2711  ;;  %8666 = vst [vmem:[#allocation40_spill] sm:$0xff] %v6951_v2  ;;  %v6957_v41 = vadd.f32 %v6530_v51, %v2456_v15 }
 0x24c   : > { %2845 = vmax.xlane.f32.xlu0 %v6933_v45  ;;  %v6964_v45 = vadd.f32 %v5285_v26, %v6530_v51  ;;  %v6970_v37 = vpop.eup %5401 }
 0x24d   : > { %v6943_v0 = vpop.xlane.xlu0 %2713  ;;  %8667 = vst [vmem:[#allocation41_spill] sm:$0xff] %v6957_v41  ;;  %8669 = vst [vmem:[#allocation43_spill] sm:$0xff] %v6970_v37 }
 0x24e   : > { %2847 = vmax.xlane.f32.xlu1 %v6940_v7  ;;  %v5288_v7 = vpop.f32.mrf.mxu1  ;;  %8668 = vst [vmem:[#allocation42_spill] sm:$0xff] %v6964_v45 }
 0x24f   : > { %v6948_v10 = vpop.xlane.xlu1 %2715 }
 0x250   : > { %3329 = vadd.xlane.f32.xlu0 %v6946_v27  ;;  %v2466_v23 = vpop.f32.mrf.mxu1 }
 0x251   : > { %v6953_v31 = vpop.xlane.xlu0 %2717  ;;  %v6975_v54 = vpop.eup %5403  ;;  %v6981_v26 = vadd.f32 %v6530_v51, %v2466_v23 }
 0x252   : > { %3331 = vadd.xlane.f32.xlu1 %v6951_v2  ;;  %v3087_v2 = vmul.f32 1.442695, %v2950_v59  ;;  %8670 = vst [vmem:[#allocation44_spill] sm:$0xff] %v6975_v54  ;;  %v2952_v59 = vsub.f32 %v6607_v53, %v2708_v36  ;;  %v6994_v48 = vpop.eup %5405 }
 0x253   : > { %v6960_v21 = vpop.xlane.xlu1 %2719  ;;  %8671 = vst [vmem:[#allocation45_spill] sm:$0xff] %v6981_v26  ;;  %8673 = vst [vmem:[#allocation47_spill] sm:$0xff] %v6994_v48 }
 0x254   : > { %2849 = vmax.xlane.f32.xlu0 %v6957_v41  ;;  %5411 = vpow2.f32 %v3087_v2  ;;  %v6988_v41 = vadd.f32 %v5288_v7, %v6530_v51  ;;  %v6999_v2 = vpop.eup %5407  ;;  %v2953_v7 = vsub.f32 %v6614_v60, %v6929_v57 }
 0x255   : > { %v6967_v27 = vpop.xlane.xlu0 %2721  ;;  %8674 = vst [vmem:[#allocation48_spill] sm:$0xff] %v6999_v2  ;;  %5413 = vpow2.f32 %v3089_v19 }
 0x256   : > { %2851 = vmax.xlane.f32.xlu1 %v6964_v45  ;;  %v5291_v45 = vpop.f32.mrf.mxu1  ;;  %8672 = vst [vmem:[#allocation46_spill] sm:$0xff] %v6988_v41  ;;  %v3093_v60 = vmul.f32 1.442695, %v2953_v7 }
 0x257   : > { %v6972_v15 = vpop.xlane.xlu1 %2723  ;;  %v7020_v57 = vpop.eup %5409 }
 0x258   : > { %3333 = vadd.xlane.f32.xlu0 %v6970_v37  ;;  %v2476_v11 = vpop.f32.mrf.mxu1  ;;  %8677 = vst [vmem:[#allocation51_spill] sm:$0xff] %v7020_v57 }
 0x259   : > { %v6977_v42 = vpop.xlane.xlu0 %2725  ;;  %v7006_v36 = vadd.f32 %v6530_v51, %v2476_v11 }
 0x25a   : > { %3335 = vadd.xlane.f32.xlu1 %v6975_v54  ;;  %v3091_v54 = vmul.f32 1.442695, %v2952_v59  ;;  %v2954_v59 = vsub.f32 %v6619_v1, %v6936_v63 }
 0x25b   : > { %v6984_v5 = vpop.xlane.xlu1 %2727  ;;  %8675 = vst [vmem:[#allocation49_spill] sm:$0xff] %v7006_v36 }
 0x25c   : > { %2853 = vmax.xlane.f32.xlu0 %v6981_v26  ;;  %5415 = vpow2.f32 %v3091_v54  ;;  %v7014_v26 = vadd.f32 %v5291_v45, %v6530_v51  ;;  %v2955_v45 = vsub.f32 %v6626_v8, %v6943_v0 }
 0x25d   : > { %v6991_v37 = vpop.xlane.xlu0 %2729  ;;  %5417 = vpow2.f32 %v3093_v60 }
 0x25e   : > { %2855 = vmax.xlane.f32.xlu1 %v6988_v41  ;;  %v5294_v41 = vpop.f32.mrf.mxu1  ;;  %8676 = vst [vmem:[#allocation50_spill] sm:$0xff] %v7014_v26  ;;  %v3097_v8 = vmul.f32 1.442695, %v2955_v45 }
 0x25f   : > { %v6996_v23 = vpop.xlane.xlu1 %2731 }
 0x260   : > { %3337 = vadd.xlane.f32.xlu0 %v6994_v48  ;;  %v2486_v11 = vpop.f32.mrf.mxu1  ;;  %v3095_v48 = vmul.f32 1.442695, %v2954_v59  ;;  %v2956_v59 = vsub.f32 %v6631_v13, %v6948_v10  ;;  %v2957_v10 = vsub.f32 %v6637_v20, %v6953_v31 }
 0x261   : > { %v7001_v53 = vpop.xlane.xlu0 %2733  ;;  %v7025_v54 = vpop.eup %5411  ;;  %v7032_v63 = vadd.f32 %v6530_v51, %v2486_v11 }
 0x262   : > { %3339 = vadd.xlane.f32.xlu1 %v6999_v2  ;;  %8678 = vst [vmem:[#allocation52_spill] sm:$0xff] %v7025_v54  ;;  %5419 = vpow2.f32 %v3095_v48  ;;  %v7046_v0 = vpop.eup %5413  ;;  %v3101_v20 = vmul.f32 1.442695, %v2957_v10 }
 0x263   : > { %v7009_v30 = vpop.xlane.xlu1 %2735  ;;  %8679 = vst [vmem:[#allocation53_spill] sm:$0xff] %v7032_v63  ;;  %8681 = vst [vmem:[#allocation55_spill] sm:$0xff] %v7046_v0  ;;  %5421 = vpow2.f32 %v3097_v8 }
 0x264   : > { %2857 = vmax.xlane.f32.xlu0 %v7006_v36  ;;  %v7040_v36 = vadd.f32 %v5294_v41, %v6530_v51 }
 0x265   : > { %v7017_v19 = vpop.xlane.xlu0 %2737 }
 0x266   : > { %2859 = vmax.xlane.f32.xlu1 %v7014_v26  ;;  %v5297_v26 = vpop.f32.mrf.mxu1  ;;  %8680 = vst [vmem:[#allocation54_spill] sm:$0xff] %v7040_v36 }
 0x267   : > { %v7022_v2 = vpop.xlane.xlu1 %2739 }
 0x268   : > { %3341 = vadd.xlane.f32.xlu0 %v7020_v57  ;;  %v2496_v11 = vpop.f32.mrf.mxu1  ;;  %v3099_v57 = vmul.f32 1.442695, %v2956_v59  ;;  %v2958_v59 = vsub.f32 %v6643_v25, %v6960_v21  ;;  %v7086_v21 = vld [vmem:[%s8465_s4] ss:$0 sm:$0xff] }
 0x269   : > { %v7027_v1 = vpop.xlane.xlu0 %2741  ;;  %v7051_v48 = vpop.eup %5415  ;;  %v7058_v41 = vadd.f32 %v6530_v51, %v2496_v11 }
 0x26a   : > { %3343 = vadd.xlane.f32.xlu1 %v7025_v54  ;;  %8682 = vst [vmem:[#allocation56_spill] sm:$0xff] %v7051_v48  ;;  %5423 = vpow2.f32 %v3099_v57  ;;  %v7072_v31 = vpop.eup %5417 }
 0x26b   : > { %v7035_v7 = vpop.xlane.xlu1 %2743  ;;  %8683 = vst [vmem:[#allocation57_spill] sm:$0xff] %v7058_v41  ;;  %8685 = vst [vmem:[#allocation59_spill] sm:$0xff] %v7072_v31  ;;  %5425 = vpow2.f32 %v3101_v20  ;;  %v2960_v20 = vsub.f32 %v6655_v38, %v6972_v15  ;;  %v2961_v15 = vsub.f32 %v6661_v46, %v6977_v42 }
 0x26c   : > { %2861 = vmax.xlane.f32.xlu0 %v7032_v63  ;;  %v7066_v63 = vadd.f32 %v5297_v26, %v6530_v51  ;;  %v2959_v51 = vsub.f32 %v6649_v33, %v6967_v27 }
 0x26d   : > { %v7043_v60 = vpop.xlane.xlu0 %2745  ;;  %v3109_v46 = vmul.f32 1.442695, %v2961_v15 }
 0x26e   : > { %2863 = vmax.xlane.f32.xlu1 %v7040_v36  ;;  %v5300_v36 = vpop.f32.mrf.mxu1  ;;  %8684 = vst [vmem:[#allocation58_spill] sm:$0xff] %v7066_v63  ;;  %v3105_v27 = vmul.f32 1.442695, %v2959_v51 }
 0x26f   : > { %v7048_v54 = vpop.xlane.xlu1 %2747  ;;  %v7077_v57 = vpop.eup %5419 }
 0x270   : > { %3345 = vadd.xlane.f32.xlu0 %v7046_v0  ;;  %v2506_v11 = vpop.f32.mrf.mxu1  ;;  %v3103_v0 = vmul.f32 1.442695, %v2958_v59  ;;  %8686 = vst [vmem:[#allocation60_spill] sm:$0xff] %v7077_v57 }
 0x271   : > { %v7053_v13 = vpop.xlane.xlu0 %2749  ;;  %v7089_v26 = vadd.f32 %v7086_v21, %v2506_v11  ;;  %v7103_v11 = vpop.eup %5421 }
 0x272   : > { %3347 = vadd.xlane.f32.xlu1 %v7051_v48  ;;  %v5303_v59 = vpop.f32.mrf.mxu1  ;;  %5427 = vpow2.f32 %v3103_v0  ;;  %8689 = vst [vmem:[#allocation63_spill] sm:$0xff] %v7103_v11 }
 0x273   : > { %v7061_v45 = vpop.xlane.xlu1 %2751  ;;  %8687 = vst [vmem:[#allocation61_spill] sm:$0xff] %v7089_v26  ;;  %5429 = vpow2.f32 %v3105_v27 }
 0x274   : > { %2865 = vmax.xlane.f32.xlu0 %v7058_v41  ;;  %v2516_v41 = vpop.f32.mrf.mxu1 }
 0x275   : > { %v7069_v8 = vpop.xlane.xlu0 %2753 }
 0x276   : > { %2867 = vmax.xlane.f32.xlu1 %v7066_v63  ;;  %v7097_v63 = vadd.f32 %v7086_v21, %v5300_v36  ;;  %v7115_v36 = vadd.f32 %v7086_v21, %v2516_v41 }
 0x277   : > { %v7074_v48 = vpop.xlane.xlu1 %2755  ;;  %v7108_v0 = vpop.eup %5423 }
 0x278   : > { %3349 = vadd.xlane.f32.xlu0 %v7072_v31  ;;  %8688 = vst [vmem:[#allocation62_spill] sm:$0xff] %v7097_v63  ;;  %v3107_v31 = vmul.f32 1.442695, %v2960_v20  ;;  %8690 = vst [vmem:[#allocation64_spill] sm:$0xff] %v7108_v0  ;;  %v2962_v20 = vsub.f32 %v6667_v52, %v6984_v5  ;;  %v7129_v42 = vpop.eup %5425  ;;  %v2963_v5 = vsub.f32 %v6673_v61, %v6991_v37 }
 0x279   : > { %v7079_v25 = vpop.xlane.xlu0 %2757  ;;  %8691 = vst [vmem:[#allocation65_spill] sm:$0xff] %v7115_v36  ;;  %8693 = vst [vmem:[#allocation67_spill] sm:$0xff] %v7129_v42 }
 0x27a   : > { %3351 = vadd.xlane.f32.xlu1 %v7077_v57  ;;  %5431 = vpow2.f32 %v3107_v31  ;;  %v3113_v61 = vmul.f32 1.442695, %v2963_v5 }
 0x27b   : > { %v7092_v10 = vpop.xlane.xlu1 %2759  ;;  %5433 = vpow2.f32 %v3109_v46 }
 0x27c   : > { %2869 = vmax.xlane.f32.xlu0 %v7089_v26  ;;  %v7123_v26 = vadd.f32 %v7086_v21, %v5303_v59 }
 0x27d   : > { %v7100_v33 = vpop.xlane.xlu0 %2761 }
 0x27e   : > { %2871 = vmax.xlane.f32.xlu1 %v7097_v63  ;;  %v5306_v63 = vpop.f32.mrf.mxu1  ;;  %8692 = vst [vmem:[#allocation66_spill] sm:$0xff] %v7123_v26 }
 0x27f   : > { %v7105_v57 = vpop.xlane.xlu1 %2763  ;;  %v7134_v31 = vpop.eup %5427 }
 0x280   : > { %3353 = vadd.xlane.f32.xlu0 %v7103_v11  ;;  %v2526_v41 = vpop.f32.mrf.mxu1  ;;  %v3111_v11 = vmul.f32 1.442695, %v2962_v20  ;;  %8694 = vst [vmem:[#allocation68_spill] sm:$0xff] %v7134_v31  ;;  %v2964_v20 = vsub.f32 %v6679_v4, %v6996_v23  ;;  %v7155_v37 = vpop.eup %5429  ;;  %v2965_v23 = vsub.f32 %v6685_v12, %v7001_v53 }
 0x281   : > { %v7110_v38 = vpop.xlane.xlu0 %2765  ;;  %v7141_v59 = vadd.f32 %v7086_v21, %v2526_v41  ;;  %8697 = vst [vmem:[#allocation71_spill] sm:$0xff] %v7155_v37 }
 0x282   : > { %3355 = vadd.xlane.f32.xlu1 %v7108_v0  ;;  %5435 = vpow2.f32 %v3111_v11  ;;  %v3117_v12 = vmul.f32 1.442695, %v2965_v23 }
 0x283   : > { %v7118_v51 = vpop.xlane.xlu1 %2767  ;;  %8695 = vst [vmem:[#allocation69_spill] sm:$0xff] %v7141_v59  ;;  %5437 = vpow2.f32 %v3113_v61 }
 0x284   : > { %2873 = vmax.xlane.f32.xlu0 %v7115_v36  ;;  %v7149_v36 = vadd.f32 %v7086_v21, %v5306_v63 }
 0x285   : > { %v7126_v27 = vpop.xlane.xlu0 %2769 }
 0x286   : > { %2875 = vmax.xlane.f32.xlu1 %v7123_v26  ;;  %v5309_v26 = vpop.f32.mrf.mxu1  ;;  %8696 = vst [vmem:[#allocation70_spill] sm:$0xff] %v7149_v36 }
 0x287   : > { %v7131_v0 = vpop.xlane.xlu1 %2771  ;;  %v7160_v11 = vpop.eup %5431 }
 0x288   : > { %3357 = vadd.xlane.f32.xlu0 %v7129_v42  ;;  %v2536_v41 = vpop.f32.mrf.mxu1  ;;  %v3115_v42 = vmul.f32 1.442695, %v2964_v20  ;;  %8698 = vst [vmem:[#allocation72_spill] sm:$0xff] %v7160_v11  ;;  %v2966_v20 = vsub.f32 %v6691_v18, %v7009_v30  ;;  %v7181_v53 = vpop.eup %5433  ;;  %v2967_v30 = vsub.f32 %v6697_v28, %v7017_v19 }
 0x289   : > { %v7136_v52 = vpop.xlane.xlu0 %2773  ;;  %v7167_v63 = vadd.f32 %v7086_v21, %v2536_v41  ;;  %8701 = vst [vmem:[#allocation75_spill] sm:$0xff] %v7181_v53 }
 0x28a   : > { %3359 = vadd.xlane.f32.xlu1 %v7134_v31  ;;  %5439 = vpow2.f32 %v3115_v42  ;;  %v3121_v28 = vmul.f32 1.442695, %v2967_v30 }
 0x28b   : > { %v7144_v15 = vpop.xlane.xlu1 %2775  ;;  %8699 = vst [vmem:[#allocation73_spill] sm:$0xff] %v7167_v63  ;;  %5441 = vpow2.f32 %v3117_v12 }
 0x28c   : > { %2877 = vmax.xlane.f32.xlu0 %v7141_v59  ;;  %v7175_v59 = vadd.f32 %v7086_v21, %v5309_v26 }
 0x28d   : > { %v7152_v46 = vpop.xlane.xlu0 %2777 }
 0x28e   : > { %2879 = vmax.xlane.f32.xlu1 %v7149_v36  ;;  %v5312_v36 = vpop.f32.mrf.mxu1  ;;  %8700 = vst [vmem:[#allocation74_spill] sm:$0xff] %v7175_v59 }
 0x28f   : > { %v7157_v31 = vpop.xlane.xlu1 %2779  ;;  %v7186_v42 = vpop.eup %5435 }
 0x290   : > { %3361 = vadd.xlane.f32.xlu0 %v7155_v37  ;;  %v2546_v41 = vpop.f32.mrf.mxu1  ;;  %v3119_v37 = vmul.f32 1.442695, %v2966_v20  ;;  %8702 = vst [vmem:[#allocation76_spill] sm:$0xff] %v7186_v42  ;;  %v2968_v20 = vsub.f32 %v6703_v32, %v7022_v2  ;;  %v7207_v19 = vpop.eup %5437  ;;  %v2969_v2 = vsub.f32 %v6708_v39, %v7027_v1 }
 0x291   : > { %v7162_v4 = vpop.xlane.xlu0 %2781  ;;  %v7193_v26 = vadd.f32 %v7086_v21, %v2546_v41  ;;  %8705 = vst [vmem:[#allocation79_spill] sm:$0xff] %v7207_v19 }
 0x292   : > { %3363 = vadd.xlane.f32.xlu1 %v7160_v11  ;;  %5443 = vpow2.f32 %v3119_v37  ;;  %v3125_v39 = vmul.f32 1.442695, %v2969_v2 }
 0x293   : > { %v7170_v5 = vpop.xlane.xlu1 %2783  ;;  %8703 = vst [vmem:[#allocation77_spill] sm:$0xff] %v7193_v26  ;;  %5445 = vpow2.f32 %v3121_v28 }
 0x294   : > { %2881 = vmax.xlane.f32.xlu0 %v7167_v63  ;;  %v7201_v63 = vadd.f32 %v7086_v21, %v5312_v36 }
 0x295   : > { %v7178_v61 = vpop.xlane.xlu0 %2785 }
 0x296   : > { %2883 = vmax.xlane.f32.xlu1 %v7175_v59  ;;  %v5315_v59 = vpop.f32.mrf.mxu1  ;;  %8704 = vst [vmem:[#allocation78_spill] sm:$0xff] %v7201_v63 }
 0x297   : > { %v7183_v11 = vpop.xlane.xlu1 %2787  ;;  %v7212_v37 = vpop.eup %5439 }
 0x298   : > { %3365 = vadd.xlane.f32.xlu0 %v7181_v53  ;;  %v2556_v41 = vpop.f32.mrf.mxu1  ;;  %v3123_v53 = vmul.f32 1.442695, %v2968_v20  ;;  %8706 = vst [vmem:[#allocation80_spill] sm:$0xff] %v7212_v37  ;;  %v2970_v20 = vsub.f32 %v6713_v34, %v7035_v7  ;;  %v7233_v1 = vpop.eup %5441  ;;  %v2971_v7 = vsub.f32 %v6718_v44, %v7043_v60 }
 0x299   : > { %v7188_v18 = vpop.xlane.xlu0 %2789  ;;  %v7219_v36 = vadd.f32 %v7086_v21, %v2556_v41  ;;  %8709 = vst [vmem:[#allocation83_spill] sm:$0xff] %v7233_v1 }
 0x29a   : > { %3367 = vadd.xlane.f32.xlu1 %v7186_v42  ;;  %5447 = vpow2.f32 %v3123_v53  ;;  %v3129_v44 = vmul.f32 1.442695, %v2971_v7 }
 0x29b   : > { %v7196_v23 = vpop.xlane.xlu1 %2791  ;;  %8707 = vst [vmem:[#allocation81_spill] sm:$0xff] %v7219_v36  ;;  %5449 = vpow2.f32 %v3125_v39 }
 0x29c   : > { %2885 = vmax.xlane.f32.xlu0 %v7193_v26  ;;  %v7227_v26 = vadd.f32 %v7086_v21, %v5315_v59 }
 0x29d   : > { %v7204_v12 = vpop.xlane.xlu0 %2793 }
 0x29e   : > { %2887 = vmax.xlane.f32.xlu1 %v7201_v63  ;;  %v5318_v63 = vpop.f32.mrf.mxu1  ;;  %8708 = vst [vmem:[#allocation82_spill] sm:$0xff] %v7227_v26 }
 0x29f   : > { %v7209_v42 = vpop.xlane.xlu1 %2795  ;;  %v7238_v53 = vpop.eup %5443 }
 0x2a0   : > { %3369 = vadd.xlane.f32.xlu0 %v7207_v19  ;;  %v2566_v41 = vpop.f32.mrf.mxu1  ;;  %v3127_v19 = vmul.f32 1.442695, %v2970_v20  ;;  %8710 = vst [vmem:[#allocation84_spill] sm:$0xff] %v7238_v53  ;;  %v2972_v20 = vsub.f32 %v6722_v47, %v7048_v54  ;;  %v7259_v60 = vpop.eup %5445  ;;  %v2973_v54 = vsub.f32 %v6726_v50, %v7053_v13 }
 0x2a1   : > { %v7214_v32 = vpop.xlane.xlu0 %2797  ;;  %v7245_v59 = vadd.f32 %v7086_v21, %v2566_v41  ;;  %8713 = vst [vmem:[#allocation87_spill] sm:$0xff] %v7259_v60 }
 0x2a2   : > { %3371 = vadd.xlane.f32.xlu1 %v7212_v37  ;;  %5451 = vpow2.f32 %v3127_v19  ;;  %v3133_v50 = vmul.f32 1.442695, %v2973_v54 }
 0x2a3   : > { %v7222_v30 = vpop.xlane.xlu1 %2799  ;;  %8711 = vst [vmem:[#allocation85_spill] sm:$0xff] %v7245_v59  ;;  %5453 = vpow2.f32 %v3129_v44 }
 0x2a4   : > { %2889 = vmax.xlane.f32.xlu0 %v7219_v36  ;;  %v7253_v36 = vadd.f32 %v7086_v21, %v5318_v63 }
 0x2a5   : > { %v7230_v28 = vpop.xlane.xlu0 %2801 }
 0x2a6   : > { %2891 = vmax.xlane.f32.xlu1 %v7227_v26  ;;  %v5321_v26 = vpop.f32.mrf.mxu1  ;;  %8712 = vst [vmem:[#allocation86_spill] sm:$0xff] %v7253_v36 }
 0x2a7   : > { %v7235_v37 = vpop.xlane.xlu1 %2803  ;;  %v7264_v19 = vpop.eup %5447 }
 0x2a8   : > { %3373 = vadd.xlane.f32.xlu0 %v7233_v1  ;;  %v2576_v41 = vpop.f32.mrf.mxu1  ;;  %v3131_v1 = vmul.f32 1.442695, %v2972_v20  ;;  %8714 = vst [vmem:[#allocation88_spill] sm:$0xff] %v7264_v19  ;;  %v2974_v20 = vsub.f32 %v6730_v55, %v7061_v45  ;;  %v7285_v13 = vpop.eup %5449  ;;  %v2975_v45 = vsub.f32 %v6734_v58, %v7069_v8 }
 0x2a9   : > { %v7240_v34 = vpop.xlane.xlu0 %2805  ;;  %v7271_v63 = vadd.f32 %v7086_v21, %v2576_v41  ;;  %8717 = vst [vmem:[#allocation91_spill] sm:$0xff] %v7285_v13 }
 0x2aa   : > { %3375 = vadd.xlane.f32.xlu1 %v7238_v53  ;;  %5455 = vpow2.f32 %v3131_v1  ;;  %v3137_v58 = vmul.f32 1.442695, %v2975_v45 }
 0x2ab   : > { %v7248_v2 = vpop.xlane.xlu1 %2807  ;;  %8715 = vst [vmem:[#allocation89_spill] sm:$0xff] %v7271_v63  ;;  %5457 = vpow2.f32 %v3133_v50 }
 0x2ac   : > { %2893 = vmax.xlane.f32.xlu0 %v7245_v59  ;;  %v7279_v59 = vadd.f32 %v7086_v21, %v5321_v26 }
 0x2ad   : > { %v7256_v39 = vpop.xlane.xlu0 %2809 }
 0x2ae   : > { %2895 = vmax.xlane.f32.xlu1 %v7253_v36  ;;  %v5324_v36 = vpop.f32.mrf.mxu1  ;;  %8716 = vst [vmem:[#allocation90_spill] sm:$0xff] %v7279_v59 }
 0x2af   : > { %v7261_v53 = vpop.xlane.xlu1 %2811  ;;  %v7290_v1 = vpop.eup %5451 }
 0x2b0   : > { %3377 = vadd.xlane.f32.xlu0 %v7259_v60  ;;  %v2586_v41 = vpop.f32.mrf.mxu1  ;;  %v3135_v60 = vmul.f32 1.442695, %v2974_v20  ;;  %8718 = vst [vmem:[#allocation92_spill] sm:$0xff] %v7290_v1  ;;  %v2976_v20 = vsub.f32 %v6738_v62, %v7074_v48  ;;  %v7311_v8 = vpop.eup %5453  ;;  %v2977_v48 = vsub.f32 %v6742_v3, %v7079_v25 }
 0x2b1   : > { %v7266_v47 = vpop.xlane.xlu0 %2813  ;;  %v7297_v26 = vadd.f32 %v7086_v21, %v2586_v41  ;;  %8721 = vst [vmem:[#allocation95_spill] sm:$0xff] %v7311_v8 }
 0x2b2   : > { %3379 = vadd.xlane.f32.xlu1 %v7264_v19  ;;  %5459 = vpow2.f32 %v3135_v60  ;;  %v3141_v3 = vmul.f32 1.442695, %v2977_v48 }
 0x2b3   : > { %v7274_v7 = vpop.xlane.xlu1 %2815  ;;  %8719 = vst [vmem:[#allocation93_spill] sm:$0xff] %v7297_v26  ;;  %5461 = vpow2.f32 %v3137_v58 }
 0x2b4   : > { %2897 = vmax.xlane.f32.xlu0 %v7271_v63  ;;  %v7305_v63 = vadd.f32 %v7086_v21, %v5324_v36 }
 0x2b5   : > { %v7282_v44 = vpop.xlane.xlu0 %2817 }
 0x2b6   : > { %2899 = vmax.xlane.f32.xlu1 %v7279_v59  ;;  %v5327_v59 = vpop.f32.mrf.mxu1  ;;  %8720 = vst [vmem:[#allocation94_spill] sm:$0xff] %v7305_v63 }
 0x2b7   : > { %v7287_v19 = vpop.xlane.xlu1 %2819  ;;  %v7316_v60 = vpop.eup %5455 }
 0x2b8   : > { %3381 = vadd.xlane.f32.xlu0 %v7285_v13  ;;  %v2596_v41 = vpop.f32.mrf.mxu1  ;;  %v3139_v13 = vmul.f32 1.442695, %v2976_v20  ;;  %8722 = vst [vmem:[#allocation96_spill] sm:$0xff] %v7316_v60  ;;  %v2978_v20 = vsub.f32 %v6746_v6, %v7092_v10  ;;  %v7337_v25 = vpop.eup %5457  ;;  %v2979_v10 = vsub.f32 %v6750_v9, %v7100_v33 }
 0x2b9   : > { %v7292_v55 = vpop.xlane.xlu0 %2821  ;;  %v7323_v36 = vadd.f32 %v7086_v21, %v2596_v41  ;;  %8725 = vst [vmem:[#allocation99_spill] sm:$0xff] %v7337_v25 }
 0x2ba   : > { %3383 = vadd.xlane.f32.xlu1 %v7290_v1  ;;  %5463 = vpow2.f32 %v3139_v13  ;;  %v3145_v9 = vmul.f32 1.442695, %v2979_v10 }
 0x2bb   : > { %v7300_v54 = vpop.xlane.xlu1 %2823  ;;  %8723 = vst [vmem:[#allocation97_spill] sm:$0xff] %v7323_v36  ;;  %5465 = vpow2.f32 %v3141_v3 }
 0x2bc   : > { %2901 = vmax.xlane.f32.xlu0 %v7297_v26  ;;  %v7331_v26 = vadd.f32 %v7086_v21, %v5327_v59 }
 0x2bd   : > { %v7308_v50 = vpop.xlane.xlu0 %2825 }
 0x2be   : > { %2903 = vmax.xlane.f32.xlu1 %v7305_v63  ;;  %v5330_v63 = vpop.f32.mrf.mxu1  ;;  %8724 = vst [vmem:[#allocation98_spill] sm:$0xff] %v7331_v26 }
 0x2bf   : > { %v7313_v1 = vpop.xlane.xlu1 %2827  ;;  %v7342_v13 = vpop.eup %5459 }
 0x2c0   : > { %3385 = vadd.xlane.f32.xlu0 %v7311_v8  ;;  %v2606_v41 = vpop.f32.mrf.mxu1  ;;  %v3143_v8 = vmul.f32 1.442695, %v2978_v20  ;;  %8726 = vst [vmem:[#allocation100_spill] sm:$0xff] %v7342_v13  ;;  %v2980_v20 = vsub.f32 %v6754_v14, %v7105_v57  ;;  %v7363_v33 = vpop.eup %5461  ;;  %v2981_v57 = vsub.f32 %v6758_v16, %v7110_v38 }
 0x2c1   : > { %v7318_v62 = vpop.xlane.xlu0 %2829  ;;  %v7349_v59 = vadd.f32 %v7086_v21, %v2606_v41  ;;  %8729 = vst [vmem:[#allocation103_spill] sm:$0xff] %v7363_v33 }
 0x2c2   : > { %3387 = vadd.xlane.f32.xlu1 %v7316_v60  ;;  %5467 = vpow2.f32 %v3143_v8  ;;  %v3149_v16 = vmul.f32 1.442695, %v2981_v57 }
 0x2c3   : > { %v7326_v45 = vpop.xlane.xlu1 %2831  ;;  %8727 = vst [vmem:[#allocation101_spill] sm:$0xff] %v7349_v59  ;;  %5469 = vpow2.f32 %v3145_v9 }
 0x2c4   : > { %2905 = vmax.xlane.f32.xlu0 %v7323_v36  ;;  %v7357_v36 = vadd.f32 %v7086_v21, %v5330_v63 }
 0x2c5   : > { %v7334_v58 = vpop.xlane.xlu0 %2833 }
 0x2c6   : > { %2907 = vmax.xlane.f32.xlu1 %v7331_v26  ;;  %v5333_v26 = vpop.f32.mrf.mxu1  ;;  %8728 = vst [vmem:[#allocation102_spill] sm:$0xff] %v7357_v36 }
 0x2c7   : > { %v7339_v60 = vpop.xlane.xlu1 %2835  ;;  %v7368_v8 = vpop.eup %5463 }
 0x2c8   : > { %3389 = vadd.xlane.f32.xlu0 %v7337_v25  ;;  %v2616_v41 = vpop.f32.mrf.mxu1  ;;  %v3147_v25 = vmul.f32 1.442695, %v2980_v20  ;;  %8730 = vst [vmem:[#allocation104_spill] sm:$0xff] %v7368_v8  ;;  %v2982_v20 = vsub.f32 %v6762_v22, %v7118_v51  ;;  %v7385_v38 = vpop.eup %5465 }
 0x2c9   : > { %v7344_v6 = vpop.xlane.xlu0 %2837  ;;  %v7373_v63 = vadd.f32 %v7086_v21, %v2616_v41  ;;  %8733 = vst [vmem:[#allocation107_spill] sm:$0xff] %v7385_v38 }
 0x2ca   : > { %3391 = vadd.xlane.f32.xlu1 %v7342_v13 }
 0x2cb   : > { %v7352_v48 = vpop.xlane.xlu1 %2839  ;;  %8731 = vst [vmem:[#allocation105_spill] sm:$0xff] %v7373_v63 }
 0x2cc   : > { %2909 = vmax.xlane.f32.xlu0 %v7349_v59  ;;  %v7379_v59 = vadd.f32 %v7086_v21, %v5333_v26  ;;  %v2983_v26 = vsub.f32 %v6766_v24, %v7126_v27 }
 0x2cd   : > { %v7360_v3 = vpop.xlane.xlu0 %2841 }
 0x2ce   : > { %2911 = vmax.xlane.f32.xlu1 %v7357_v36  ;;  %v5336_v36 = vpop.f32.mrf.mxu1  ;;  %8732 = vst [vmem:[#allocation106_spill] sm:$0xff] %v7379_v59  ;;  %v3153_v27 = vmul.f32 1.442695, %v2983_v26  ;;  %v2985_v26 = vsub.f32 %v6774_v35, %v7136_v52 }
 0x2cf   : > { %v7365_v13 = vpop.xlane.xlu1 %2843  ;;  %v7390_v22 = vpop.eup %5467 }
 0x2d0   : > { %3393 = vadd.xlane.f32.xlu0 %v7363_v33  ;;  %v2626_v41 = vpop.f32.mrf.mxu1  ;;  %8735 = vst [vmem:[#allocation109_spill] sm:$0xff] %v7390_v22 }
 0x2d1   : > { %v3326_v14 = vpop.xlane.xlu0 %3325 }
 0x2d2   : > { %3395 = vadd.xlane.f32.xlu1 %v7368_v8  ;;  %5471 = vrcp.f32 %v3326_v14 }
 0x2d3   : > { %v3328_v10 = vpop.xlane.xlu1 %3327  ;;  %5473 = vpow2.f32 %v3147_v25  ;;  %v3151_v25 = vmul.f32 1.442695, %v2982_v20  ;;  %v2984_v20 = vsub.f32 %v6770_v29, %v7131_v0 }
 0x2d4   : > { %2913 = vmax.xlane.f32.xlu0 %v7373_v63  ;;  %5475 = vrcp.f32 %v3328_v10  ;;  %v7395_v63 = vadd.f32 %v7086_v21, %v2626_v41 }
 0x2d5   : > { %v7382_v9 = vpop.xlane.xlu0 %2845  ;;  %5477 = vpow2.f32 %v3149_v16  ;;  %v7407_v16 = vpop.eup %5469  ;;  %v3155_v33 = vmul.f32 1.442695, %v2984_v20 }
 0x2d6   : > { %2915 = vmax.xlane.f32.xlu1 %v7379_v59  ;;  %8736 = vst [vmem:[#allocation110_spill] sm:$0xff] %v7395_v63  ;;  %v5339_v59 = vpop.f32.mrf.mxu1  ;;  %8739 = vst [vmem:[#allocation113_spill] sm:$0xff] %v7407_v16 }
 0x2d7   : > { %v7387_v8 = vpop.xlane.xlu1 %2847  ;;  %v7431_v35 = vadd.f32 %v7086_v21, %v5339_v59 }
 0x2d8   : > { %8734 = vst [vmem:[#allocation108_spill] sm:$0xff] %v7387_v8  ;;  %3397 = vadd.xlane.f32.xlu0 %v7385_v38  ;;  %v7401_v38 = vadd.f32 %v7086_v21, %v5336_v36  ;;  %v2636_v41 = vpop.f32.mrf.mxu1 }
 0x2d9   : > { %v3330_v51 = vpop.xlane.xlu0 %3329 }
 0x2da   : > { %3399 = vadd.xlane.f32.xlu1 %v7390_v22  ;;  %5479 = vrcp.f32 %v3330_v51  ;;  %8737 = vst [vmem:[#allocation111_spill] sm:$0xff] %v7401_v38 }
 0x2db   : > { %v3332_v57 = vpop.xlane.xlu1 %3331  ;;  %5481 = vpow2.f32 %v3151_v25 }
 0x2dc   : > { %2917 = vmax.xlane.f32.xlu0 %v7395_v63  ;;  %5483 = vrcp.f32 %v3332_v57 }
 0x2dd   : > { %v7404_v24 = vpop.xlane.xlu0 %2849  ;;  %5485 = vpow2.f32 %v3153_v27  ;;  %v2986_v27 = vsub.f32 %v6778_v40, %v7144_v15 }
 0x2de   : > { %8738 = vst [vmem:[#allocation112_spill] sm:$0xff] %v7404_v24  ;;  %2919 = vmax.xlane.f32.xlu1 %v7401_v38  ;;  %v7420_v38 = vadd.f32 %v7086_v21, %v2636_v41 }
 0x2df   : > { %v7409_v22 = vpop.xlane.xlu1 %2851  ;;  %v5472_v25 = vpop.eup %5471  ;;  %v3159_v8 = vmul.f32 1.442695, %v2986_v27 }
 0x2e0   : > { %8740 = vst [vmem:[#allocation114_spill] sm:$0xff] %v7409_v22  ;;  %3401 = vadd.xlane.f32.xlu0 %v7407_v16  ;;  %v7413_v29 = vpop.eup %5473  ;;  %v3709_v0 = vmul.f32 %v5472_v25, %v3326_v14  ;;  %v5342_v14 = vpop.f32.mrf.mxu1 }
 0x2e1   : > { %8741 = vst [vmem:[#allocation115_spill] sm:$0xff] %v7413_v29  ;;  %v7415_v36 = vpop.xlane.xlu0 %3333  ;;  %v5476_v63 = vpop.eup %5475 }
 0x2e2   : > { %3403 = vadd.xlane.f32.xlu1 %v7413_v29  ;;  %v3837_v20 = vsub.f32 2.0, %v3709_v0  ;;  %v3710_v22 = vmul.f32 %v5476_v63, %v3328_v10  ;;  %5487 = vrcp.f32 %v7415_v36  ;;  %v3157_v10 = vmul.f32 1.442695, %v2985_v26  ;;  %v7438_v29 = vpop.eup %5477  ;;  %v2646_v40 = vpop.f32.mrf.mxu1 }
 0x2e3   : > { %v7426_v16 = vpop.xlane.xlu1 %3335  ;;  %5489 = vpow2.f32 %v3155_v33  ;;  %8742 = vst [vmem:[#allocation116_spill] sm:$0xff] %v7438_v29  ;;  %v7455_v27 = vadd.f32 %v7086_v21, %v2646_v40 }
 0x2e4   : > { %2921 = vmax.xlane.f32.xlu0 %v7420_v38  ;;  %v3965_v52 = vmul.f32 %v5472_v25, %v3837_v20  ;;  %v3838_v41 = vsub.f32 2.0, %v3710_v22  ;;  %5491 = vrcp.f32 %v7426_v16 }
 0x2e5   : > { %v7435_v0 = vpop.xlane.xlu0 %2853  ;;  %5493 = vpow2.f32 %v3157_v10  ;;  %8744 = vst [vmem:[#allocation118_spill] sm:$0xff] %v7455_v27 }
 0x2e6   : > { %2923 = vmax.xlane.f32.xlu1 %v7431_v35  ;;  %v4093_v33 = vmul.f32 %v6924_v17, %v3965_v52  ;;  %v3966_v24 = vmul.f32 %v5476_v63, %v3838_v41  ;;  %v2987_v63 = vsub.f32 %v6782_v43, %v7152_v46 }
 0x2e7   : > { %v7441_v15 = vpop.xlane.xlu1 %2855  ;;  %v5480_v59 = vpop.eup %5479 }
 0x2e8   : > { %3405 = vadd.xlane.f32.xlu0 %v7438_v29  ;;  %v7444_v22 = vpop.eup %5481  ;;  %4221 = vst [vmem:[%s7446_s14] sm:$0xff] %v4093_v33  ;;  %v4094_v25 = vmul.f32 %v6927_v56, %v3966_v24  ;;  %v3711_v26 = vmul.f32 %v5480_v59, %v3330_v51  ;;  %v5345_v56 = vpop.f32.mrf.mxu1  ;;  %v2988_v51 = vsub.f32 %v6786_v49, %v7157_v31  ;;  %v3161_v10 = vmul.f32 1.442695, %v2987_v63 }
 0x2e9   : > { %8743 = vst [vmem:[#allocation117_spill] sm:$0xff] %v7444_v22  ;;  %v7450_v20 = vpop.xlane.xlu0 %3337  ;;  %v5484_v17 = vpop.eup %5483  ;;  %v7465_v24 = vadd.f32 %v7086_v21, %v5342_v14 }
 0x2ea   : > { %3407 = vadd.xlane.f32.xlu1 %v7444_v22  ;;  %4222 = vst [vmem:[%s7446_s14 + $0x8] sm:$0xff] %v4094_v25  ;;  %v3839_v52 = vsub.f32 2.0, %v3711_v26  ;;  %v3712_v41 = vmul.f32 %v5484_v17, %v3332_v57  ;;  %5495 = vrcp.f32 %v7450_v20  ;;  %v7472_v40 = vpop.eup %5485  ;;  %v2656_v31 = vpop.f32.mrf.mxu1  ;;  %v3163_v22 = vmul.f32 1.442695, %v2988_v51 }
 0x2eb   : > { %v7460_v33 = vpop.xlane.xlu1 %3339  ;;  %5497 = vpow2.f32 %v3159_v8  ;;  %8745 = vst [vmem:[#allocation119_spill] sm:$0xff] %v7465_v24  ;;  %8746 = vst [vmem:[#allocation120_spill] sm:$0xff] %v7472_v40  ;;  %v8747_v8 = vld [vmem:[#allocation39_spill] sm:$0xff] }
 0x2ec   : > { %2925 = vmax.xlane.f32.xlu0 %v7455_v27  ;;  %v3967_v43 = vmul.f32 %v5480_v59, %v3839_v52  ;;  %v3840_v46 = vsub.f32 2.0, %v3712_v41  ;;  %5499 = vrcp.f32 %v7460_v33  ;;  %v8749_v52 = vld [vmem:[#allocation40_spill] sm:$0xff] }
 0x2ed   : > { %v7469_v57 = vpop.xlane.xlu0 %2857  ;;  %5501 = vpow2.f32 %v3161_v10  ;;  %v8752_v10 = vld [vmem:[#allocation6_spill] sm:$0xff] }
 0x2ee   : > { %2927 = vmax.xlane.f32.xlu1 %v7465_v24  ;;  %v4095_v25 = vmul.f32 %v8747_v8, %v3967_v43  ;;  %v3968_v49 = vmul.f32 %v5484_v17, %v3840_v46  ;;  %v8750_v17 = vld [vmem:[#allocation5_spill] sm:$0xff]  ;;  %v7488_v46 = vadd.f32 %v7086_v21, %v2656_v31 }
 0x2ef   : > { %v7475_v14 = vpop.xlane.xlu1 %2859  ;;  %v5488_v26 = vpop.eup %5487  ;;  %v2989_v43 = vsub.f32 %v8750_v17, %v7162_v4  ;;  %v7499_v4 = vadd.f32 %v7086_v21, %v5345_v56 }
 0x2f0   : > { %3409 = vadd.xlane.f32.xlu0 %v7472_v40  ;;  %v7478_v59 = vpop.eup %5489  ;;  %4223 = vst [vmem:[%s7446_s14 + $0x10] sm:$0xff] %v4095_v25  ;;  %v4096_v63 = vmul.f32 %v8749_v52, %v3968_v49  ;;  %v3713_v41 = vmul.f32 %v5488_v26, %v7415_v36  ;;  %8751 = vst [vmem:[#allocation40_spill] sm:$0xff] %v7488_v46  ;;  %v5348_v36 = vpop.f32.mrf.mxu1  ;;  %v2990_v49 = vsub.f32 %v8752_v10, %v7170_v5  ;;  %v8756_v5 = vld [vmem:[#allocation43_spill] sm:$0xff] }
 0x2f1   : > { %8748 = vst [vmem:[#allocation39_spill] sm:$0xff] %v7478_v59  ;;  %v7483_v29 = vpop.xlane.xlu0 %3341  ;;  %v5492_v24 = vpop.eup %5491  ;;  %8753 = vst [vmem:[#allocation5_spill] sm:$0xff] %v7499_v4 }
 0x2f2   : > { %3411 = vadd.xlane.f32.xlu1 %v7478_v59  ;;  %4224 = vst [vmem:[%s7446_s14 + $0x18] sm:$0xff] %v4096_v63  ;;  %v3841_v51 = vsub.f32 2.0, %v3713_v41  ;;  %v3714_v8 = vmul.f32 %v5492_v24, %v7426_v16  ;;  %5503 = vrcp.f32 %v7483_v29  ;;  %v3165_v63 = vmul.f32 1.442695, %v2989_v43  ;;  %v8754_v41 = vld [vmem:[#allocation7_spill] sm:$0xff]  ;;  %v2666_v59 = vpop.f32.mrf.mxu1 }
 0x2f3   : > { %v7494_v25 = vpop.xlane.xlu1 %3343  ;;  %5505 = vpow2.f32 %v3163_v22  ;;  %v2991_v17 = vsub.f32 %v8754_v41, %v7178_v61  ;;  %v7508_v22 = vpop.eup %5493  ;;  %v8759_v61 = vld [vmem:[#allocation44_spill] sm:$0xff]  ;;  %v7526_v27 = vadd.f32 %v7086_v21, %v2666_v59 }
 0x2f4   : > { %2929 = vmax.xlane.f32.xlu0 %v7488_v46  ;;  %v3969_v31 = vmul.f32 %v5488_v26, %v3841_v51  ;;  %v3842_v52 = vsub.f32 2.0, %v3714_v8  ;;  %5507 = vrcp.f32 %v7494_v25  ;;  %8755 = vst [vmem:[#allocation6_spill] sm:$0xff] %v7508_v22  ;;  %v3167_v51 = vmul.f32 1.442695, %v2990_v49  ;;  %v8757_v8 = vld [vmem:[#allocation8_spill] sm:$0xff] }
 0x2f5   : > { %v7503_v16 = vpop.xlane.xlu0 %2861  ;;  %v2992_v46 = vsub.f32 %v8757_v8, %v7183_v11  ;;  %5509 = vpow2.f32 %v3165_v63 }
 0x2f6   : > { %2931 = vmax.xlane.f32.xlu1 %v7499_v4  ;;  %v4097_v56 = vmul.f32 %v8756_v5, %v3969_v31  ;;  %v3970_v10 = vmul.f32 %v5492_v24, %v3842_v52  ;;  %v3169_v52 = vmul.f32 1.442695, %v2991_v17  ;;  %v8760_v5 = vld [vmem:[#allocation9_spill] sm:$0xff]  ;;  %v8761_v17 = vld [vmem:[#allocation10_spill] sm:$0xff] }
 0x2f7   : > { %v7511_v40 = vpop.xlane.xlu1 %2863  ;;  %v5496_v26 = vpop.eup %5495  ;;  %v2993_v49 = vsub.f32 %v8760_v5, %v7188_v18  ;;  %v3171_v63 = vmul.f32 1.442695, %v2992_v46  ;;  %v2994_v8 = vsub.f32 %v8761_v17, %v7196_v23  ;;  %v7537_v18 = vadd.f32 %v7086_v21, %v5348_v36  ;;  %v8763_v36 = vld [vmem:[#allocation47_spill] sm:$0xff] }
 0x2f8   : > { %3413 = vadd.xlane.f32.xlu0 %v7508_v22  ;;  %v7516_v43 = vpop.eup %5497  ;;  %4225 = vst [vmem:[%s7446_s14 + $0x20] sm:$0xff] %v4097_v56  ;;  %v4098_v41 = vmul.f32 %v8759_v61, %v3970_v10  ;;  %v3715_v4 = vmul.f32 %v5496_v26, %v7450_v20  ;;  %v5351_v10 = vpop.f32.mrf.mxu1 }
 0x2f9   : > { %8758 = vst [vmem:[#allocation7_spill] sm:$0xff] %v7516_v43  ;;  %v7521_v31 = vpop.xlane.xlu0 %3345  ;;  %v5500_v24 = vpop.eup %5499 }
 0x2fa   : > { %3415 = vadd.xlane.f32.xlu1 %v7516_v43  ;;  %4226 = vst [vmem:[%s7446_s14 + $0x28] sm:$0xff] %v4098_v41  ;;  %v3843_v11 = vsub.f32 2.0, %v3715_v4  ;;  %v3716_v56 = vmul.f32 %v5500_v24, %v7460_v33  ;;  %5511 = vrcp.f32 %v7521_v31  ;;  %v3173_v4 = vmul.f32 1.442695, %v2993_v49  ;;  %v7546_v23 = vpop.eup %5501  ;;  %v2676_v17 = vpop.f32.mrf.mxu1 }
 0x2fb   : > { %v7532_v20 = vpop.xlane.xlu1 %3347  ;;  %5513 = vpow2.f32 %v3167_v51  ;;  %v8762_v51 = vld [vmem:[#allocation11_spill] sm:$0xff]  ;;  %v7564_v22 = vadd.f32 %v7086_v21, %v2676_v17 }
 0x2fc   : > { %2933 = vmax.xlane.f32.xlu0 %v7526_v27  ;;  %v3971_v59 = vmul.f32 %v5496_v26, %v3843_v11  ;;  %v3844_v61 = vsub.f32 2.0, %v3716_v56  ;;  %5515 = vrcp.f32 %v7532_v20  ;;  %v2995_v46 = vsub.f32 %v8762_v51, %v7204_v12  ;;  %v8765_v51 = vld [vmem:[#allocation48_spill] sm:$0xff] }
 0x2fd   : > { %v7541_v33 = vpop.xlane.xlu0 %2865  ;;  %5517 = vpow2.f32 %v3169_v52  ;;  %v3175_v56 = vmul.f32 1.442695, %v2994_v8  ;;  %v8764_v52 = vld [vmem:[#allocation12_spill] sm:$0xff] }
 0x2fe   : > { %2935 = vmax.xlane.f32.xlu1 %v7537_v18  ;;  %v4099_v41 = vmul.f32 %v8763_v36, %v3971_v59  ;;  %v3972_v5 = vmul.f32 %v5500_v24, %v3844_v61  ;;  %5519 = vpow2.f32 %v3171_v63  ;;  %v2996_v49 = vsub.f32 %v8764_v52, %v7209_v42  ;;  %v8766_v63 = vld [vmem:[#allocation13_spill] sm:$0xff] }
 0x2ff   : > { %v7549_v26 = vpop.xlane.xlu1 %2867  ;;  %v5504_v11 = vpop.eup %5503  ;;  %5521 = vpow2.f32 %v3173_v4  ;;  %v3177_v36 = vmul.f32 1.442695, %v2995_v46  ;;  %v2997_v8 = vsub.f32 %v8766_v63, %v7214_v32  ;;  %v8767_v4 = vld [vmem:[#allocation14_spill] sm:$0xff]  ;;  %v7575_v32 = vadd.f32 %v7086_v21, %v5351_v10  ;;  %v8769_v21 = vld [vmem:[#allocation51_spill] sm:$0xff] }
 0x300   : > { %3417 = vadd.xlane.f32.xlu0 %v7546_v23  ;;  %v7554_v12 = vpop.eup %5505  ;;  %4227 = vst [vmem:[%s7446_s14 + $0x30] sm:$0xff] %v4099_v41  ;;  %v4100_v43 = vmul.f32 %v8765_v51, %v3972_v5  ;;  %v3717_v59 = vmul.f32 %v5504_v11, %v7483_v29  ;;  %v3179_v5 = vmul.f32 1.442695, %v2996_v49  ;;  %v2998_v46 = vsub.f32 %v8767_v4, %v7222_v30 }
 0x301   : > { %v7559_v24 = vpop.xlane.xlu0 %3349  ;;  %v5508_v61 = vpop.eup %5507 }
 0x302   : > { %3419 = vadd.xlane.f32.xlu1 %v7554_v12  ;;  %4228 = vst [vmem:[%s7446_s14 + $0x38] sm:$0xff] %v4100_v43  ;;  %v3845_v42 = vsub.f32 2.0, %v3717_v59  ;;  %v3718_v41 = vmul.f32 %v5508_v61, %v7494_v25  ;;  %5523 = vrcp.f32 %v7559_v24  ;;  %v3181_v43 = vmul.f32 1.442695, %v2997_v8  ;;  %v7584_v30 = vpop.eup %5509 }
 0x303   : > { %v7570_v29 = vpop.xlane.xlu1 %3351  ;;  %5525 = vpow2.f32 %v3175_v56  ;;  %v8768_v56 = vld [vmem:[#allocation15_spill] sm:$0xff]  ;;  %v3183_v63 = vmul.f32 1.442695, %v2998_v46 }
 0x304   : > { %2937 = vmax.xlane.f32.xlu0 %v7564_v22  ;;  %v3973_v17 = vmul.f32 %v5504_v11, %v3845_v42  ;;  %v3846_v52 = vsub.f32 2.0, %v3718_v41  ;;  %5527 = vrcp.f32 %v7570_v29  ;;  %v2999_v49 = vsub.f32 %v8768_v56, %v7230_v28  ;;  %v8770_v42 = vld [vmem:[#allocation16_spill] sm:$0xff] }
 0x305   : > { %v7579_v25 = vpop.xlane.xlu0 %2869  ;;  %5529 = vpow2.f32 %v3177_v36  ;;  %v3000_v36 = vsub.f32 %v8770_v42, %v7235_v37  ;;  %v8771_v28 = vld [vmem:[#allocation52_spill] sm:$0xff] }
 0x306   : > { %2939 = vmax.xlane.f32.xlu1 %v7575_v32  ;;  %v4101_v10 = vmul.f32 %v8769_v21, %v3973_v17  ;;  %v3974_v51 = vmul.f32 %v5508_v61, %v3846_v52  ;;  %5531 = vpow2.f32 %v3179_v5  ;;  %v3185_v52 = vmul.f32 1.442695, %v2999_v49  ;;  %v8772_v5 = vld [vmem:[#allocation17_spill] sm:$0xff] }
 0x307   : > { %v7587_v59 = vpop.xlane.xlu1 %2871  ;;  %v5512_v11 = vpop.eup %5511  ;;  %5533 = vpow2.f32 %v3181_v43  ;;  %v3001_v46 = vsub.f32 %v8772_v5, %v7240_v34  ;;  %v8773_v43 = vld [vmem:[#allocation18_spill] sm:$0xff] }
 0x308   : > { %3421 = vadd.xlane.f32.xlu0 %v7584_v30  ;;  %v7592_v8 = vpop.eup %5513  ;;  %4229 = vst [vmem:[%s7446_s14 + $0x40] sm:$0xff] %v4101_v10  ;;  %v4102_v41 = vmul.f32 %v8771_v28, %v3974_v51  ;;  %v3719_v4 = vmul.f32 %v5512_v11, %v7521_v31  ;;  %v3187_v31 = vmul.f32 1.442695, %v3000_v36  ;;  %v3002_v49 = vsub.f32 %v8773_v43, %v7248_v2  ;;  %v8776_v2 = vld [vmem:[#allocation55_spill] sm:$0xff] }
 0x309   : > { %v7597_v17 = vpop.xlane.xlu0 %3353  ;;  %v5516_v61 = vpop.eup %5515 }
 0x30a   : > { %3423 = vadd.xlane.f32.xlu1 %v7592_v8  ;;  %v7602_v37 = vpop.eup %5517  ;;  %4230 = vst [vmem:[%s7446_s14 + $0x48] sm:$0xff] %v4102_v41  ;;  %v3847_v56 = vsub.f32 2.0, %v3719_v4  ;;  %v3720_v21 = vmul.f32 %v5516_v61, %v7532_v20  ;;  %5535 = vrcp.f32 %v7597_v17  ;;  %v3189_v20 = vmul.f32 1.442695, %v3001_v46  ;;  %v8775_v41 = vld [vmem:[#allocation19_spill] sm:$0xff] }
 0x30b   : > { %v7607_v10 = vpop.xlane.xlu1 %3355  ;;  %5537 = vpow2.f32 %v3183_v63  ;;  %v7612_v34 = vpop.eup %5519  ;;  %v3003_v63 = vsub.f32 %v8775_v41, %v7256_v39  ;;  %v8778_v39 = vld [vmem:[#allocation56_spill] sm:$0xff] }
 0x30c   : > { %3425 = vadd.xlane.f32.xlu0 %v7602_v37  ;;  %8774 = vst [vmem:[#allocation43_spill] sm:$0xff] %v7612_v34  ;;  %v3975_v51 = vmul.f32 %v5512_v11, %v3847_v56  ;;  %v3848_v42 = vsub.f32 2.0, %v3720_v21  ;;  %5539 = vrcp.f32 %v7607_v10  ;;  %v7620_v36 = vpop.eup %5521  ;;  %v3191_v56 = vmul.f32 1.442695, %v3002_v49  ;;  %v8777_v21 = vld [vmem:[#allocation20_spill] sm:$0xff] }
 0x30d   : > { %v7615_v28 = vpop.xlane.xlu0 %2873  ;;  %5541 = vpow2.f32 %v3185_v52  ;;  %v3004_v52 = vsub.f32 %v8777_v21, %v7261_v53 }
 0x30e   : > { %3427 = vadd.xlane.f32.xlu1 %v7612_v34  ;;  %v4103_v4 = vmul.f32 %v8776_v2, %v3975_v51  ;;  %v3976_v5 = vmul.f32 %v5516_v61, %v3848_v42  ;;  %5543 = vpow2.f32 %v3187_v31  ;;  %v3193_v42 = vmul.f32 1.442695, %v3003_v63  ;;  %v8779_v31 = vld [vmem:[#allocation21_spill] sm:$0xff] }
 0x30f   : > { %v7623_v43 = vpop.xlane.xlu1 %2875  ;;  %v5524_v11 = vpop.eup %5523  ;;  %5545 = vpow2.f32 %v3189_v20  ;;  %v3005_v49 = vsub.f32 %v8779_v31, %v7266_v47  ;;  %v8781_v20 = vld [vmem:[#allocation22_spill] sm:$0xff] }
 0x310   : > { %3429 = vadd.xlane.f32.xlu0 %v7620_v36  ;;  %v7628_v46 = vpop.eup %5525  ;;  %4231 = vst [vmem:[%s7446_s14 + $0x50] sm:$0xff] %v4103_v4  ;;  %v4104_v41 = vmul.f32 %v8778_v39, %v3976_v5  ;;  %v3721_v34 = vmul.f32 %v5524_v11, %v7559_v24  ;;  %v3195_v24 = vmul.f32 1.442695, %v3004_v52  ;;  %v3006_v63 = vsub.f32 %v8781_v20, %v7274_v7  ;;  %v8784_v7 = vld [vmem:[#allocation59_spill] sm:$0xff] }
 0x311   : > { %v7633_v51 = vpop.xlane.xlu0 %3357  ;;  %v5528_v61 = vpop.eup %5527 }
 0x312   : > { %3431 = vadd.xlane.f32.xlu1 %v7628_v46  ;;  %v7638_v53 = vpop.eup %5529  ;;  %4232 = vst [vmem:[%s7446_s14 + $0x58] sm:$0xff] %v4104_v41  ;;  %v3849_v2 = vsub.f32 2.0, %v3721_v34  ;;  %v3722_v4 = vmul.f32 %v5528_v61, %v7570_v29  ;;  %5547 = vrcp.f32 %v7633_v51  ;;  %v3197_v29 = vmul.f32 1.442695, %v3005_v49  ;;  %v8783_v41 = vld [vmem:[#allocation23_spill] sm:$0xff] }
 0x313   : > { %8780 = vst [vmem:[#allocation8_spill] sm:$0xff] %v7638_v53  ;;  %v7643_v5 = vpop.xlane.xlu1 %3359  ;;  %5549 = vpow2.f32 %v3191_v56  ;;  %v7648_v47 = vpop.eup %5531  ;;  %v3007_v56 = vsub.f32 %v8783_v41, %v7282_v44  ;;  %v8786_v44 = vld [vmem:[#allocation60_spill] sm:$0xff] }
 0x314   : > { %3433 = vadd.xlane.f32.xlu0 %v7638_v53  ;;  %8782 = vst [vmem:[#allocation44_spill] sm:$0xff] %v7648_v47  ;;  %v3977_v21 = vmul.f32 %v5524_v11, %v3849_v2  ;;  %v3850_v39 = vsub.f32 2.0, %v3722_v4  ;;  %5551 = vrcp.f32 %v7643_v5  ;;  %v7656_v52 = vpop.eup %5533  ;;  %v3199_v2 = vmul.f32 1.442695, %v3006_v63  ;;  %v8785_v4 = vld [vmem:[#allocation24_spill] sm:$0xff] }
 0x315   : > { %v7651_v34 = vpop.xlane.xlu0 %2877  ;;  %5553 = vpow2.f32 %v3193_v42  ;;  %v3008_v42 = vsub.f32 %v8785_v4, %v7287_v19 }
 0x316   : > { %3435 = vadd.xlane.f32.xlu1 %v7648_v47  ;;  %v4105_v31 = vmul.f32 %v8784_v7, %v3977_v21  ;;  %v3978_v20 = vmul.f32 %v5528_v61, %v3850_v39  ;;  %5555 = vpow2.f32 %v3195_v24  ;;  %v3201_v39 = vmul.f32 1.442695, %v3007_v56  ;;  %v8787_v24 = vld [vmem:[#allocation25_spill] sm:$0xff] }
 0x317   : > { %v7659_v53 = vpop.xlane.xlu1 %2879  ;;  %v5536_v11 = vpop.eup %5535  ;;  %5557 = vpow2.f32 %v3197_v29  ;;  %v3009_v63 = vsub.f32 %v8787_v24, %v7292_v55  ;;  %v8789_v29 = vld [vmem:[#allocation26_spill] sm:$0xff] }
 0x318   : > { %3437 = vadd.xlane.f32.xlu0 %v7656_v52  ;;  %v7664_v49 = vpop.eup %5537  ;;  %4233 = vst [vmem:[%s7446_s14 + $0x60] sm:$0xff] %v4105_v31  ;;  %v4106_v41 = vmul.f32 %v8786_v44, %v3978_v20  ;;  %v3723_v47 = vmul.f32 %v5536_v11, %v7597_v17  ;;  %v3203_v17 = vmul.f32 1.442695, %v3008_v42  ;;  %v3010_v56 = vsub.f32 %v8789_v29, %v7300_v54  ;;  %v8792_v54 = vld [vmem:[#allocation63_spill] sm:$0xff] }
 0x319   : > { %v7669_v21 = vpop.xlane.xlu0 %3361  ;;  %v5540_v61 = vpop.eup %5539 }
 0x31a   : > { %3439 = vadd.xlane.f32.xlu1 %v7664_v49  ;;  %v7674_v19 = vpop.eup %5541  ;;  %4234 = vst [vmem:[%s7446_s14 + $0x68] sm:$0xff] %v4106_v41  ;;  %v3851_v7 = vsub.f32 2.0, %v3723_v47  ;;  %v3724_v31 = vmul.f32 %v5540_v61, %v7607_v10  ;;  %5559 = vrcp.f32 %v7669_v21  ;;  %v3205_v10 = vmul.f32 1.442695, %v3009_v63  ;;  %v8791_v41 = vld [vmem:[#allocation27_spill] sm:$0xff] }
 0x31b   : > { %8788 = vst [vmem:[#allocation9_spill] sm:$0xff] %v7674_v19  ;;  %v7679_v20 = vpop.xlane.xlu1 %3363  ;;  %5561 = vpow2.f32 %v3199_v2  ;;  %v7684_v55 = vpop.eup %5543  ;;  %v3011_v2 = vsub.f32 %v8791_v41, %v7308_v50  ;;  %v8794_v50 = vld [vmem:[#allocation64_spill] sm:$0xff] }
 0x31c   : > { %3441 = vadd.xlane.f32.xlu0 %v7674_v19  ;;  %8790 = vst [vmem:[#allocation10_spill] sm:$0xff] %v7684_v55  ;;  %v3979_v4 = vmul.f32 %v5536_v11, %v3851_v7  ;;  %v3852_v44 = vsub.f32 2.0, %v3724_v31  ;;  %5563 = vrcp.f32 %v7679_v20  ;;  %v7692_v42 = vpop.eup %5545  ;;  %v3207_v7 = vmul.f32 1.442695, %v3010_v56  ;;  %v8793_v31 = vld [vmem:[#allocation28_spill] sm:$0xff] }
 0x31d   : > { %v7687_v47 = vpop.xlane.xlu0 %2881  ;;  %5565 = vpow2.f32 %v3201_v39  ;;  %v3012_v39 = vsub.f32 %v8793_v31, %v7313_v1 }
 0x31e   : > { %3443 = vadd.xlane.f32.xlu1 %v7684_v55  ;;  %v4107_v24 = vmul.f32 %v8792_v54, %v3979_v4  ;;  %v3980_v29 = vmul.f32 %v5540_v61, %v3852_v44  ;;  %5567 = vpow2.f32 %v3203_v17  ;;  %v3209_v44 = vmul.f32 1.442695, %v3011_v2  ;;  %v8795_v17 = vld [vmem:[#allocation29_spill] sm:$0xff] }
 0x31f   : > { %v7695_v19 = vpop.xlane.xlu1 %2883  ;;  %v5548_v11 = vpop.eup %5547  ;;  %5569 = vpow2.f32 %v3205_v10  ;;  %v3013_v56 = vsub.f32 %v8795_v17, %v7318_v62  ;;  %v8797_v10 = vld [vmem:[#allocation30_spill] sm:$0xff] }
 0x320   : > { %3445 = vadd.xlane.f32.xlu0 %v7692_v42  ;;  %v7700_v63 = vpop.eup %5549  ;;  %4235 = vst [vmem:[%s7446_s14 + $0x70] sm:$0xff] %v4107_v24  ;;  %v4108_v41 = vmul.f32 %v8794_v50, %v3980_v29  ;;  %v3725_v55 = vmul.f32 %v5548_v11, %v7633_v51  ;;  %v3211_v51 = vmul.f32 1.442695, %v3012_v39  ;;  %v3014_v2 = vsub.f32 %v8797_v10, %v7326_v45  ;;  %v8800_v45 = vld [vmem:[#allocation67_spill] sm:$0xff] }
 0x321   : > { %v7705_v4 = vpop.xlane.xlu0 %3365  ;;  %v5552_v61 = vpop.eup %5551 }
 0x322   : > { %3447 = vadd.xlane.f32.xlu1 %v7700_v63  ;;  %v7710_v1 = vpop.eup %5553  ;;  %4236 = vst [vmem:[%s7446_s14 + $0x78] sm:$0xff] %v4108_v41  ;;  %v3853_v54 = vsub.f32 2.0, %v3725_v55  ;;  %v3726_v24 = vmul.f32 %v5552_v61, %v7643_v5  ;;  %5571 = vrcp.f32 %v7705_v4  ;;  %v3213_v5 = vmul.f32 1.442695, %v3013_v56  ;;  %v8799_v41 = vld [vmem:[#allocation31_spill] sm:$0xff] }
 0x323   : > { %8796 = vst [vmem:[#allocation11_spill] sm:$0xff] %v7710_v1  ;;  %v7715_v29 = vpop.xlane.xlu1 %3367  ;;  %5573 = vpow2.f32 %v3207_v7  ;;  %v7720_v62 = vpop.eup %5555  ;;  %v3015_v7 = vsub.f32 %v8799_v41, %v7334_v58  ;;  %v8803_v58 = vld [vmem:[#allocation68_spill] sm:$0xff] }
 0x324   : > { %3449 = vadd.xlane.f32.xlu0 %v7710_v1  ;;  %8798 = vst [vmem:[#allocation47_spill] sm:$0xff] %v7720_v62  ;;  %v3981_v31 = vmul.f32 %v5548_v11, %v3853_v54  ;;  %v3854_v50 = vsub.f32 2.0, %v3726_v24  ;;  %5575 = vrcp.f32 %v7715_v29  ;;  %v7728_v39 = vpop.eup %5557  ;;  %v3215_v54 = vmul.f32 1.442695, %v3014_v2  ;;  %v8801_v24 = vld [vmem:[#allocation32_spill] sm:$0xff] }
 0x325   : > { %v7723_v55 = vpop.xlane.xlu0 %2885  ;;  %5577 = vpow2.f32 %v3209_v44  ;;  %v3016_v44 = vsub.f32 %v8801_v24, %v7339_v60 }
 0x326   : > { %3451 = vadd.xlane.f32.xlu1 %v7720_v62  ;;  %v4109_v17 = vmul.f32 %v8800_v45, %v3981_v31  ;;  %v3982_v10 = vmul.f32 %v5552_v61, %v3854_v50  ;;  %5579 = vpow2.f32 %v3211_v51  ;;  %v3217_v50 = vmul.f32 1.442695, %v3015_v7  ;;  %v8804_v51 = vld [vmem:[#allocation33_spill] sm:$0xff] }
 0x327   : > { %v7731_v1 = vpop.xlane.xlu1 %2887  ;;  %v5560_v11 = vpop.eup %5559  ;;  %5581 = vpow2.f32 %v3213_v5  ;;  %v3017_v2 = vsub.f32 %v8804_v51, %v7344_v6  ;;  %v8806_v5 = vld [vmem:[#allocation34_spill] sm:$0xff] }
 0x328   : > { %3453 = vadd.xlane.f32.xlu0 %v7728_v39  ;;  %v7736_v56 = vpop.eup %5561  ;;  %4237 = vst [vmem:[%s7446_s14 + $0x80] sm:$0xff] %v4109_v17  ;;  %v4110_v41 = vmul.f32 %v8803_v58, %v3982_v10  ;;  %v3727_v62 = vmul.f32 %v5560_v11, %v7669_v21  ;;  %v3219_v21 = vmul.f32 1.442695, %v3016_v44  ;;  %v3018_v7 = vsub.f32 %v8806_v5, %v7352_v48  ;;  %v8810_v48 = vld [vmem:[#allocation71_spill] sm:$0xff] }
 0x329   : > { %8802 = vst [vmem:[#allocation12_spill] sm:$0xff] %v7736_v56  ;;  %v7741_v31 = vpop.xlane.xlu0 %3369  ;;  %v5564_v61 = vpop.eup %5563 }
 0x32a   : > { %3455 = vadd.xlane.f32.xlu1 %v7736_v56  ;;  %v7746_v60 = vpop.eup %5565  ;;  %4238 = vst [vmem:[%s7446_s14 + $0x88] sm:$0xff] %v4110_v41  ;;  %v3855_v45 = vsub.f32 2.0, %v3727_v62  ;;  %v3728_v17 = vmul.f32 %v5564_v61, %v7679_v20  ;;  %5583 = vrcp.f32 %v7741_v31  ;;  %v3221_v20 = vmul.f32 1.442695, %v3017_v2  ;;  %v8808_v41 = vld [vmem:[#allocation35_spill] sm:$0xff]  ;;  %v8823_v56 = vld [vmem:[#allocation42_spill] sm:$0xff] }
 0x32b   : > { %8805 = vst [vmem:[#allocation48_spill] sm:$0xff] %v7746_v60  ;;  %v7751_v10 = vpop.xlane.xlu1 %3371  ;;  %5585 = vpow2.f32 %v3215_v54  ;;  %v7756_v6 = vpop.eup %5567  ;;  %v3019_v54 = vsub.f32 %v8808_v41, %v7360_v3  ;;  %v8813_v3 = vld [vmem:[#allocation72_spill] sm:$0xff] }
 0x32c   : > { %3457 = vadd.xlane.f32.xlu0 %v7746_v60  ;;  %8807 = vst [vmem:[#allocation13_spill] sm:$0xff] %v7756_v6  ;;  %v3983_v24 = vmul.f32 %v5560_v11, %v3855_v45  ;;  %v3856_v58 = vsub.f32 2.0, %v3728_v17  ;;  %5587 = vrcp.f32 %v7751_v10  ;;  %v7764_v44 = vpop.eup %5569  ;;  %v3223_v45 = vmul.f32 1.442695, %v3018_v7  ;;  %v8811_v17 = vld [vmem:[#allocation36_spill] sm:$0xff] }
 0x32d   : > { %v7759_v62 = vpop.xlane.xlu0 %2889  ;;  %5589 = vpow2.f32 %v3217_v50  ;;  %8809 = vst [vmem:[#allocation14_spill] sm:$0xff] %v7764_v44  ;;  %v3020_v50 = vsub.f32 %v8811_v17, %v7365_v13  ;;  %v8816_v17 = vld [vmem:[#allocation108_spill] sm:$0xff] }
 0x32e   : > { %3459 = vadd.xlane.f32.xlu1 %v7756_v6  ;;  %v4111_v51 = vmul.f32 %v8810_v48, %v3983_v24  ;;  %v3984_v5 = vmul.f32 %v5564_v61, %v3856_v58  ;;  %5591 = vpow2.f32 %v3219_v21  ;;  %v3225_v58 = vmul.f32 1.442695, %v3019_v54  ;;  %v8814_v21 = vld [vmem:[#allocation37_spill] sm:$0xff] }
 0x32f   : > { %v7767_v60 = vpop.xlane.xlu1 %2891  ;;  %v5572_v11 = vpop.eup %5571  ;;  %5593 = vpow2.f32 %v3221_v20  ;;  %v3021_v7 = vsub.f32 %v8814_v21, %v7382_v9  ;;  %v8817_v20 = vld [vmem:[#allocation38_spill] sm:$0xff] }
 0x330   : > { %3461 = vadd.xlane.f32.xlu0 %v7764_v44  ;;  %v7772_v2 = vpop.eup %5573  ;;  %4239 = vst [vmem:[%s7446_s14 + $0x90] sm:$0xff] %v4111_v51  ;;  %v4112_v41 = vmul.f32 %v8813_v3, %v3984_v5  ;;  %v3729_v6 = vmul.f32 %v5572_v11, %v7705_v4  ;;  %v3227_v4 = vmul.f32 1.442695, %v3020_v50  ;;  %v3022_v54 = vsub.f32 %v8817_v20, %v8816_v17  ;;  %v8821_v17 = vld [vmem:[#allocation75_spill] sm:$0xff] }
 0x331   : > { %8812 = vst [vmem:[#allocation15_spill] sm:$0xff] %v7772_v2  ;;  %v7777_v24 = vpop.xlane.xlu0 %3373  ;;  %v5576_v61 = vpop.eup %5575 }
 0x332   : > { %3463 = vadd.xlane.f32.xlu1 %v7772_v2  ;;  %v7782_v13 = vpop.eup %5577  ;;  %4240 = vst [vmem:[%s7446_s14 + $0x98] sm:$0xff] %v4112_v41  ;;  %v3857_v48 = vsub.f32 2.0, %v3729_v6  ;;  %v3730_v51 = vmul.f32 %v5576_v61, %v7715_v29  ;;  %5595 = vrcp.f32 %v7777_v24  ;;  %v3229_v29 = vmul.f32 1.442695, %v3021_v7  ;;  %v8819_v41 = vld [vmem:[#allocation112_spill] sm:$0xff]  ;;  %v8820_v2 = vld [vmem:[#allocation41_spill] sm:$0xff] }
 0x333   : > { %8815 = vst [vmem:[#allocation51_spill] sm:$0xff] %v7782_v13  ;;  %v7787_v5 = vpop.xlane.xlu1 %3375  ;;  %5597 = vpow2.f32 %v3223_v45  ;;  %v7792_v9 = vpop.eup %5579  ;;  %v3023_v45 = vsub.f32 %v8820_v2, %v8819_v41  ;;  %v8824_v2 = vld [vmem:[#allocation76_spill] sm:$0xff] }
 0x334   : > { %3465 = vadd.xlane.f32.xlu0 %v7782_v13  ;;  %8818 = vst [vmem:[#allocation16_spill] sm:$0xff] %v7792_v9  ;;  %v3985_v3 = vmul.f32 %v5572_v11, %v3857_v48  ;;  %v3858_v21 = vsub.f32 2.0, %v3730_v51  ;;  %5599 = vrcp.f32 %v7787_v5  ;;  %v7800_v50 = vpop.eup %5581  ;;  %v3231_v48 = vmul.f32 1.442695, %v3022_v54  ;;  %v8822_v51 = vld [vmem:[#allocation114_spill] sm:$0xff] }
 0x335   : > { %v7795_v6 = vpop.xlane.xlu0 %2893  ;;  %5601 = vpow2.f32 %v3225_v58  ;;  %v3024_v58 = vsub.f32 %v8823_v56, %v8822_v51 }
 0x336   : > { %3467 = vadd.xlane.f32.xlu1 %v7792_v9  ;;  %v4113_v20 = vmul.f32 %v8821_v17, %v3985_v3  ;;  %v3986_v13 = vmul.f32 %v5576_v61, %v3858_v21  ;;  %5603 = vpow2.f32 %v3227_v4  ;;  %v3233_v21 = vmul.f32 1.442695, %v3023_v45  ;;  %v8825_v4 = vld [vmem:[#allocation45_spill] sm:$0xff] }
 0x337   : > { %v7803_v44 = vpop.xlane.xlu1 %2895  ;;  %v5584_v11 = vpop.eup %5583  ;;  %5605 = vpow2.f32 %v3229_v29  ;;  %v3025_v54 = vsub.f32 %v8825_v4, %v7435_v0  ;;  %v8827_v29 = vld [vmem:[#allocation46_spill] sm:$0xff] }
 0x338   : > { %3469 = vadd.xlane.f32.xlu0 %v7800_v50  ;;  %v7808_v7 = vpop.eup %5585  ;;  %4241 = vst [vmem:[%s7446_s14 + $0xa0] sm:$0xff] %v4113_v20  ;;  %v4114_v41 = vmul.f32 %v8824_v2, %v3986_v13  ;;  %v3731_v9 = vmul.f32 %v5584_v11, %v7741_v31  ;;  %v3235_v31 = vmul.f32 1.442695, %v3024_v58  ;;  %v3026_v45 = vsub.f32 %v8827_v29, %v7441_v15  ;;  %v8830_v15 = vld [vmem:[#allocation79_spill] sm:$0xff] }
 0x339   : > { %v7813_v3 = vpop.xlane.xlu0 %3377  ;;  %v5588_v61 = vpop.eup %5587 }
 0x33a   : > { %3471 = vadd.xlane.f32.xlu1 %v7808_v7  ;;  %v7818_v56 = vpop.eup %5589  ;;  %4242 = vst [vmem:[%s7446_s14 + $0xa8] sm:$0xff] %v4114_v41  ;;  %v3859_v17 = vsub.f32 2.0, %v3731_v9  ;;  %v3732_v20 = vmul.f32 %v5588_v61, %v7751_v10  ;;  %5607 = vrcp.f32 %v7813_v3  ;;  %v3237_v10 = vmul.f32 1.442695, %v3025_v54  ;;  %v8829_v41 = vld [vmem:[#allocation49_spill] sm:$0xff] }
 0x33b   : > { %8826 = vst [vmem:[#allocation52_spill] sm:$0xff] %v7818_v56  ;;  %v7823_v13 = vpop.xlane.xlu1 %3379  ;;  %5609 = vpow2.f32 %v3231_v48  ;;  %v7828_v0 = vpop.eup %5591  ;;  %v3027_v48 = vsub.f32 %v8829_v41, %v7469_v57  ;;  %v8832_v57 = vld [vmem:[#allocation80_spill] sm:$0xff] }
 0x33c   : > { %3473 = vadd.xlane.f32.xlu0 %v7818_v56  ;;  %8828 = vst [vmem:[#allocation17_spill] sm:$0xff] %v7828_v0  ;;  %v3987_v51 = vmul.f32 %v5584_v11, %v3859_v17  ;;  %v3860_v2 = vsub.f32 2.0, %v3732_v20  ;;  %5611 = vrcp.f32 %v7823_v13  ;;  %v7836_v58 = vpop.eup %5593  ;;  %v3239_v17 = vmul.f32 1.442695, %v3026_v45  ;;  %v8831_v20 = vld [vmem:[#allocation50_spill] sm:$0xff] }
 0x33d   : > { %v7831_v9 = vpop.xlane.xlu0 %2897  ;;  %5613 = vpow2.f32 %v3233_v21  ;;  %v3028_v21 = vsub.f32 %v8831_v20, %v7475_v14 }
 0x33e   : > { %3475 = vadd.xlane.f32.xlu1 %v7828_v0  ;;  %v4115_v4 = vmul.f32 %v8830_v15, %v3987_v51  ;;  %v3988_v29 = vmul.f32 %v5588_v61, %v3860_v2  ;;  %5615 = vpow2.f32 %v3235_v31  ;;  %v3241_v2 = vmul.f32 1.442695, %v3027_v48  ;;  %v8833_v31 = vld [vmem:[#allocation53_spill] sm:$0xff] }
 0x33f   : > { %v7839_v56 = vpop.xlane.xlu1 %2899  ;;  %v5596_v11 = vpop.eup %5595  ;;  %5617 = vpow2.f32 %v3237_v10  ;;  %v3029_v45 = vsub.f32 %v8833_v31, %v7503_v16  ;;  %v8835_v10 = vld [vmem:[#allocation54_spill] sm:$0xff] }
 0x340   : > { %3477 = vadd.xlane.f32.xlu0 %v7836_v58  ;;  %v7844_v54 = vpop.eup %5597  ;;  %4243 = vst [vmem:[%s7446_s14 + $0xb0] sm:$0xff] %v4115_v4  ;;  %v4116_v41 = vmul.f32 %v8832_v57, %v3988_v29  ;;  %v3733_v0 = vmul.f32 %v5596_v11, %v7777_v24  ;;  %v3243_v24 = vmul.f32 1.442695, %v3028_v21  ;;  %v3030_v48 = vsub.f32 %v8835_v10, %v7511_v40  ;;  %v8838_v40 = vld [vmem:[#allocation83_spill] sm:$0xff] }
 0x341   : > { %v7849_v51 = vpop.xlane.xlu0 %3381  ;;  %v5600_v61 = vpop.eup %5599 }
 0x342   : > { %3479 = vadd.xlane.f32.xlu1 %v7844_v54  ;;  %v7854_v14 = vpop.eup %5601  ;;  %4244 = vst [vmem:[%s7446_s14 + $0xb8] sm:$0xff] %v4116_v41  ;;  %v3861_v15 = vsub.f32 2.0, %v3733_v0  ;;  %v3734_v4 = vmul.f32 %v5600_v61, %v7787_v5  ;;  %5619 = vrcp.f32 %v7849_v51  ;;  %v3245_v5 = vmul.f32 1.442695, %v3029_v45  ;;  %v8837_v41 = vld [vmem:[#allocation57_spill] sm:$0xff] }
 0x343   : > { %8834 = vst [vmem:[#allocation18_spill] sm:$0xff] %v7854_v14  ;;  %v7859_v29 = vpop.xlane.xlu1 %3383  ;;  %5621 = vpow2.f32 %v3239_v17  ;;  %v7864_v16 = vpop.eup %5603  ;;  %v3031_v17 = vsub.f32 %v8837_v41, %v7541_v33  ;;  %v8840_v33 = vld [vmem:[#allocation84_spill] sm:$0xff] }
 0x344   : > { %3481 = vadd.xlane.f32.xlu0 %v7854_v14  ;;  %8836 = vst [vmem:[#allocation19_spill] sm:$0xff] %v7864_v16  ;;  %v3989_v20 = vmul.f32 %v5596_v11, %v3861_v15  ;;  %v3862_v57 = vsub.f32 2.0, %v3734_v4  ;;  %5623 = vrcp.f32 %v7859_v29  ;;  %v7872_v21 = vpop.eup %5605  ;;  %v3247_v15 = vmul.f32 1.442695, %v3030_v48  ;;  %v8839_v4 = vld [vmem:[#allocation58_spill] sm:$0xff] }
 0x345   : > { %v7867_v0 = vpop.xlane.xlu0 %2901  ;;  %5625 = vpow2.f32 %v3241_v2  ;;  %v3032_v2 = vsub.f32 %v8839_v4, %v7549_v26 }
 0x346   : > { %3483 = vadd.xlane.f32.xlu1 %v7864_v16  ;;  %v4117_v31 = vmul.f32 %v8838_v40, %v3989_v20  ;;  %v3990_v10 = vmul.f32 %v5600_v61, %v3862_v57  ;;  %5627 = vpow2.f32 %v3243_v24  ;;  %v3249_v57 = vmul.f32 1.442695, %v3031_v17  ;;  %v8841_v24 = vld [vmem:[#allocation61_spill] sm:$0xff] }
 0x347   : > { %v7875_v14 = vpop.xlane.xlu1 %2903  ;;  %v5608_v11 = vpop.eup %5607  ;;  %5629 = vpow2.f32 %v3245_v5  ;;  %v3033_v48 = vsub.f32 %v8841_v24, %v7579_v25  ;;  %v8843_v5 = vld [vmem:[#allocation62_spill] sm:$0xff] }
 0x348   : > { %3485 = vadd.xlane.f32.xlu0 %v7872_v21  ;;  %v7880_v45 = vpop.eup %5609  ;;  %4245 = vst [vmem:[%s7446_s14 + $0xc0] sm:$0xff] %v4117_v31  ;;  %v4118_v41 = vmul.f32 %v8840_v33, %v3990_v10  ;;  %v3735_v16 = vmul.f32 %v5608_v11, %v7813_v3  ;;  %v3251_v3 = vmul.f32 1.442695, %v3032_v2  ;;  %v3034_v17 = vsub.f32 %v8843_v5, %v7587_v59  ;;  %v8846_v59 = vld [vmem:[#allocation87_spill] sm:$0xff] }
 0x349   : > { %v7885_v20 = vpop.xlane.xlu0 %3385  ;;  %v5612_v61 = vpop.eup %5611 }
 0x34a   : > { %3487 = vadd.xlane.f32.xlu1 %v7880_v45  ;;  %v7890_v26 = vpop.eup %5613  ;;  %4246 = vst [vmem:[%s7446_s14 + $0xc8] sm:$0xff] %v4118_v41  ;;  %v3863_v40 = vsub.f32 2.0, %v3735_v16  ;;  %v3736_v31 = vmul.f32 %v5612_v61, %v7823_v13  ;;  %5631 = vrcp.f32 %v7885_v20  ;;  %v3253_v13 = vmul.f32 1.442695, %v3033_v48  ;;  %v8845_v41 = vld [vmem:[#allocation65_spill] sm:$0xff] }
 0x34b   : > { %8842 = vst [vmem:[#allocation55_spill] sm:$0xff] %v7890_v26  ;;  %v7895_v10 = vpop.xlane.xlu1 %3387  ;;  %5633 = vpow2.f32 %v3247_v15  ;;  %v7900_v25 = vpop.eup %5615  ;;  %v3035_v15 = vsub.f32 %v8845_v41, %v7615_v28  ;;  %v8848_v28 = vld [vmem:[#allocation88_spill] sm:$0xff] }
 0x34c   : > { %3489 = vadd.xlane.f32.xlu0 %v7890_v26  ;;  %8844 = vst [vmem:[#allocation20_spill] sm:$0xff] %v7900_v25  ;;  %v3991_v4 = vmul.f32 %v5608_v11, %v3863_v40  ;;  %v3864_v33 = vsub.f32 2.0, %v3736_v31  ;;  %5635 = vrcp.f32 %v7895_v10  ;;  %v7908_v2 = vpop.eup %5617  ;;  %v3255_v40 = vmul.f32 1.442695, %v3034_v17  ;;  %v8847_v31 = vld [vmem:[#allocation66_spill] sm:$0xff] }
 0x34d   : > { %v7903_v16 = vpop.xlane.xlu0 %2905  ;;  %5637 = vpow2.f32 %v3249_v57  ;;  %v3036_v57 = vsub.f32 %v8847_v31, %v7623_v43 }
 0x34e   : > { %3491 = vadd.xlane.f32.xlu1 %v7900_v25  ;;  %v4119_v24 = vmul.f32 %v8846_v59, %v3991_v4  ;;  %v3992_v5 = vmul.f32 %v5612_v61, %v3864_v33  ;;  %5639 = vpow2.f32 %v3251_v3  ;;  %v3257_v33 = vmul.f32 1.442695, %v3035_v15  ;;  %v8849_v3 = vld [vmem:[#allocation69_spill] sm:$0xff] }
 0x34f   : > { %v7911_v26 = vpop.xlane.xlu1 %2907  ;;  %v5620_v11 = vpop.eup %5619  ;;  %5641 = vpow2.f32 %v3253_v13  ;;  %v3037_v17 = vsub.f32 %v8849_v3, %v7651_v34  ;;  %v8851_v13 = vld [vmem:[#allocation70_spill] sm:$0xff] }
 0x350   : > { %3493 = vadd.xlane.f32.xlu0 %v7908_v2  ;;  %v7916_v48 = vpop.eup %5621  ;;  %4247 = vst [vmem:[%s7446_s14 + $0xd0] sm:$0xff] %v4119_v24  ;;  %v4120_v41 = vmul.f32 %v8848_v28, %v3992_v5  ;;  %v3737_v25 = vmul.f32 %v5620_v11, %v7849_v51  ;;  %v3259_v51 = vmul.f32 1.442695, %v3036_v57  ;;  %v3038_v15 = vsub.f32 %v8851_v13, %v7659_v53  ;;  %v8854_v53 = vld [vmem:[#allocation91_spill] sm:$0xff] }
 0x351   : > { %v7921_v4 = vpop.xlane.xlu0 %3389  ;;  %v5624_v61 = vpop.eup %5623 }
 0x352   : > { %3495 = vadd.xlane.f32.xlu1 %v7916_v48  ;;  %v7926_v43 = vpop.eup %5625  ;;  %4248 = vst [vmem:[%s7446_s14 + $0xd8] sm:$0xff] %v4120_v41  ;;  %v3865_v59 = vsub.f32 2.0, %v3737_v25  ;;  %v3738_v24 = vmul.f32 %v5624_v61, %v7859_v29  ;;  %5643 = vrcp.f32 %v7921_v4  ;;  %v3261_v29 = vmul.f32 1.442695, %v3037_v17  ;;  %v8853_v41 = vld [vmem:[#allocation73_spill] sm:$0xff] }
 0x353   : > { %8850 = vst [vmem:[#allocation56_spill] sm:$0xff] %v7926_v43  ;;  %v7931_v5 = vpop.xlane.xlu1 %3391  ;;  %5645 = vpow2.f32 %v3255_v40  ;;  %v7936_v34 = vpop.eup %5627  ;;  %v3039_v40 = vsub.f32 %v8853_v41, %v7687_v47  ;;  %v8856_v47 = vld [vmem:[#allocation92_spill] sm:$0xff] }
 0x354   : > { %3497 = vadd.xlane.f32.xlu0 %v7926_v43  ;;  %8852 = vst [vmem:[#allocation21_spill] sm:$0xff] %v7936_v34  ;;  %v3993_v31 = vmul.f32 %v5620_v11, %v3865_v59  ;;  %v3866_v28 = vsub.f32 2.0, %v3738_v24  ;;  %5647 = vrcp.f32 %v7931_v5  ;;  %v7944_v57 = vpop.eup %5629  ;;  %v3263_v59 = vmul.f32 1.442695, %v3038_v15  ;;  %v8855_v24 = vld [vmem:[#allocation74_spill] sm:$0xff] }
 0x355   : > { %v7939_v25 = vpop.xlane.xlu0 %2909  ;;  %5649 = vpow2.f32 %v3257_v33  ;;  %v3040_v33 = vsub.f32 %v8855_v24, %v7695_v19 }
 0x356   : > { %3499 = vadd.xlane.f32.xlu1 %v7936_v34  ;;  %v4121_v3 = vmul.f32 %v8854_v53, %v3993_v31  ;;  %v3994_v13 = vmul.f32 %v5624_v61, %v3866_v28  ;;  %5651 = vpow2.f32 %v3259_v51  ;;  %v3265_v28 = vmul.f32 1.442695, %v3039_v40  ;;  %v8857_v51 = vld [vmem:[#allocation77_spill] sm:$0xff] }
 0x357   : > { %v7947_v43 = vpop.xlane.xlu1 %2911  ;;  %v5632_v11 = vpop.eup %5631  ;;  %5653 = vpow2.f32 %v3261_v29  ;;  %v3041_v15 = vsub.f32 %v8857_v51, %v7723_v55  ;;  %v8859_v29 = vld [vmem:[#allocation78_spill] sm:$0xff] }
 0x358   : > { %3501 = vadd.xlane.f32.xlu0 %v7944_v57  ;;  %v7952_v17 = vpop.eup %5633  ;;  %4249 = vst [vmem:[%s7446_s14 + $0xe0] sm:$0xff] %v4121_v3  ;;  %v4122_v41 = vmul.f32 %v8856_v47, %v3994_v13  ;;  %v3739_v34 = vmul.f32 %v5632_v11, %v7885_v20  ;;  %v3267_v20 = vmul.f32 1.442695, %v3040_v33  ;;  %v3042_v40 = vsub.f32 %v8859_v29, %v7731_v1  ;;  %v8862_v1 = vld [vmem:[#allocation95_spill] sm:$0xff] }
 0x359   : > { %v7957_v31 = vpop.xlane.xlu0 %3393  ;;  %v5636_v61 = vpop.eup %5635 }
 0x35a   : > { %3503 = vadd.xlane.f32.xlu1 %v7952_v17  ;;  %v7962_v19 = vpop.eup %5637  ;;  %4250 = vst [vmem:[%s7446_s14 + $0xe8] sm:$0xff] %v4122_v41  ;;  %v3867_v53 = vsub.f32 2.0, %v3739_v34  ;;  %v3740_v3 = vmul.f32 %v5636_v61, %v7895_v10  ;;  %5655 = vrcp.f32 %v7957_v31  ;;  %v3269_v10 = vmul.f32 1.442695, %v3041_v15  ;;  %v8861_v41 = vld [vmem:[#allocation81_spill] sm:$0xff] }
 0x35b   : > { %8858 = vst [vmem:[#allocation22_spill] sm:$0xff] %v7962_v19  ;;  %v7967_v13 = vpop.xlane.xlu1 %3395  ;;  %5657 = vpow2.f32 %v3263_v59  ;;  %v7972_v55 = vpop.eup %5639  ;;  %v3043_v59 = vsub.f32 %v8861_v41, %v7759_v62  ;;  %v8864_v62 = vld [vmem:[#allocation96_spill] sm:$0xff] }
 0x35c   : > { %3505 = vadd.xlane.f32.xlu0 %v7962_v19  ;;  %8860 = vst [vmem:[#allocation23_spill] sm:$0xff] %v7972_v55  ;;  %v3995_v24 = vmul.f32 %v5632_v11, %v3867_v53  ;;  %v3868_v47 = vsub.f32 2.0, %v3740_v3  ;;  %5659 = vrcp.f32 %v7967_v13  ;;  %v7980_v33 = vpop.eup %5641  ;;  %v3271_v53 = vmul.f32 1.442695, %v3042_v40  ;;  %v8863_v3 = vld [vmem:[#allocation82_spill] sm:$0xff] }
 0x35d   : > { %v7975_v34 = vpop.xlane.xlu0 %2913  ;;  %5661 = vpow2.f32 %v3265_v28  ;;  %v3044_v28 = vsub.f32 %v8863_v3, %v7767_v60 }
 0x35e   : > { %3507 = vadd.xlane.f32.xlu1 %v7972_v55  ;;  %v4123_v51 = vmul.f32 %v8862_v1, %v3995_v24  ;;  %v3996_v29 = vmul.f32 %v5636_v61, %v3868_v47  ;;  %5663 = vpow2.f32 %v3267_v20  ;;  %v3273_v47 = vmul.f32 1.442695, %v3043_v59  ;;  %v8865_v20 = vld [vmem:[#allocation85_spill] sm:$0xff] }
 0x35f   : > { %v7983_v19 = vpop.xlane.xlu1 %2915  ;;  %v5644_v11 = vpop.eup %5643  ;;  %5665 = vpow2.f32 %v3269_v10  ;;  %v3045_v40 = vsub.f32 %v8865_v20, %v7795_v6  ;;  %v8867_v10 = vld [vmem:[#allocation86_spill] sm:$0xff] }
 0x360   : > { %3509 = vadd.xlane.f32.xlu0 %v7980_v33  ;;  %v7988_v15 = vpop.eup %5645  ;;  %4251 = vst [vmem:[%s7446_s14 + $0xf0] sm:$0xff] %v4123_v51  ;;  %v4124_v41 = vmul.f32 %v8864_v62, %v3996_v29  ;;  %v3741_v55 = vmul.f32 %v5644_v11, %v7921_v4  ;;  %v3275_v4 = vmul.f32 1.442695, %v3044_v28  ;;  %v3046_v59 = vsub.f32 %v8867_v10, %v7803_v44  ;;  %v8870_v44 = vld [vmem:[#allocation99_spill] sm:$0xff] }
 0x361   : > { %v7993_v24 = vpop.xlane.xlu0 %3397  ;;  %v5648_v61 = vpop.eup %5647 }
 0x362   : > { %3511 = vadd.xlane.f32.xlu1 %v7988_v15  ;;  %v7998_v60 = vpop.eup %5649  ;;  %4252 = vst [vmem:[%s7446_s14 + $0xf8] sm:$0xff] %v4124_v41  ;;  %v3869_v1 = vsub.f32 2.0, %v3741_v55  ;;  %v3742_v51 = vmul.f32 %v5648_v61, %v7931_v5  ;;  %5667 = vrcp.f32 %v7993_v24  ;;  %v3277_v5 = vmul.f32 1.442695, %v3045_v40  ;;  %v8869_v41 = vld [vmem:[#allocation89_spill] sm:$0xff] }
 0x363   : > { %8866 = vst [vmem:[#allocation59_spill] sm:$0xff] %v7998_v60  ;;  %v8003_v29 = vpop.xlane.xlu1 %3399  ;;  %5669 = vpow2.f32 %v3271_v53  ;;  %v8008_v6 = vpop.eup %5651  ;;  %v3047_v53 = vsub.f32 %v8869_v41, %v7831_v9  ;;  %v8872_v9 = vld [vmem:[#allocation100_spill] sm:$0xff] }
 0x364   : > { %3513 = vadd.xlane.f32.xlu0 %v7998_v60  ;;  %8868 = vst [vmem:[#allocation24_spill] sm:$0xff] %v8008_v6  ;;  %v3997_v3 = vmul.f32 %v5644_v11, %v3869_v1  ;;  %v3870_v62 = vsub.f32 2.0, %v3742_v51  ;;  %5671 = vrcp.f32 %v8003_v29  ;;  %v8016_v28 = vpop.eup %5653  ;;  %v3279_v1 = vmul.f32 1.442695, %v3046_v59  ;;  %v8871_v51 = vld [vmem:[#allocation90_spill] sm:$0xff] }
 0x365   : > { %v8011_v55 = vpop.xlane.xlu0 %2917  ;;  %5673 = vpow2.f32 %v3273_v47  ;;  %v3048_v47 = vsub.f32 %v8871_v51, %v7839_v56 }
 0x366   : > { %3515 = vadd.xlane.f32.xlu1 %v8008_v6  ;;  %v4125_v20 = vmul.f32 %v8870_v44, %v3997_v3  ;;  %v3998_v10 = vmul.f32 %v5648_v61, %v3870_v62  ;;  %5675 = vpow2.f32 %v3275_v4  ;;  %v3281_v62 = vmul.f32 1.442695, %v3047_v53  ;;  %v8873_v4 = vld [vmem:[#allocation93_spill] sm:$0xff] }
 0x367   : > { %v8019_v60 = vpop.xlane.xlu1 %2919  ;;  %v5656_v11 = vpop.eup %5655  ;;  %5677 = vpow2.f32 %v3277_v5  ;;  %v3049_v59 = vsub.f32 %v8873_v4, %v7867_v0  ;;  %v8875_v5 = vld [vmem:[#allocation94_spill] sm:$0xff] }
 0x368   : > { %3517 = vadd.xlane.f32.xlu0 %v8016_v28  ;;  %v8024_v40 = vpop.eup %5657  ;;  %4253 = vst [vmem:[%s7446_s14 + $0x100] sm:$0xff] %v4125_v20  ;;  %v4126_v41 = vmul.f32 %v8872_v9, %v3998_v10  ;;  %v3743_v6 = vmul.f32 %v5656_v11, %v7957_v31  ;;  %v3283_v31 = vmul.f32 1.442695, %v3048_v47  ;;  %v3050_v53 = vsub.f32 %v8875_v5, %v7875_v14  ;;  %v8878_v14 = vld [vmem:[#allocation103_spill] sm:$0xff] }
 0x369   : > { %v8029_v3 = vpop.xlane.xlu0 %3401  ;;  %v5660_v61 = vpop.eup %5659 }
 0x36a   : > { %3519 = vadd.xlane.f32.xlu1 %v8024_v40  ;;  %v8034_v56 = vpop.eup %5661  ;;  %4254 = vst [vmem:[%s7446_s14 + $0x108] sm:$0xff] %v4126_v41  ;;  %v3871_v44 = vsub.f32 2.0, %v3743_v6  ;;  %v3744_v20 = vmul.f32 %v5660_v61, %v7967_v13  ;;  %5679 = vrcp.f32 %v8029_v3  ;;  %v3285_v13 = vmul.f32 1.442695, %v3049_v59  ;;  %v8877_v41 = vld [vmem:[#allocation97_spill] sm:$0xff] }
 0x36b   : > { %8874 = vst [vmem:[#allocation60_spill] sm:$0xff] %v8034_v56  ;;  %v8039_v10 = vpop.xlane.xlu1 %3403  ;;  %5681 = vpow2.f32 %v3279_v1  ;;  %v8044_v0 = vpop.eup %5663  ;;  %v3051_v1 = vsub.f32 %v8877_v41, %v7903_v16  ;;  %v8880_v16 = vld [vmem:[#allocation104_spill] sm:$0xff] }
 0x36c   : > { %3521 = vadd.xlane.f32.xlu0 %v8034_v56  ;;  %8876 = vst [vmem:[#allocation25_spill] sm:$0xff] %v8044_v0  ;;  %v3999_v51 = vmul.f32 %v5656_v11, %v3871_v44  ;;  %v3872_v9 = vsub.f32 2.0, %v3744_v20  ;;  %5683 = vrcp.f32 %v8039_v10  ;;  %v8052_v47 = vpop.eup %5665  ;;  %v3287_v44 = vmul.f32 1.442695, %v3050_v53  ;;  %v8879_v20 = vld [vmem:[#allocation98_spill] sm:$0xff] }
 0x36d   : > { %v8047_v6 = vpop.xlane.xlu0 %2921  ;;  %5685 = vpow2.f32 %v3281_v62  ;;  %v3052_v62 = vsub.f32 %v8879_v20, %v7911_v26 }
 0x36e   : > { %3523 = vadd.xlane.f32.xlu1 %v8044_v0  ;;  %v4127_v4 = vmul.f32 %v8878_v14, %v3999_v51  ;;  %v4000_v5 = vmul.f32 %v5660_v61, %v3872_v9  ;;  %5687 = vpow2.f32 %v3283_v31  ;;  %v3289_v9 = vmul.f32 1.442695, %v3051_v1  ;;  %v8881_v31 = vld [vmem:[#allocation101_spill] sm:$0xff] }
 0x36f   : > { %v8055_v56 = vpop.xlane.xlu1 %2923  ;;  %v5668_v11 = vpop.eup %5667  ;;  %5689 = vpow2.f32 %v3285_v13  ;;  %v3053_v53 = vsub.f32 %v8881_v31, %v7939_v25  ;;  %v8883_v13 = vld [vmem:[#allocation102_spill] sm:$0xff] }
 0x370   : > { %3525 = vadd.xlane.f32.xlu0 %v8052_v47  ;;  %v8060_v59 = vpop.eup %5669  ;;  %4255 = vst [vmem:[%s7446_s14 + $0x110] sm:$0xff] %v4127_v4  ;;  %v4128_v41 = vmul.f32 %v8880_v16, %v4000_v5  ;;  %v3745_v0 = vmul.f32 %v5668_v11, %v7993_v24  ;;  %v3291_v24 = vmul.f32 1.442695, %v3052_v62  ;;  %v3054_v1 = vsub.f32 %v8883_v13, %v7947_v43  ;;  %v8886_v43 = vld [vmem:[#allocation107_spill] sm:$0xff] }
 0x371   : > { %v8065_v51 = vpop.xlane.xlu0 %3405  ;;  %v5672_v61 = vpop.eup %5671 }
 0x372   : > { %3527 = vadd.xlane.f32.xlu1 %v8060_v59  ;;  %v8070_v26 = vpop.eup %5673  ;;  %4256 = vst [vmem:[%s7446_s14 + $0x118] sm:$0xff] %v4128_v41  ;;  %v3873_v14 = vsub.f32 2.0, %v3745_v0  ;;  %v3746_v4 = vmul.f32 %v5672_v61, %v8003_v29  ;;  %5691 = vrcp.f32 %v8065_v51  ;;  %v3293_v29 = vmul.f32 1.442695, %v3053_v53  ;;  %v8885_v41 = vld [vmem:[#allocation105_spill] sm:$0xff] }
 0x373   : > { %8882 = vst [vmem:[#allocation26_spill] sm:$0xff] %v8070_v26  ;;  %v8075_v5 = vpop.xlane.xlu1 %3407  ;;  %5693 = vpow2.f32 %v3287_v44  ;;  %v8080_v25 = vpop.eup %5675  ;;  %v3055_v44 = vsub.f32 %v8885_v41, %v7975_v34  ;;  %v8888_v34 = vld [vmem:[#allocation109_spill] sm:$0xff] }
 0x374   : > { %3529 = vadd.xlane.f32.xlu0 %v8070_v26  ;;  %8884 = vst [vmem:[#allocation27_spill] sm:$0xff] %v8080_v25  ;;  %v4001_v20 = vmul.f32 %v5668_v11, %v3873_v14  ;;  %v3874_v16 = vsub.f32 2.0, %v3746_v4  ;;  %5695 = vrcp.f32 %v8075_v5  ;;  %v8088_v62 = vpop.eup %5677  ;;  %v3295_v14 = vmul.f32 1.442695, %v3054_v1  ;;  %v8887_v4 = vld [vmem:[#allocation106_spill] sm:$0xff] }
 0x375   : > { %v8083_v0 = vpop.xlane.xlu0 %2925  ;;  %5697 = vpow2.f32 %v3289_v9  ;;  %v3056_v9 = vsub.f32 %v8887_v4, %v7983_v19 }
 0x376   : > { %3531 = vadd.xlane.f32.xlu1 %v8080_v25  ;;  %v4129_v31 = vmul.f32 %v8886_v43, %v4001_v20  ;;  %v4002_v13 = vmul.f32 %v5672_v61, %v3874_v16  ;;  %5699 = vpow2.f32 %v3291_v24  ;;  %v3297_v16 = vmul.f32 1.442695, %v3055_v44  ;;  %v8889_v24 = vld [vmem:[#allocation110_spill] sm:$0xff] }
 0x377   : > { %v8091_v26 = vpop.xlane.xlu1 %2927  ;;  %v5680_v11 = vpop.eup %5679  ;;  %5701 = vpow2.f32 %v3293_v29  ;;  %v3057_v1 = vsub.f32 %v8889_v24, %v8011_v55  ;;  %v8891_v29 = vld [vmem:[#allocation111_spill] sm:$0xff] }
 0x378   : > { %3533 = vadd.xlane.f32.xlu0 %v8088_v62  ;;  %v8096_v53 = vpop.eup %5681  ;;  %4257 = vst [vmem:[%s7446_s14 + $0x120] sm:$0xff] %v4129_v31  ;;  %v4130_v41 = vmul.f32 %v8888_v34, %v4002_v13  ;;  %v3747_v25 = vmul.f32 %v5680_v11, %v8029_v3  ;;  %v3299_v3 = vmul.f32 1.442695, %v3056_v9  ;;  %v3058_v44 = vsub.f32 %v8891_v29, %v8019_v60  ;;  %v8892_v60 = vld [vmem:[#allocation113_spill] sm:$0xff] }
 0x379   : > { %v8101_v20 = vpop.xlane.xlu0 %3409  ;;  %v5684_v61 = vpop.eup %5683 }
 0x37a   : > { %3535 = vadd.xlane.f32.xlu1 %v8096_v53  ;;  %v8106_v19 = vpop.eup %5685  ;;  %4258 = vst [vmem:[%s7446_s14 + $0x128] sm:$0xff] %v4130_v41  ;;  %v3875_v43 = vsub.f32 2.0, %v3747_v25  ;;  %v3748_v31 = vmul.f32 %v5684_v61, %v8039_v10  ;;  %5703 = vrcp.f32 %v8101_v20  ;;  %v3301_v10 = vmul.f32 1.442695, %v3057_v1 }
 0x37b   : > { %8890 = vst [vmem:[#allocation63_spill] sm:$0xff] %v8106_v19  ;;  %v8111_v13 = vpop.xlane.xlu1 %3411  ;;  %5705 = vpow2.f32 %v3295_v14  ;;  %v8116_v55 = vpop.eup %5687  ;;  %v3059_v41 = vsub.f32 %v7420_v38, %v8047_v6  ;;  %v8893_v38 = vld [vmem:[#allocation115_spill] sm:$0xff] }
 0x37c   : > { %3537 = vadd.xlane.f32.xlu0 %v8106_v19  ;;  %v4003_v4 = vmul.f32 %v5680_v11, %v3875_v43  ;;  %v3876_v34 = vsub.f32 2.0, %v3748_v31  ;;  %5707 = vrcp.f32 %v8111_v13  ;;  %v8122_v14 = vpop.eup %5689  ;;  %v3303_v11 = vmul.f32 1.442695, %v3058_v44 }
 0x37d   : > { %v2930_v25 = vpop.xlane.xlu0 %2929  ;;  %5709 = vpow2.f32 %v3297_v16  ;;  %v3060_v43 = vsub.f32 %v7431_v35, %v8055_v56 }
 0x37e   : > { %3539 = vadd.xlane.f32.xlu1 %v8116_v55  ;;  %v4131_v9 = vmul.f32 %v8892_v60, %v4003_v4  ;;  %v4004_v24 = vmul.f32 %v5684_v61, %v3876_v34  ;;  %5711 = vpow2.f32 %v3299_v3  ;;  %v3305_v4 = vmul.f32 1.442695, %v3059_v41  ;;  %v8894_v3 = vld [vmem:[#allocation118_spill] sm:$0xff] }
 0x37f   : > { %v2932_v29 = vpop.xlane.xlu1 %2931  ;;  %v5692_v19 = vpop.eup %5691  ;;  %5713 = vpow2.f32 %v3301_v10  ;;  %v3061_v44 = vsub.f32 %v8894_v3, %v8083_v0  ;;  %v8896_v10 = vld [vmem:[#allocation119_spill] sm:$0xff] }
 0x380   : > { %3541 = vadd.xlane.f32.xlu0 %v8122_v14  ;;  %v8128_v16 = vpop.eup %5693  ;;  %4259 = vst [vmem:[%s7446_s14 + $0x130] sm:$0xff] %v4131_v9  ;;  %v4132_v6 = vmul.f32 %v8893_v38, %v4004_v24  ;;  %v3749_v1 = vmul.f32 %v5692_v19, %v8065_v51  ;;  %v3307_v51 = vmul.f32 1.442695, %v3060_v43  ;;  %v3062_v41 = vsub.f32 %v8896_v10, %v8091_v26  ;;  %v8899_v43 = vld [vmem:[#allocation116_spill] sm:$0xff] }
 0x381   : > { %v8133_v31 = vpop.xlane.xlu0 %3413  ;;  %v5696_v61 = vpop.eup %5695 }
 0x382   : > { %3543 = vadd.xlane.f32.xlu1 %v8128_v16  ;;  %v8138_v35 = vpop.eup %5697  ;;  %4260 = vst [vmem:[%s7446_s14 + $0x138] sm:$0xff] %v4132_v6  ;;  %v3877_v56 = vsub.f32 2.0, %v3749_v1  ;;  %v3750_v34 = vmul.f32 %v5696_v61, %v8075_v5  ;;  %5715 = vrcp.f32 %v8133_v31  ;;  %v3309_v5 = vmul.f32 1.442695, %v3061_v44  ;;  %v8898_v6 = vld [vmem:[#allocation40_spill] sm:$0xff] }
 0x383   : > { %8895 = vst [vmem:[#allocation28_spill] sm:$0xff] %v8138_v35  ;;  %v8143_v60 = vpop.xlane.xlu1 %3415  ;;  %5717 = vpow2.f32 %v3303_v11  ;;  %v8148_v0 = vpop.eup %5699  ;;  %v3063_v1 = vsub.f32 %v8898_v6, %v2930_v25  ;;  %v8901_v25 = vld [vmem:[#allocation117_spill] sm:$0xff] }
 0x384   : > { %3545 = vadd.xlane.f32.xlu0 %v8138_v35  ;;  %8897 = vst [vmem:[#allocation64_spill] sm:$0xff] %v8148_v0  ;;  %v4005_v9 = vmul.f32 %v5692_v19, %v3877_v56  ;;  %v3878_v24 = vsub.f32 2.0, %v3750_v34  ;;  %5719 = vrcp.f32 %v8143_v60  ;;  %v8153_v11 = vpop.eup %5701  ;;  %v3311_v19 = vmul.f32 1.442695, %v3062_v41  ;;  %v8900_v56 = vld [vmem:[#allocation5_spill] sm:$0xff] }
 0x385   : > { %v2934_v38 = vpop.xlane.xlu0 %2933  ;;  %5721 = vpow2.f32 %v3305_v4  ;;  %v3064_v34 = vsub.f32 %v8900_v56, %v2932_v29 }
 0x386   : > { %3547 = vadd.xlane.f32.xlu1 %v8148_v0  ;;  %v4133_v26 = vmul.f32 %v8899_v43, %v4005_v9  ;;  %v4006_v3 = vmul.f32 %v5696_v61, %v3878_v24  ;;  %5723 = vpow2.f32 %v3307_v51  ;;  %v3065_v0 = vsub.f32 %v7526_v27, %v2934_v38 }
 0x387   : > { %v2936_v10 = vpop.xlane.xlu1 %2935  ;;  %v5704_v35 = vpop.eup %5703  ;;  %5725 = vpow2.f32 %v3309_v5  ;;  %v3313_v51 = vmul.f32 1.442695, %v3063_v1  ;;  %v3315_v27 = vmul.f32 1.442695, %v3064_v34 }
 0x388   : > { %3549 = vadd.xlane.f32.xlu0 %v8153_v11  ;;  %v8158_v4 = vpop.eup %5705  ;;  %4261 = vst [vmem:[%s7446_s14 + $0x140] sm:$0xff] %v4133_v26  ;;  %v4134_v44 = vmul.f32 %v8901_v25, %v4006_v3  ;;  %v3751_v6 = vmul.f32 %v5704_v35, %v8101_v20  ;;  %v3066_v41 = vsub.f32 %v7537_v18, %v2936_v10  ;;  %v3317_v1 = vmul.f32 1.442695, %v3065_v0 }
 0x389   : > { %v8164_v9 = vpop.xlane.xlu0 %3417  ;;  %v5708_v61 = vpop.eup %5707 }
 0x38a   : > { %3551 = vadd.xlane.f32.xlu1 %v8158_v4  ;;  %v8168_v29 = vpop.eup %5709  ;;  %4262 = vst [vmem:[%s7446_s14 + $0x148] sm:$0xff] %v4134_v44  ;;  %v3879_v24 = vsub.f32 2.0, %v3751_v6  ;;  %v3752_v43 = vmul.f32 %v5708_v61, %v8111_v13  ;;  %5727 = vrcp.f32 %v8164_v9  ;;  %v3319_v3 = vmul.f32 1.442695, %v3066_v41 }
 0x38b   : > { %v8173_v20 = vpop.xlane.xlu1 %3419  ;;  %5729 = vpow2.f32 %v3311_v19  ;;  %v8176_v38 = vpop.eup %5711  ;;  %v8902_v19 = vld [vmem:[#allocation120_spill] sm:$0xff] }
 0x38c   : > { %3553 = vadd.xlane.f32.xlu0 %v8168_v29  ;;  %v4007_v5 = vmul.f32 %v5704_v35, %v3879_v24  ;;  %v3880_v18 = vsub.f32 2.0, %v3752_v43  ;;  %5731 = vrcp.f32 %v8173_v20  ;;  %v8181_v10 = vpop.eup %5713 }
 0x38d   : > { %v2938_v26 = vpop.xlane.xlu0 %2937  ;;  %5733 = vpow2.f32 %v3313_v51 }
 0x38e   : > { %v3067_v13 = vsub.f32 %v7564_v22, %v2938_v26  ;;  %3555 = vadd.xlane.f32.xlu1 %v8176_v38  ;;  %v4135_v56 = vmul.f32 %v8902_v19, %v4007_v5  ;;  %v4008_v34 = vmul.f32 %v5708_v61, %v3880_v18  ;;  %5735 = vpow2.f32 %v3315_v27  ;;  %v8904_v22 = vld [vmem:[#allocation39_spill] sm:$0xff]  ;;  %v8908_v19 = vld [vmem:[#allocation6_spill] sm:$0xff] }
 0x38f   : > { %v2940_v25 = vpop.xlane.xlu1 %2939  ;;  %v5716_v35 = vpop.eup %5715  ;;  %5737 = vpow2.f32 %v3317_v1 }
 0x390   : > { %v3321_v0 = vmul.f32 1.442695, %v3067_v13  ;;  %v3068_v44 = vsub.f32 %v7575_v32, %v2940_v25  ;;  %3557 = vadd.xlane.f32.xlu0 %v8181_v10  ;;  %v8186_v6 = vpop.eup %5717  ;;  %4263 = vst [vmem:[%s7446_s14 + $0x150] sm:$0xff] %v4135_v56  ;;  %v4136_v51 = vmul.f32 %v8904_v22, %v4008_v34  ;;  %v3753_v41 = vmul.f32 %v5716_v35, %v8133_v31 }
 0x391   : > { %8903 = vst [vmem:[#allocation29_spill] sm:$0xff] %v8186_v6  ;;  %v3422_v24 = vpop.xlane.xlu0 %3421  ;;  %v5720_v43 = vpop.eup %5719  ;;  %5739 = vpow2.f32 %v3319_v3 }
 0x392   : > { %3559 = vadd.xlane.f32.xlu1 %v8186_v6  ;;  %v8192_v61 = vpop.eup %5721  ;;  %4264 = vst [vmem:[%s7446_s14 + $0x158] sm:$0xff] %v4136_v51  ;;  %v3881_v27 = vsub.f32 2.0, %v3753_v41  ;;  %v3754_v32 = vmul.f32 %v5720_v43, %v8143_v60  ;;  %v3323_v5 = vmul.f32 1.442695, %v3068_v44  ;;  %5741 = vrcp.f32 %v3422_v24 }
 0x393   : > { %8905 = vst [vmem:[#allocation30_spill] sm:$0xff] %v8192_v61  ;;  %v3424_v18 = vpop.xlane.xlu1 %3423  ;;  %5743 = vpow2.f32 %v3321_v0  ;;  %v8197_v26 = vpop.eup %5723 }
 0x394   : > { %3561 = vadd.xlane.f32.xlu0 %v8192_v61  ;;  %8906 = vst [vmem:[#allocation31_spill] sm:$0xff] %v8197_v26  ;;  %v4009_v31 = vmul.f32 %v5716_v35, %v3881_v27  ;;  %v3882_v1 = vsub.f32 2.0, %v3754_v32  ;;  %5745 = vrcp.f32 %v3424_v18  ;;  %v8200_v13 = vpop.eup %5725  ;;  %v8910_v35 = vld [vmem:[#allocation7_spill] sm:$0xff] }
 0x395   : > { %v3426_v3 = vpop.xlane.xlu0 %3425  ;;  %8907 = vst [vmem:[#allocation67_spill] sm:$0xff] %v8200_v13 }
 0x396   : > { %5747 = vrcp.f32 %v3426_v3  ;;  %3563 = vadd.xlane.f32.xlu1 %v8197_v26  ;;  %v4137_v60 = vmul.f32 %v8908_v19, %v4009_v31  ;;  %v4010_v56 = vmul.f32 %v5720_v43, %v3882_v1 }
 0x397   : > { %5749 = vpow2.f32 %v3323_v5  ;;  %v3428_v34 = vpop.xlane.xlu1 %3427  ;;  %v5728_v25 = vpop.eup %5727 }
 0x398   : > { %5751 = vrcp.f32 %v3428_v34  ;;  %3565 = vadd.xlane.f32.xlu0 %v8200_v13  ;;  %v8204_v0 = vpop.eup %5729  ;;  %4265 = vst [vmem:[%s7446_s14 + $0x160] sm:$0xff] %v4137_v60  ;;  %v4138_v44 = vmul.f32 %v8910_v35, %v4010_v56  ;;  %v3755_v22 = vmul.f32 %v5728_v25, %v8164_v9 }
 0x399   : > { %8909 = vst [vmem:[#allocation32_spill] sm:$0xff] %v8204_v0  ;;  %v3430_v51 = vpop.xlane.xlu0 %3429  ;;  %v5732_v41 = vpop.eup %5731 }
 0x39a   : > { %5753 = vrcp.f32 %v3430_v51  ;;  %3567 = vadd.xlane.f32.xlu1 %v8204_v0  ;;  %v8210_v27 = vpop.eup %5733  ;;  %4266 = vst [vmem:[%s7446_s14 + $0x168] sm:$0xff] %v4138_v44  ;;  %v3883_v43 = vsub.f32 2.0, %v3755_v22  ;;  %v3756_v32 = vmul.f32 %v5732_v41, %v8173_v20 }
 0x39b   : > { %8911 = vst [vmem:[#allocation68_spill] sm:$0xff] %v8210_v27  ;;  %v3432_v5 = vpop.xlane.xlu1 %3431  ;;  %v8215_v31 = vpop.eup %5735 }
 0x39c   : > { %5755 = vrcp.f32 %v3432_v5  ;;  %3569 = vadd.xlane.f32.xlu0 %v8210_v27  ;;  %8912 = vst [vmem:[#allocation33_spill] sm:$0xff] %v8215_v31  ;;  %v4011_v1 = vmul.f32 %v5728_v25, %v3883_v43  ;;  %v3884_v9 = vsub.f32 2.0, %v3756_v32  ;;  %v8217_v60 = vpop.eup %5737 }
 0x39d   : > { %v3434_v19 = vpop.xlane.xlu0 %3433  ;;  %8913 = vst [vmem:[#allocation34_spill] sm:$0xff] %v8217_v60 }
 0x39e   : > { %5757 = vrcp.f32 %v3434_v19  ;;  %3571 = vadd.xlane.f32.xlu1 %v8215_v31  ;;  %v8220_v56 = vpop.eup %5739  ;;  %v4139_v20 = vmul.f32 %v7546_v23, %v4011_v1  ;;  %v4012_v35 = vmul.f32 %v5732_v41, %v3884_v9 }
 0x39f   : > { %8914 = vst [vmem:[#allocation35_spill] sm:$0xff] %v8220_v56  ;;  %v3436_v44 = vpop.xlane.xlu1 %3435  ;;  %v5742_v22 = vpop.eup %5741 }
 0x3a0   : > { %5759 = vrcp.f32 %v3436_v44  ;;  %3573 = vadd.xlane.f32.xlu0 %v8217_v60  ;;  %v8224_v27 = vpop.eup %5743  ;;  %4267 = vst [vmem:[%s7446_s14 + $0x170] sm:$0xff] %v4139_v20  ;;  %v4140_v25 = vmul.f32 %v7554_v12, %v4012_v35  ;;  %v3757_v43 = vmul.f32 %v5742_v22, %v3422_v24 }
 0x3a1   : > { %8915 = vst [vmem:[#allocation71_spill] sm:$0xff] %v8224_v27  ;;  %v3438_v32 = vpop.xlane.xlu0 %3437  ;;  %v5746_v0 = vpop.eup %5745 }
 0x3a2   : > { %5761 = vrcp.f32 %v3438_v32  ;;  %3575 = vadd.xlane.f32.xlu1 %v8220_v56  ;;  %4268 = vst [vmem:[%s7446_s14 + $0x178] sm:$0xff] %v4140_v25  ;;  %v3885_v23 = vsub.f32 2.0, %v3757_v43  ;;  %v3758_v41 = vmul.f32 %v5746_v0, %v3424_v18 }
 0x3a3   : > { %v5748_v31 = vpop.eup %5747  ;;  %v3440_v1 = vpop.xlane.xlu1 %3439 }
 0x3a4   : > { %v8230_v9 = vpop.eup %5749  ;;  %v3759_v13 = vmul.f32 %v5748_v31, %v3426_v3  ;;  %5763 = vrcp.f32 %v3440_v1  ;;  %3577 = vadd.xlane.f32.xlu0 %v8224_v27  ;;  %v4013_v60 = vmul.f32 %v5742_v22, %v3885_v23  ;;  %v3886_v12 = vsub.f32 2.0, %v3758_v41 }
 0x3a5   : > { %8916 = vst [vmem:[#allocation36_spill] sm:$0xff] %v8230_v9  ;;  %v5752_v20 = vpop.eup %5751  ;;  %v3442_v24 = vpop.xlane.xlu0 %3441 }
 0x3a6   : > { %v3887_v35 = vsub.f32 2.0, %v3759_v13  ;;  %v3760_v26 = vmul.f32 %v5752_v20, %v3428_v34  ;;  %5765 = vrcp.f32 %v3442_v24  ;;  %3579 = vadd.xlane.f32.xlu1 %v8230_v9  ;;  %v4141_v18 = vmul.f32 %v7584_v30, %v4013_v60 }
 0x3a7   : > { %v5754_v25 = vpop.eup %5753  ;;  %v4014_v43 = vmul.f32 %v5746_v0, %v3886_v12  ;;  %v3444_v56 = vpop.xlane.xlu1 %3443 }
 0x3a8   : > { %v4015_v3 = vmul.f32 %v5748_v31, %v3887_v35  ;;  %v3888_v61 = vsub.f32 2.0, %v3760_v26  ;;  %v3761_v27 = vmul.f32 %v5754_v25, %v3430_v51  ;;  %5767 = vrcp.f32 %v3444_v56  ;;  %4269 = vst [vmem:[%s7446_s14 + $0x180] sm:$0xff] %v4141_v18  ;;  %v8917_v31 = vld [vmem:[#allocation43_spill] sm:$0xff] }
 0x3a9   : > { %v5756_v22 = vpop.eup %5755  ;;  %v4142_v23 = vmul.f32 %v7592_v8, %v4014_v43  ;;  %v3446_v13 = vpop.xlane.xlu0 %3445 }
 0x3aa   : > { %v4143_v34 = vmul.f32 %v7602_v37, %v4015_v3  ;;  %v4016_v41 = vmul.f32 %v5752_v20, %v3888_v61  ;;  %v3889_v9 = vsub.f32 2.0, %v3761_v27  ;;  %v3762_v6 = vmul.f32 %v5756_v22, %v3432_v5 }
 0x3ab   : > { %v5758_v30 = vpop.eup %5757  ;;  %4270 = vst [vmem:[%s7446_s14 + $0x188] sm:$0xff] %v4142_v23  ;;  %5769 = vrcp.f32 %v3446_v13  ;;  %v3448_v0 = vpop.xlane.xlu1 %3447  ;;  %v8918_v23 = vld [vmem:[#allocation8_spill] sm:$0xff] }
 0x3ac   : > { %4271 = vst [vmem:[%s7446_s14 + $0x190] sm:$0xff] %v4143_v34  ;;  %v4144_v26 = vmul.f32 %v8917_v31, %v4016_v41  ;;  %v4017_v51 = vmul.f32 %v5754_v25, %v3889_v9  ;;  %v3890_v60 = vsub.f32 2.0, %v3762_v6  ;;  %v3763_v12 = vmul.f32 %v5758_v30, %v3434_v19 }
 0x3ad   : > { %v5760_v35 = vpop.eup %5759  ;;  %5771 = vrcp.f32 %v3448_v0  ;;  %v3450_v8 = vpop.xlane.xlu0 %3449 }
 0x3ae   : > { %4272 = vst [vmem:[%s7446_s14 + $0x198] sm:$0xff] %v4144_v26  ;;  %v4145_v37 = vmul.f32 %v7620_v36, %v4017_v51  ;;  %v4018_v61 = vmul.f32 %v5756_v22, %v3890_v60  ;;  %v3891_v27 = vsub.f32 2.0, %v3763_v12  ;;  %v3764_v5 = vmul.f32 %v5760_v35, %v3436_v44  ;;  %v8919_v26 = vld [vmem:[#allocation44_spill] sm:$0xff] }
 0x3af   : > { %v5762_v20 = vpop.eup %5761  ;;  %5773 = vrcp.f32 %v3450_v8  ;;  %v3452_v18 = vpop.xlane.xlu1 %3451 }
 0x3b0   : > { %4273 = vst [vmem:[%s7446_s14 + $0x1a0] sm:$0xff] %v4145_v37  ;;  %v4146_v43 = vmul.f32 %v7628_v46, %v4018_v61  ;;  %v4019_v9 = vmul.f32 %v5758_v30, %v3891_v27  ;;  %v3892_v6 = vsub.f32 2.0, %v3764_v5  ;;  %v3765_v19 = vmul.f32 %v5762_v20, %v3438_v32 }
 0x3b1   : > { %v5764_v25 = vpop.eup %5763  ;;  %5775 = vrcp.f32 %v3452_v18  ;;  %v3454_v3 = vpop.xlane.xlu0 %3453 }
 0x3b2   : > { %4274 = vst [vmem:[%s7446_s14 + $0x1a8] sm:$0xff] %v4146_v43  ;;  %v4147_v36 = vmul.f32 %v8918_v23, %v4019_v9  ;;  %v4020_v22 = vmul.f32 %v5760_v35, %v3892_v6  ;;  %v3893_v34 = vsub.f32 2.0, %v3765_v19  ;;  %v3766_v44 = vmul.f32 %v5764_v25, %v3440_v1  ;;  %v8920_v23 = vld [vmem:[#allocation9_spill] sm:$0xff] }
 0x3b3   : > { %v5766_v41 = vpop.eup %5765  ;;  %5777 = vrcp.f32 %v3454_v3  ;;  %v3456_v31 = vpop.xlane.xlu1 %3455 }
 0x3b4   : > { %4275 = vst [vmem:[%s7446_s14 + $0x1b0] sm:$0xff] %v4147_v36  ;;  %v4148_v46 = vmul.f32 %v8919_v26, %v4020_v22  ;;  %v4021_v30 = vmul.f32 %v5762_v20, %v3893_v34  ;;  %v3894_v51 = vsub.f32 2.0, %v3766_v44  ;;  %v3767_v32 = vmul.f32 %v5766_v41, %v3442_v24  ;;  %v8921_v44 = vld [vmem:[#allocation10_spill] sm:$0xff] }
 0x3b5   : > { %v5768_v60 = vpop.eup %5767  ;;  %5779 = vrcp.f32 %v3456_v31  ;;  %v8249_v12 = vpop.xlane.xlu0 %3457 }
 0x3b6   : > { %4276 = vst [vmem:[%s7446_s14 + $0x1b8] sm:$0xff] %v4148_v46  ;;  %v4149_v35 = vmul.f32 %v7656_v52, %v4021_v30  ;;  %v4022_v37 = vmul.f32 %v5764_v25, %v3894_v51  ;;  %v3895_v1 = vsub.f32 2.0, %v3767_v32  ;;  %v3768_v61 = vmul.f32 %v5768_v60, %v3444_v56 }
 0x3b7   : > { %5781 = vrcp.f32 %v8249_v12  ;;  %v3460_v27 = vpop.xlane.xlu1 %3459 }
 0x3b8   : > { %v5770_v5 = vpop.eup %5769  ;;  %4277 = vst [vmem:[%s7446_s14 + $0x1c0] sm:$0xff] %v4149_v35  ;;  %v4150_v20 = vmul.f32 %v7664_v49, %v4022_v37  ;;  %v4023_v24 = vmul.f32 %v5766_v41, %v3895_v1  ;;  %v3896_v43 = vsub.f32 2.0, %v3768_v61  ;;  %5783 = vrcp.f32 %v3460_v27 }
 0x3b9   : > { %v3769_v9 = vmul.f32 %v5770_v5, %v3446_v13  ;;  %v3462_v6 = vpop.xlane.xlu0 %3461 }
 0x3ba   : > { %v5772_v19 = vpop.eup %5771  ;;  %4278 = vst [vmem:[%s7446_s14 + $0x1c8] sm:$0xff] %v4150_v20  ;;  %v4151_v52 = vmul.f32 %v8920_v23, %v4023_v24  ;;  %v4024_v25 = vmul.f32 %v5768_v60, %v3896_v43  ;;  %5785 = vrcp.f32 %v3462_v6  ;;  %v8922_v43 = vld [vmem:[#allocation11_spill] sm:$0xff] }
 0x3bb   : > { %v3897_v56 = vsub.f32 2.0, %v3769_v9  ;;  %v3770_v36 = vmul.f32 %v5772_v19, %v3448_v0  ;;  %v3464_v22 = vpop.xlane.xlu1 %3463 }
 0x3bc   : > { %v5774_v34 = vpop.eup %5773  ;;  %4279 = vst [vmem:[%s7446_s14 + $0x1d0] sm:$0xff] %v4151_v52  ;;  %v4152_v26 = vmul.f32 %v8921_v44, %v4024_v25  ;;  %5787 = vrcp.f32 %v3464_v22 }
 0x3bd   : > { %v4025_v49 = vmul.f32 %v5770_v5, %v3897_v56  ;;  %v3898_v41 = vsub.f32 2.0, %v3770_v36  ;;  %v3771_v13 = vmul.f32 %v5774_v34, %v3450_v8  ;;  %v3466_v46 = vpop.xlane.xlu0 %3465 }
 0x3be   : > { %v5776_v30 = vpop.eup %5775  ;;  %4280 = vst [vmem:[%s7446_s14 + $0x1d8] sm:$0xff] %v4152_v26  ;;  %5789 = vrcp.f32 %v3466_v46 }
 0x3bf   : > { %v4153_v51 = vmul.f32 %v7692_v42, %v4025_v49  ;;  %v4026_v32 = vmul.f32 %v5772_v19, %v3898_v41  ;;  %v3899_v60 = vsub.f32 2.0, %v3771_v13  ;;  %v3772_v0 = vmul.f32 %v5776_v30, %v3452_v18  ;;  %v3468_v35 = vpop.xlane.xlu1 %3467 }
 0x3c0   : > { %v5778_v37 = vpop.eup %5777  ;;  %5791 = vrcp.f32 %v3468_v35 }
 0x3c1   : > { %4281 = vst [vmem:[%s7446_s14 + $0x1e0] sm:$0xff] %v4153_v51  ;;  %v4154_v1 = vmul.f32 %v7700_v63, %v4026_v32  ;;  %v4027_v61 = vmul.f32 %v5774_v34, %v3899_v60  ;;  %v3900_v5 = vsub.f32 2.0, %v3772_v0  ;;  %v3773_v8 = vmul.f32 %v5778_v37, %v3454_v3  ;;  %v3470_v20 = vpop.xlane.xlu0 %3469  ;;  %v8923_v63 = vld [vmem:[#allocation47_spill] sm:$0xff]  ;;  %v8924_v0 = vld [vmem:[#allocation12_spill] sm:$0xff] }
 0x3c2   : > { %v5780_v24 = vpop.eup %5779  ;;  %5793 = vrcp.f32 %v3470_v20 }
 0x3c3   : > { %4282 = vst [vmem:[%s7446_s14 + $0x1e8] sm:$0xff] %v4154_v1  ;;  %v4155_v9 = vmul.f32 %v8922_v43, %v4027_v61  ;;  %v4028_v42 = vmul.f32 %v5776_v30, %v3900_v5  ;;  %v3901_v19 = vsub.f32 2.0, %v3773_v8  ;;  %v3774_v18 = vmul.f32 %v5780_v24, %v3456_v31  ;;  %v3472_v23 = vpop.xlane.xlu1 %3471  ;;  %v8925_v8 = vld [vmem:[#allocation48_spill] sm:$0xff] }
 0x3c4   : > { %v5782_v52 = vpop.eup %5781  ;;  %5795 = vrcp.f32 %v3472_v23 }
 0x3c5   : > { %v5784_v25 = vpop.eup %5783  ;;  %4283 = vst [vmem:[%s7446_s14 + $0x1f0] sm:$0xff] %v4155_v9  ;;  %v4156_v56 = vmul.f32 %v8923_v63, %v4028_v42  ;;  %v4029_v36 = vmul.f32 %v5778_v37, %v3901_v19  ;;  %v3902_v3 = vsub.f32 2.0, %v3774_v18  ;;  %v3775_v34 = vmul.f32 %v5782_v52, %v8249_v12  ;;  %v3474_v44 = vpop.xlane.xlu0 %3473  ;;  %v8926_v9 = vld [vmem:[#allocation13_spill] sm:$0xff] }
 0x3c6   : > { %v3776_v26 = vmul.f32 %v5784_v25, %v3460_v27  ;;  %5797 = vrcp.f32 %v3474_v44 }
 0x3c7   : > { %v5786_v49 = vpop.eup %5785  ;;  %4284 = vst [vmem:[%s7446_s14 + $0x1f8] sm:$0xff] %v4156_v56  ;;  %v4157_v41 = vmul.f32 %v7728_v39, %v4029_v36  ;;  %v4030_v31 = vmul.f32 %v5780_v24, %v3902_v3  ;;  %v3903_v13 = vsub.f32 2.0, %v3775_v34  ;;  %v3476_v30 = vpop.xlane.xlu1 %3475 }
 0x3c8   : > { %v3904_v51 = vsub.f32 2.0, %v3776_v26  ;;  %v3777_v32 = vmul.f32 %v5786_v49, %v3462_v6  ;;  %5799 = vrcp.f32 %v3476_v30 }
 0x3c9   : > { %v5788_v60 = vpop.eup %5787  ;;  %4285 = vst [vmem:[%s7446_s14 + $0x200] sm:$0xff] %v4157_v41  ;;  %v4158_v37 = vmul.f32 %v8924_v0, %v4030_v31  ;;  %v4031_v12 = vmul.f32 %v5782_v52, %v3903_v13  ;;  %v3478_v1 = vpop.xlane.xlu0 %3477  ;;  %v8928_v41 = vld [vmem:[#allocation15_spill] sm:$0xff] }
 0x3ca   : > { %v4032_v27 = vmul.f32 %v5784_v25, %v3904_v51  ;;  %v3905_v61 = vsub.f32 2.0, %v3777_v32  ;;  %v3778_v5 = vmul.f32 %v5788_v60, %v3464_v22  ;;  %5801 = vrcp.f32 %v3478_v1  ;;  %v8927_v25 = vld [vmem:[#allocation14_spill] sm:$0xff]  ;;  %v8929_v0 = vld [vmem:[#allocation51_spill] sm:$0xff] }
 0x3cb   : > { %v5790_v39 = vpop.eup %5789  ;;  %4286 = vst [vmem:[%s7446_s14 + $0x208] sm:$0xff] %v4158_v37  ;;  %v4159_v24 = vmul.f32 %v8925_v8, %v4031_v12  ;;  %v3480_v43 = vpop.xlane.xlu1 %3479 }
 0x3cc   : > { %v4160_v6 = vmul.f32 %v8926_v9, %v4032_v27  ;;  %v4033_v42 = vmul.f32 %v5786_v49, %v3905_v61  ;;  %v3906_v19 = vsub.f32 2.0, %v3778_v5  ;;  %v3779_v18 = vmul.f32 %v5790_v39, %v3466_v46  ;;  %v8930_v5 = vld [vmem:[#allocation16_spill] sm:$0xff] }
 0x3cd   : > { %v5792_v63 = vpop.eup %5791  ;;  %4287 = vst [vmem:[%s7446_s14 + $0x210] sm:$0xff] %v4159_v24  ;;  %5803 = vrcp.f32 %v3480_v43  ;;  %v3482_v52 = vpop.xlane.xlu0 %3481 }
 0x3ce   : > { %4288 = vst [vmem:[%s7446_s14 + $0x218] sm:$0xff] %v4160_v6  ;;  %v4161_v22 = vmul.f32 %v8927_v25, %v4033_v42  ;;  %v4034_v56 = vmul.f32 %v5788_v60, %v3906_v19  ;;  %v3907_v36 = vsub.f32 2.0, %v3779_v18  ;;  %v3780_v3 = vmul.f32 %v5792_v63, %v3468_v35 }
 0x3cf   : > { %v5794_v34 = vpop.eup %5793  ;;  %5805 = vrcp.f32 %v3482_v52  ;;  %v3484_v26 = vpop.xlane.xlu1 %3483 }
 0x3d0   : > { %4289 = vst [vmem:[%s7446_s14 + $0x220] sm:$0xff] %v4161_v22  ;;  %v4162_v49 = vmul.f32 %v8928_v41, %v4034_v56  ;;  %v4035_v31 = vmul.f32 %v5790_v39, %v3907_v36  ;;  %v3908_v46 = vsub.f32 2.0, %v3780_v3  ;;  %v3781_v13 = vmul.f32 %v5794_v34, %v3470_v20 }
 0x3d1   : > { %v5796_v51 = vpop.eup %5795  ;;  %5807 = vrcp.f32 %v3484_v26  ;;  %v3486_v32 = vpop.xlane.xlu0 %3485 }
 0x3d2   : > { %4290 = vst [vmem:[%s7446_s14 + $0x228] sm:$0xff] %v4162_v49  ;;  %v4163_v37 = vmul.f32 %v8929_v0, %v4035_v31  ;;  %v4036_v60 = vmul.f32 %v5792_v63, %v3908_v46  ;;  %v3909_v12 = vsub.f32 2.0, %v3781_v13  ;;  %v3782_v35 = vmul.f32 %v5796_v51, %v3472_v23 }
 0x3d3   : > { %v5798_v27 = vpop.eup %5797  ;;  %5809 = vrcp.f32 %v3486_v32  ;;  %v3488_v61 = vpop.xlane.xlu1 %3487 }
 0x3d4   : > { %4291 = vst [vmem:[%s7446_s14 + $0x230] sm:$0xff] %v4163_v37  ;;  %v4164_v8 = vmul.f32 %v8930_v5, %v4036_v60  ;;  %v4037_v39 = vmul.f32 %v5794_v34, %v3909_v12  ;;  %v3910_v24 = vsub.f32 2.0, %v3782_v35  ;;  %v3783_v20 = vmul.f32 %v5798_v27, %v3474_v44 }
 0x3d5   : > { %v5800_v9 = vpop.eup %5799  ;;  %5811 = vrcp.f32 %v3488_v61  ;;  %v3490_v6 = vpop.xlane.xlu0 %3489 }
 0x3d6   : > { %4292 = vst [vmem:[%s7446_s14 + $0x238] sm:$0xff] %v4164_v8  ;;  %v4165_v42 = vmul.f32 %v7800_v50, %v4037_v39  ;;  %v4038_v19 = vmul.f32 %v5796_v51, %v3910_v24  ;;  %v3911_v18 = vsub.f32 2.0, %v3783_v20  ;;  %v3784_v23 = vmul.f32 %v5800_v9, %v3476_v30  ;;  %v8931_v50 = vld [vmem:[#allocation52_spill] sm:$0xff]  ;;  %v8932_v51 = vld [vmem:[#allocation17_spill] sm:$0xff] }
 0x3d7   : > { %v5802_v63 = vpop.eup %5801  ;;  %5813 = vrcp.f32 %v3490_v6  ;;  %v8287_v25 = vpop.xlane.xlu1 %3491 }
 0x3d8   : > { %4293 = vst [vmem:[%s7446_s14 + $0x240] sm:$0xff] %v4165_v42  ;;  %v4166_v22 = vmul.f32 %v7808_v7, %v4038_v19  ;;  %v4039_v56 = vmul.f32 %v5798_v27, %v3911_v18  ;;  %v3912_v44 = vsub.f32 2.0, %v3784_v23  ;;  %v3785_v36 = vmul.f32 %v5802_v63, %v3478_v1 }
 0x3d9   : > { %5815 = vrcp.f32 %v8287_v25  ;;  %v3494_v3 = vpop.xlane.xlu0 %3493 }
 0x3da   : > { %v5804_v34 = vpop.eup %5803  ;;  %4294 = vst [vmem:[%s7446_s14 + $0x248] sm:$0xff] %v4166_v22  ;;  %v4167_v41 = vmul.f32 %v8931_v50, %v4039_v56  ;;  %v4040_v30 = vmul.f32 %v5800_v9, %v3912_v44  ;;  %v3913_v49 = vsub.f32 2.0, %v3785_v36  ;;  %5817 = vrcp.f32 %v3494_v3  ;;  %v8934_v44 = vld [vmem:[#allocation19_spill] sm:$0xff] }
 0x3db   : > { %v3786_v31 = vmul.f32 %v5804_v34, %v3480_v43  ;;  %v3496_v46 = vpop.xlane.xlu1 %3495 }
 0x3dc   : > { %v5806_v13 = vpop.eup %5805  ;;  %4295 = vst [vmem:[%s7446_s14 + $0x250] sm:$0xff] %v4167_v41  ;;  %v4168_v7 = vmul.f32 %v8932_v51, %v4040_v30  ;;  %v4041_v0 = vmul.f32 %v5802_v63, %v3913_v49  ;;  %5819 = vrcp.f32 %v3496_v46 }
 0x3dd   : > { %v3914_v1 = vsub.f32 2.0, %v3786_v31  ;;  %v3787_v37 = vmul.f32 %v5806_v13, %v3482_v52  ;;  %v3498_v60 = vpop.xlane.xlu0 %3497 }
 0x3de   : > { %v5808_v12 = vpop.eup %5807  ;;  %4296 = vst [vmem:[%s7446_s14 + $0x258] sm:$0xff] %v4168_v7  ;;  %v4169_v35 = vmul.f32 %v7836_v58, %v4041_v0  ;;  %5821 = vrcp.f32 %v3498_v60  ;;  %v8933_v58 = vld [vmem:[#allocation18_spill] sm:$0xff] }
 0x3df   : > { %v4042_v27 = vmul.f32 %v5804_v34, %v3914_v1  ;;  %v3915_v5 = vsub.f32 2.0, %v3787_v37  ;;  %v3788_v43 = vmul.f32 %v5808_v12, %v3484_v26  ;;  %v3500_v8 = vpop.xlane.xlu1 %3499 }
 0x3e0   : > { %v5810_v39 = vpop.eup %5809  ;;  %4297 = vst [vmem:[%s7446_s14 + $0x260] sm:$0xff] %v4169_v35  ;;  %5823 = vrcp.f32 %v3500_v8 }
 0x3e1   : > { %v4170_v24 = vmul.f32 %v7844_v54, %v4042_v27  ;;  %v4043_v20 = vmul.f32 %v5806_v13, %v3915_v5  ;;  %v3916_v9 = vsub.f32 2.0, %v3788_v43  ;;  %v3789_v52 = vmul.f32 %v5810_v39, %v3486_v32  ;;  %v3502_v42 = vpop.xlane.xlu0 %3501  ;;  %v8935_v5 = vld [vmem:[#allocation55_spill] sm:$0xff] }
 0x3e2   : > { %v5812_v19 = vpop.eup %5811  ;;  %5825 = vrcp.f32 %v3502_v42 }
 0x3e3   : > { %4298 = vst [vmem:[%s7446_s14 + $0x268] sm:$0xff] %v4170_v24  ;;  %v4171_v18 = vmul.f32 %v8933_v58, %v4043_v20  ;;  %v4044_v23 = vmul.f32 %v5808_v12, %v3916_v9  ;;  %v3917_v63 = vsub.f32 2.0, %v3789_v52  ;;  %v3790_v26 = vmul.f32 %v5812_v19, %v3488_v61  ;;  %v3504_v22 = vpop.xlane.xlu1 %3503  ;;  %v8936_v9 = vld [vmem:[#allocation20_spill] sm:$0xff] }
 0x3e4   : > { %v5814_v56 = vpop.eup %5813  ;;  %5827 = vrcp.f32 %v3504_v22 }
 0x3e5   : > { %4299 = vst [vmem:[%s7446_s14 + $0x270] sm:$0xff] %v4171_v18  ;;  %v4172_v36 = vmul.f32 %v8934_v44, %v4044_v23  ;;  %v4045_v54 = vmul.f32 %v5810_v39, %v3917_v63  ;;  %v3918_v34 = vsub.f32 2.0, %v3790_v26  ;;  %v3791_v32 = vmul.f32 %v5814_v56, %v3490_v6  ;;  %v3506_v50 = vpop.xlane.xlu0 %3505 }
 0x3e6   : > { %v5816_v41 = vpop.eup %5815  ;;  %5829 = vrcp.f32 %v3506_v50 }
 0x3e7   : > { %v5818_v30 = vpop.eup %5817  ;;  %4300 = vst [vmem:[%s7446_s14 + $0x278] sm:$0xff] %v4172_v36  ;;  %v4173_v49 = vmul.f32 %v7872_v21, %v4045_v54  ;;  %v4046_v31 = vmul.f32 %v5812_v19, %v3918_v34  ;;  %v3919_v61 = vsub.f32 2.0, %v3791_v32  ;;  %v3792_v13 = vmul.f32 %v5816_v41, %v8287_v25  ;;  %v3508_v51 = vpop.xlane.xlu1 %3507 }
 0x3e8   : > { %v3793_v7 = vmul.f32 %v5818_v30, %v3494_v3  ;;  %5831 = vrcp.f32 %v3508_v51 }
 0x3e9   : > { %v5820_v0 = vpop.eup %5819  ;;  %4301 = vst [vmem:[%s7446_s14 + $0x280] sm:$0xff] %v4173_v49  ;;  %v4174_v1 = vmul.f32 %v7880_v45, %v4046_v31  ;;  %v4047_v6 = vmul.f32 %v5814_v56, %v3919_v61  ;;  %v3920_v37 = vsub.f32 2.0, %v3792_v13  ;;  %v3510_v12 = vpop.xlane.xlu0 %3509  ;;  %v8938_v61 = vld [vmem:[#allocation21_spill] sm:$0xff] }
 0x3ea   : > { %v3921_v35 = vsub.f32 2.0, %v3793_v7  ;;  %v3794_v27 = vmul.f32 %v5820_v0, %v3496_v46  ;;  %5833 = vrcp.f32 %v3510_v12 }
 0x3eb   : > { %v5822_v21 = vpop.eup %5821  ;;  %4302 = vst [vmem:[%s7446_s14 + $0x288] sm:$0xff] %v4174_v1  ;;  %v4175_v43 = vmul.f32 %v8935_v5, %v4047_v6  ;;  %v4048_v25 = vmul.f32 %v5816_v41, %v3920_v37  ;;  %v3512_v39 = vpop.xlane.xlu1 %3511 }
 0x3ec   : > { %v4049_v3 = vmul.f32 %v5818_v30, %v3921_v35  ;;  %v3922_v24 = vsub.f32 2.0, %v3794_v27  ;;  %v3795_v20 = vmul.f32 %v5822_v21, %v3498_v60  ;;  %5835 = vrcp.f32 %v3512_v39 }
 0x3ed   : > { %v5824_v45 = vpop.eup %5823  ;;  %4303 = vst [vmem:[%s7446_s14 + $0x290] sm:$0xff] %v4175_v43  ;;  %v4176_v52 = vmul.f32 %v8936_v9, %v4048_v25  ;;  %v3514_v19 = vpop.xlane.xlu0 %3513 }
 0x3ee   : > { %v4177_v46 = vmul.f32 %v7908_v2, %v4049_v3  ;;  %v4050_v58 = vmul.f32 %v5820_v0, %v3922_v24  ;;  %v3923_v18 = vsub.f32 2.0, %v3795_v20  ;;  %v3796_v23 = vmul.f32 %v5824_v45, %v3500_v8  ;;  %v8937_v2 = vld [vmem:[#allocation56_spill] sm:$0xff]  ;;  %v8939_v20 = vld [vmem:[#allocation22_spill] sm:$0xff] }
 0x3ef   : > { %v5826_v63 = vpop.eup %5825  ;;  %4304 = vst [vmem:[%s7446_s14 + $0x298] sm:$0xff] %v4176_v52  ;;  %5837 = vrcp.f32 %v3514_v19  ;;  %v3516_v26 = vpop.xlane.xlu1 %3515 }
 0x3f0   : > { %4305 = vst [vmem:[%s7446_s14 + $0x2a0] sm:$0xff] %v4177_v46  ;;  %v4178_v60 = vmul.f32 %v7916_v48, %v4050_v58  ;;  %v4051_v56 = vmul.f32 %v5822_v21, %v3923_v18  ;;  %v3924_v44 = vsub.f32 2.0, %v3796_v23  ;;  %v3797_v36 = vmul.f32 %v5826_v63, %v3502_v42 }
 0x3f1   : > { %v5828_v54 = vpop.eup %5827  ;;  %5839 = vrcp.f32 %v3516_v26  ;;  %v3518_v34 = vpop.xlane.xlu0 %3517 }
 0x3f2   : > { %4306 = vst [vmem:[%s7446_s14 + $0x2a8] sm:$0xff] %v4178_v60  ;;  %v4179_v32 = vmul.f32 %v8937_v2, %v4051_v56  ;;  %v4052_v41 = vmul.f32 %v5824_v45, %v3924_v44  ;;  %v3925_v8 = vsub.f32 2.0, %v3797_v36  ;;  %v3798_v30 = vmul.f32 %v5828_v54, %v3504_v22 }
 0x3f3   : > { %v5830_v49 = vpop.eup %5829  ;;  %5841 = vrcp.f32 %v3518_v34  ;;  %v3520_v31 = vpop.xlane.xlu1 %3519 }
 0x3f4   : > { %4307 = vst [vmem:[%s7446_s14 + $0x2b0] sm:$0xff] %v4179_v32  ;;  %v4180_v48 = vmul.f32 %v8938_v61, %v4052_v41  ;;  %v4053_v13 = vmul.f32 %v5826_v63, %v3925_v8  ;;  %v3926_v7 = vsub.f32 2.0, %v3798_v30  ;;  %v3799_v42 = vmul.f32 %v5830_v49, %v3506_v50  ;;  %v8941_v61 = vld [vmem:[#allocation59_spill] sm:$0xff] }
 0x3f5   : > { %v5832_v0 = vpop.eup %5831  ;;  %5843 = vrcp.f32 %v3520_v31  ;;  %v3522_v1 = vpop.xlane.xlu0 %3521 }
 0x3f6   : > { %4308 = vst [vmem:[%s7446_s14 + $0x2b8] sm:$0xff] %v4180_v48  ;;  %v4181_v6 = vmul.f32 %v7944_v57, %v4053_v13  ;;  %v4054_v37 = vmul.f32 %v5828_v54, %v3926_v7  ;;  %v3927_v35 = vsub.f32 2.0, %v3799_v42  ;;  %v3800_v22 = vmul.f32 %v5832_v0, %v3508_v51 }
 0x3f7   : > { %v5834_v27 = vpop.eup %5833  ;;  %5845 = vrcp.f32 %v3522_v1  ;;  %v3524_v21 = vpop.xlane.xlu1 %3523 }
 0x3f8   : > { %4309 = vst [vmem:[%s7446_s14 + $0x2c0] sm:$0xff] %v4181_v6  ;;  %v4182_v5 = vmul.f32 %v7952_v17, %v4054_v37  ;;  %v4055_v43 = vmul.f32 %v5830_v49, %v3927_v35  ;;  %v3928_v25 = vsub.f32 2.0, %v3800_v22  ;;  %v3801_v50 = vmul.f32 %v5834_v27, %v3510_v12  ;;  %v8940_v17 = vld [vmem:[#allocation23_spill] sm:$0xff] }
 0x3f9   : > { %v5836_v3 = vpop.eup %5835  ;;  %5847 = vrcp.f32 %v3524_v21  ;;  %v8325_v24 = vpop.xlane.xlu0 %3525 }
 0x3fa   : > { %4310 = vst [vmem:[%s7446_s14 + $0x2c8] sm:$0xff] %v4182_v5  ;;  %v4183_v57 = vmul.f32 %v8939_v20, %v4055_v43  ;;  %v4056_v45 = vmul.f32 %v5832_v0, %v3928_v25  ;;  %v3929_v51 = vsub.f32 2.0, %v3801_v50  ;;  %v3802_v9 = vmul.f32 %v5836_v3, %v3512_v39 }
 0x3fb   : > { %5849 = vrcp.f32 %v8325_v24  ;;  %v3528_v52 = vpop.xlane.xlu1 %3527 }
 0x3fc   : > { %v5838_v46 = vpop.eup %5837  ;;  %4311 = vst [vmem:[%s7446_s14 + $0x2d0] sm:$0xff] %v4183_v57  ;;  %v4184_v58 = vmul.f32 %v8940_v17, %v4056_v45  ;;  %v4057_v12 = vmul.f32 %v5834_v27, %v3929_v51  ;;  %v3930_v18 = vsub.f32 2.0, %v3802_v9  ;;  %5851 = vrcp.f32 %v3528_v52 }
 0x3fd   : > { %v3803_v23 = vmul.f32 %v5838_v46, %v3514_v19  ;;  %v3530_v63 = vpop.xlane.xlu0 %3529 }
 0x3fe   : > { %v5840_v60 = vpop.eup %5839  ;;  %4312 = vst [vmem:[%s7446_s14 + $0x2d8] sm:$0xff] %v4184_v58  ;;  %v4185_v56 = vmul.f32 %v7980_v33, %v4057_v12  ;;  %v4058_v44 = vmul.f32 %v5836_v3, %v3930_v18  ;;  %5853 = vrcp.f32 %v3530_v63 }
 0x3ff   : > { %v3931_v39 = vsub.f32 2.0, %v3803_v23  ;;  %v3804_v36 = vmul.f32 %v5840_v60, %v3516_v26  ;;  %v3532_v54 = vpop.xlane.xlu1 %3531 }
 0x400   : > { %v5842_v2 = vpop.eup %5841  ;;  %4313 = vst [vmem:[%s7446_s14 + $0x2e0] sm:$0xff] %v4185_v56  ;;  %v4186_v32 = vmul.f32 %v7988_v15, %v4058_v44  ;;  %5855 = vrcp.f32 %v3532_v54  ;;  %v8942_v15 = vld [vmem:[#allocation24_spill] sm:$0xff] }
 0x401   : > { %v4059_v41 = vmul.f32 %v5838_v46, %v3931_v39  ;;  %v3932_v8 = vsub.f32 2.0, %v3804_v36  ;;  %v3805_v19 = vmul.f32 %v5842_v2, %v3518_v34  ;;  %v3534_v30 = vpop.xlane.xlu0 %3533  ;;  %v8943_v46 = vld [vmem:[#allocation60_spill] sm:$0xff] }
 0x402   : > { %v5844_v49 = vpop.eup %5843  ;;  %4314 = vst [vmem:[%s7446_s14 + $0x2e8] sm:$0xff] %v4186_v32  ;;  %5857 = vrcp.f32 %v3534_v30 }
 0x403   : > { %v4187_v33 = vmul.f32 %v8941_v61, %v4059_v41  ;;  %v4060_v48 = vmul.f32 %v5840_v60, %v3932_v8  ;;  %v3933_v13 = vsub.f32 2.0, %v3805_v19  ;;  %v3806_v26 = vmul.f32 %v5844_v49, %v3520_v31  ;;  %v3536_v7 = vpop.xlane.xlu1 %3535  ;;  %v8944_v60 = vld [vmem:[#allocation25_spill] sm:$0xff] }
 0x404   : > { %v5846_v42 = vpop.eup %5845  ;;  %5859 = vrcp.f32 %v3536_v7 }
 0x405   : > { %4315 = vst [vmem:[%s7446_s14 + $0x2f0] sm:$0xff] %v4187_v33  ;;  %v4188_v0 = vmul.f32 %v8942_v15, %v4060_v48  ;;  %v4061_v6 = vmul.f32 %v5842_v2, %v3933_v13  ;;  %v3934_v37 = vsub.f32 2.0, %v3806_v26  ;;  %v3807_v34 = vmul.f32 %v5846_v42, %v3522_v1  ;;  %v3538_v35 = vpop.xlane.xlu0 %3537  ;;  %v8945_v48 = vld [vmem:[#allocation26_spill] sm:$0xff] }
 0x406   : > { %v5848_v22 = vpop.eup %5847  ;;  %5861 = vrcp.f32 %v3538_v35 }
 0x407   : > { %4316 = vst [vmem:[%s7446_s14 + $0x2f8] sm:$0xff] %v4188_v0  ;;  %v4189_v27 = vmul.f32 %v8016_v28, %v4061_v6  ;;  %v4062_v5 = vmul.f32 %v5844_v49, %v3934_v37  ;;  %v3935_v43 = vsub.f32 2.0, %v3807_v34  ;;  %v3808_v31 = vmul.f32 %v5848_v22, %v3524_v21  ;;  %v3540_v25 = vpop.xlane.xlu1 %3539 }
 0x408   : > { %v5850_v50 = vpop.eup %5849  ;;  %5863 = vrcp.f32 %v3540_v25 }
 0x409   : > { %v5852_v3 = vpop.eup %5851  ;;  %4317 = vst [vmem:[%s7446_s14 + $0x300] sm:$0xff] %v4189_v27  ;;  %v4190_v20 = vmul.f32 %v8024_v40, %v4062_v5  ;;  %v4063_v57 = vmul.f32 %v5846_v42, %v3935_v43  ;;  %v3936_v1 = vsub.f32 2.0, %v3808_v31  ;;  %v3809_v45 = vmul.f32 %v5850_v50, %v8325_v24  ;;  %v3542_v51 = vpop.xlane.xlu0 %3541 }
 0x40a   : > { %v3810_v9 = vmul.f32 %v5852_v3, %v3528_v52  ;;  %5865 = vrcp.f32 %v3542_v51 }
 0x40b   : > { %v5854_v28 = vpop.eup %5853  ;;  %4318 = vst [vmem:[%s7446_s14 + $0x308] sm:$0xff] %v4190_v20  ;;  %v4191_v17 = vmul.f32 %v8943_v46, %v4063_v57  ;;  %v4064_v21 = vmul.f32 %v5848_v22, %v3936_v1  ;;  %v3937_v58 = vsub.f32 2.0, %v3809_v45  ;;  %v3544_v12 = vpop.xlane.xlu1 %3543 }
 0x40c   : > { %v3938_v18 = vsub.f32 2.0, %v3810_v9  ;;  %v3811_v23 = vmul.f32 %v5854_v28, %v3530_v63  ;;  %5867 = vrcp.f32 %v3544_v12  ;;  %v8947_v9 = vld [vmem:[#allocation63_spill] sm:$0xff] }
 0x40d   : > { %v5856_v40 = vpop.eup %5855  ;;  %4319 = vst [vmem:[%s7446_s14 + $0x310] sm:$0xff] %v4191_v17  ;;  %v4192_v56 = vmul.f32 %v8944_v60, %v4064_v21  ;;  %v4065_v24 = vmul.f32 %v5850_v50, %v3937_v58  ;;  %v3546_v44 = vpop.xlane.xlu0 %3545 }
 0x40e   : > { %v4066_v52 = vmul.f32 %v5852_v3, %v3938_v18  ;;  %v3939_v39 = vsub.f32 2.0, %v3811_v23  ;;  %v3812_v36 = vmul.f32 %v5856_v40, %v3532_v54  ;;  %5869 = vrcp.f32 %v3546_v44 }
 0x40f   : > { %v5858_v2 = vpop.eup %5857  ;;  %4320 = vst [vmem:[%s7446_s14 + $0x318] sm:$0xff] %v4192_v56  ;;  %v4193_v32 = vmul.f32 %v8052_v47, %v4065_v24  ;;  %v3548_v41 = vpop.xlane.xlu1 %3547 }
 0x410   : > { %v4194_v63 = vmul.f32 %v8060_v59, %v4066_v52  ;;  %v4067_v8 = vmul.f32 %v5854_v28, %v3939_v39  ;;  %v3940_v19 = vsub.f32 2.0, %v3812_v36  ;;  %v3813_v49 = vmul.f32 %v5858_v2, %v3534_v30  ;;  %v8946_v59 = vld [vmem:[#allocation27_spill] sm:$0xff] }
 0x411   : > { %v5860_v61 = vpop.eup %5859  ;;  %4321 = vst [vmem:[%s7446_s14 + $0x320] sm:$0xff] %v4193_v32  ;;  %5871 = vrcp.f32 %v3548_v41  ;;  %v3550_v33 = vpop.xlane.xlu0 %3549 }
 0x412   : > { %4322 = vst [vmem:[%s7446_s14 + $0x328] sm:$0xff] %v4194_v63  ;;  %v4195_v54 = vmul.f32 %v8945_v48, %v4067_v8  ;;  %v4068_v13 = vmul.f32 %v5856_v40, %v3940_v19  ;;  %v3941_v26 = vsub.f32 2.0, %v3813_v49  ;;  %v3814_v42 = vmul.f32 %v5860_v61, %v3536_v7  ;;  %v8948_v8 = vld [vmem:[#allocation28_spill] sm:$0xff] }
 0x413   : > { %v5862_v15 = vpop.eup %5861  ;;  %5873 = vrcp.f32 %v3550_v33  ;;  %v3552_v47 = vpop.xlane.xlu1 %3551 }
 0x414   : > { %4323 = vst [vmem:[%s7446_s14 + $0x330] sm:$0xff] %v4195_v54  ;;  %v4196_v0 = vmul.f32 %v8946_v59, %v4068_v13  ;;  %v4069_v6 = vmul.f32 %v5858_v2, %v3941_v26  ;;  %v3942_v30 = vsub.f32 2.0, %v3814_v42  ;;  %v3815_v37 = vmul.f32 %v5862_v15, %v3538_v35  ;;  %v8949_v54 = vld [vmem:[#allocation64_spill] sm:$0xff] }
 0x415   : > { %v5864_v34 = vpop.eup %5863  ;;  %5875 = vrcp.f32 %v3552_v47  ;;  %v3554_v22 = vpop.xlane.xlu0 %3553 }
 0x416   : > { %4324 = vst [vmem:[%s7446_s14 + $0x338] sm:$0xff] %v4196_v0  ;;  %v4197_v27 = vmul.f32 %v8088_v62, %v4069_v6  ;;  %v4070_v5 = vmul.f32 %v5860_v61, %v3942_v30  ;;  %v3943_v43 = vsub.f32 2.0, %v3815_v37  ;;  %v3816_v7 = vmul.f32 %v5864_v34, %v3540_v25 }
 0x417   : > { %v5866_v31 = vpop.eup %5865  ;;  %5877 = vrcp.f32 %v3554_v22  ;;  %v3556_v50 = vpop.xlane.xlu1 %3555 }
 0x418   : > { %4325 = vst [vmem:[%s7446_s14 + $0x340] sm:$0xff] %v4197_v27  ;;  %v4198_v3 = vmul.f32 %v8096_v53, %v4070_v5  ;;  %v4071_v20 = vmul.f32 %v5862_v15, %v3943_v43  ;;  %v3944_v57 = vsub.f32 2.0, %v3816_v7  ;;  %v3817_v35 = vmul.f32 %v5866_v31, %v3542_v51 }
 0x419   : > { %v5868_v1 = vpop.eup %5867  ;;  %5879 = vrcp.f32 %v3556_v50  ;;  %v3558_v45 = vpop.xlane.xlu0 %3557 }
 0x41a   : > { %4326 = vst [vmem:[%s7446_s14 + $0x348] sm:$0xff] %v4198_v3  ;;  %v4199_v62 = vmul.f32 %v8947_v9, %v4071_v20  ;;  %v4072_v28 = vmul.f32 %v5864_v34, %v3944_v57  ;;  %v3945_v46 = vsub.f32 2.0, %v3817_v35  ;;  %v3818_v25 = vmul.f32 %v5868_v1, %v3544_v12 }
 0x41b   : > { %v5870_v17 = vpop.eup %5869  ;;  %5881 = vrcp.f32 %v3558_v45  ;;  %v8363_v21 = vpop.xlane.xlu1 %3559 }
 0x41c   : > { %4327 = vst [vmem:[%s7446_s14 + $0x350] sm:$0xff] %v4199_v62  ;;  %v4200_v53 = vmul.f32 %v8116_v55, %v4072_v28  ;;  %v4073_v58 = vmul.f32 %v5866_v31, %v3945_v46  ;;  %v3946_v51 = vsub.f32 2.0, %v3818_v25  ;;  %v3819_v18 = vmul.f32 %v5870_v17, %v3546_v44 }
 0x41d   : > { %5883 = vrcp.f32 %v8363_v21  ;;  %v3562_v23 = vpop.xlane.xlu0 %3561 }
 0x41e   : > { %v5872_v40 = vpop.eup %5871  ;;  %4328 = vst [vmem:[%s7446_s14 + $0x358] sm:$0xff] %v4200_v53  ;;  %v4201_v60 = vmul.f32 %v8122_v14, %v4073_v58  ;;  %v4074_v12 = vmul.f32 %v5868_v1, %v3946_v51  ;;  %v3947_v56 = vsub.f32 2.0, %v3819_v18  ;;  %5885 = vrcp.f32 %v3562_v23  ;;  %v8950_v18 = vld [vmem:[#allocation29_spill] sm:$0xff] }
 0x41f   : > { %v3820_v24 = vmul.f32 %v5872_v40, %v3548_v41  ;;  %v3564_v52 = vpop.xlane.xlu1 %3563 }
 0x420   : > { %v5874_v39 = vpop.eup %5873  ;;  %4329 = vst [vmem:[%s7446_s14 + $0x360] sm:$0xff] %v4201_v60  ;;  %v4202_v55 = vmul.f32 %v8128_v16, %v4074_v12  ;;  %v4075_v36 = vmul.f32 %v5870_v17, %v3947_v56  ;;  %5887 = vrcp.f32 %v3564_v52 }
 0x421   : > { %v3948_v44 = vsub.f32 2.0, %v3820_v24  ;;  %v3821_v2 = vmul.f32 %v5874_v39, %v3550_v33  ;;  %v3566_v32 = vpop.xlane.xlu0 %3565 }
 0x422   : > { %v5876_v63 = vpop.eup %5875  ;;  %4330 = vst [vmem:[%s7446_s14 + $0x368] sm:$0xff] %v4202_v55  ;;  %v4203_v19 = vmul.f32 %v8948_v8, %v4075_v36  ;;  %5889 = vrcp.f32 %v3566_v32 }
 0x423   : > { %v4076_v14 = vmul.f32 %v5872_v40, %v3948_v44  ;;  %v3949_v49 = vsub.f32 2.0, %v3821_v2  ;;  %v3822_v41 = vmul.f32 %v5876_v63, %v3552_v47  ;;  %v3568_v61 = vpop.xlane.xlu1 %3567  ;;  %v8951_v40 = vld [vmem:[#allocation30_spill] sm:$0xff] }
 0x424   : > { %v5878_v48 = vpop.eup %5877  ;;  %4331 = vst [vmem:[%s7446_s14 + $0x370] sm:$0xff] %v4203_v19  ;;  %5891 = vrcp.f32 %v3568_v61 }
 0x425   : > { %v4204_v16 = vmul.f32 %v8949_v54, %v4076_v14  ;;  %v4077_v13 = vmul.f32 %v5874_v39, %v3949_v49  ;;  %v3950_v26 = vsub.f32 2.0, %v3822_v41  ;;  %v3823_v33 = vmul.f32 %v5878_v48, %v3554_v22  ;;  %v3570_v42 = vpop.xlane.xlu0 %3569  ;;  %v8954_v41 = vld [vmem:[#allocation32_spill] sm:$0xff] }
 0x426   : > { %v5880_v15 = vpop.eup %5879  ;;  %5893 = vrcp.f32 %v3570_v42 }
 0x427   : > { %4332 = vst [vmem:[%s7446_s14 + $0x378] sm:$0xff] %v4204_v16  ;;  %v4205_v59 = vmul.f32 %v8153_v11, %v4077_v13  ;;  %v4078_v0 = vmul.f32 %v5876_v63, %v3950_v26  ;;  %v3951_v6 = vsub.f32 2.0, %v3823_v33  ;;  %v3824_v47 = vmul.f32 %v5880_v15, %v3556_v50  ;;  %v3572_v30 = vpop.xlane.xlu1 %3571  ;;  %v8955_v26 = vld [vmem:[#allocation68_spill] sm:$0xff] }
 0x428   : > { %v5882_v37 = vpop.eup %5881  ;;  %5895 = vrcp.f32 %v3572_v30 }
 0x429   : > { %4333 = vst [vmem:[%s7446_s14 + $0x380] sm:$0xff] %v4205_v59  ;;  %v4206_v34 = vmul.f32 %v8158_v4, %v4078_v0  ;;  %v4079_v27 = vmul.f32 %v5878_v48, %v3951_v6  ;;  %v3952_v5 = vsub.f32 2.0, %v3824_v47  ;;  %v3825_v22 = vmul.f32 %v5882_v37, %v3558_v45  ;;  %v3574_v43 = vpop.xlane.xlu0 %3573  ;;  %v8956_v6 = vld [vmem:[#allocation33_spill] sm:$0xff] }
 0x42a   : > { %v5884_v7 = vpop.eup %5883  ;;  %5897 = vrcp.f32 %v3574_v43 }
 0x42b   : > { %v5886_v31 = vpop.eup %5885  ;;  %4334 = vst [vmem:[%s7446_s14 + $0x388] sm:$0xff] %v4206_v34  ;;  %v4207_v11 = vmul.f32 %v8168_v29, %v4079_v27  ;;  %v4080_v3 = vmul.f32 %v5880_v15, %v3952_v5  ;;  %v3953_v50 = vsub.f32 2.0, %v3825_v22  ;;  %v3826_v20 = vmul.f32 %v5884_v7, %v8363_v21  ;;  %v3576_v57 = vpop.xlane.xlu1 %3575  ;;  %v8957_v5 = vld [vmem:[#allocation34_spill] sm:$0xff] }
 0x42c   : > { %v3827_v35 = vmul.f32 %v5886_v31, %v3562_v23  ;;  %5899 = vrcp.f32 %v3576_v57 }
 0x42d   : > { %v5888_v4 = vpop.eup %5887  ;;  %4335 = vst [vmem:[%s7446_s14 + $0x390] sm:$0xff] %v4207_v11  ;;  %v4208_v1 = vmul.f32 %v8176_v38, %v4080_v3  ;;  %v4081_v45 = vmul.f32 %v5882_v37, %v3953_v50  ;;  %v3954_v9 = vsub.f32 2.0, %v3826_v20  ;;  %v3578_v62 = vpop.xlane.xlu0 %3577  ;;  %v8958_v11 = vld [vmem:[#allocation35_spill] sm:$0xff] }
 0x42e   : > { %v3955_v28 = vsub.f32 2.0, %v3827_v35  ;;  %v3828_v46 = vmul.f32 %v5888_v4, %v3564_v52  ;;  %5901 = vrcp.f32 %v3578_v62 }
 0x42f   : > { %v5890_v29 = vpop.eup %5889  ;;  %4336 = vst [vmem:[%s7446_s14 + $0x398] sm:$0xff] %v4208_v1  ;;  %v4209_v25 = vmul.f32 %v8181_v10, %v4081_v45  ;;  %v4082_v17 = vmul.f32 %v5884_v7, %v3954_v9  ;;  %v3580_v21 = vpop.xlane.xlu1 %3579  ;;  %v8952_v10 = vld [vmem:[#allocation31_spill] sm:$0xff]  ;;  %v8960_v1 = vld [vmem:[#allocation36_spill] sm:$0xff] }
 0x430   : > { %v4083_v53 = vmul.f32 %v5886_v31, %v3955_v28  ;;  %v3956_v58 = vsub.f32 2.0, %v3828_v46  ;;  %v3829_v51 = vmul.f32 %v5890_v29, %v3566_v32  ;;  %5903 = vrcp.f32 %v3580_v21  ;;  %v8953_v32 = vld [vmem:[#allocation67_spill] sm:$0xff] }
 0x431   : > { %v5892_v38 = vpop.eup %5891  ;;  %4337 = vst [vmem:[%s7446_s14 + $0x3a0] sm:$0xff] %v4209_v25  ;;  %v4210_v23 = vmul.f32 %v8950_v18, %v4082_v17 }
 0x432   : > { %v4211_v60 = vmul.f32 %v8951_v40, %v4083_v53  ;;  %v4084_v12 = vmul.f32 %v5888_v4, %v3956_v58  ;;  %v3957_v56 = vsub.f32 2.0, %v3829_v51  ;;  %v3830_v24 = vmul.f32 %v5892_v38, %v3568_v61 }
 0x433   : > { %v5894_v52 = vpop.eup %5893  ;;  %4338 = vst [vmem:[%s7446_s14 + $0x3a8] sm:$0xff] %v4210_v23 }
 0x434   : > { %4339 = vst [vmem:[%s7446_s14 + $0x3b0] sm:$0xff] %v4211_v60  ;;  %v4212_v39 = vmul.f32 %v8952_v10, %v4084_v12  ;;  %v4085_v55 = vmul.f32 %v5890_v29, %v3957_v56  ;;  %v3958_v36 = vsub.f32 2.0, %v3830_v24  ;;  %v3831_v44 = vmul.f32 %v5894_v52, %v3570_v42 }
 0x435   : > { %v5896_v2 = vpop.eup %5895 }
 0x436   : > { %4340 = vst [vmem:[%s7446_s14 + $0x3b8] sm:$0xff] %v4212_v39  ;;  %v4213_v63 = vmul.f32 %v8953_v32, %v4085_v55  ;;  %v4086_v8 = vmul.f32 %v5892_v38, %v3958_v36  ;;  %v3959_v19 = vsub.f32 2.0, %v3831_v44  ;;  %v3832_v14 = vmul.f32 %v5896_v2, %v3572_v30 }
 0x437   : > { %v5898_v49 = vpop.eup %5897 }
 0x438   : > { %4341 = vst [vmem:[%s7446_s14 + $0x3c0] sm:$0xff] %v4213_v63  ;;  %v4214_v61 = vmul.f32 %v8954_v41, %v4086_v8  ;;  %v4087_v48 = vmul.f32 %v5894_v52, %v3959_v19  ;;  %v3960_v54 = vsub.f32 2.0, %v3832_v14  ;;  %v3833_v16 = vmul.f32 %v5898_v49, %v3574_v43 }
 0x439   : > { %v5900_v13 = vpop.eup %5899 }
 0x43a   : > { %4342 = vst [vmem:[%s7446_s14 + $0x3c8] sm:$0xff] %v4214_v61  ;;  %v4215_v33 = vmul.f32 %v8955_v26, %v4087_v48  ;;  %v4088_v42 = vmul.f32 %v5896_v2, %v3960_v54  ;;  %v3961_v15 = vsub.f32 2.0, %v3833_v16  ;;  %v3834_v59 = vmul.f32 %v5900_v13, %v3576_v57  ;;  %v8959_v57 = vld [vmem:[#allocation71_spill] sm:$0xff] }
 0x43b   : > { %v5902_v0 = vpop.eup %5901 }
 0x43c   : > { %4343 = vst [vmem:[%s7446_s14 + $0x3d0] sm:$0xff] %v4215_v33  ;;  %v4216_v47 = vmul.f32 %v8956_v6, %v4088_v42  ;;  %v4089_v30 = vmul.f32 %v5898_v49, %v3961_v15  ;;  %v3962_v37 = vsub.f32 2.0, %v3834_v59  ;;  %v3835_v34 = vmul.f32 %v5902_v0, %v3578_v62 }
 0x43d   : > { %v5904_v27 = vpop.eup %5903 }
 0x43e   : > { %4344 = vst [vmem:[%s7446_s14 + $0x3d8] sm:$0xff] %v4216_v47  ;;  %v4217_v22 = vmul.f32 %v8957_v5, %v4089_v30  ;;  %v4090_v43 = vmul.f32 %v5900_v13, %v3962_v37  ;;  %v3963_v7 = vsub.f32 2.0, %v3835_v34  ;;  %v3836_v31 = vmul.f32 %v5904_v27, %v3580_v21 }
 0x440   : > { %4345 = vst [vmem:[%s7446_s14 + $0x3e0] sm:$0xff] %v4217_v22  ;;  %v4218_v3 = vmul.f32 %v8958_v11, %v4090_v43  ;;  %v4091_v50 = vmul.f32 %v5902_v0, %v3963_v7  ;;  %v3964_v20 = vsub.f32 2.0, %v3836_v31 }
 0x442   : > { %4346 = vst [vmem:[%s7446_s14 + $0x3e8] sm:$0xff] %v4218_v3  ;;  %v4219_v35 = vmul.f32 %v8959_v57, %v4091_v50  ;;  %v4092_v4 = vmul.f32 %v5904_v27, %v3964_v20 }
 0x444   : > { %4347 = vst [vmem:[%s7446_s14 + $0x3f0] sm:$0xff] %v4219_v35  ;;  %v4220_v45 = vmul.f32 %v8960_v1, %v4092_v4 }
 0x446   : > { %4348 = vst [vmem:[%s7446_s14 + $0x3f8] sm:$0xff] %v4220_v45 }
 0x447   : > { %5920 = shalt.err (!%p5917_p3)
}
 0x448   : > { %s5921_s8 = scalar_lea.hbm %s8412_s25, 16384  ;;  %s5925_s11 = scalar_lea.hbm %s8466_s5, 32768 }
 0x449   : > { %p5922_p4 = scmp.ne.s32.totalorder %s8412_s25, %s5921_s8  ;;  %p5926_p9 = scmp.lt.s32.totalorder %s8412_s25, %s8466_s5 }
 0x44a   : > { %p5927_p10 = scmp.lt.s32.totalorder %s5925_s11, %s5921_s8 }
 0x44b   : > { %p5923_p7 = pnand %p5922_p4, %p6040_p5 }
 0x44c   : > { %p5928_p11 = por %p5927_p10, %p5926_p9 }
 0x44d   : > { %p5924_p8 = pneg %p5923_p7 }
 0x44f   : > { %p5929_p12 = pnand %p5928_p11, %p5924_p8 }
 0x451   : > { %5932 = shalt.err (!%p5929_p12)
}
 0x452   : > { %s5970_s14 = smov 128   ;;  %s5971_s15 = smov 8  }
 0x453   : > { %5352 = dma.vmem_to_hbm [thread:$0]  (%p6040_p5), %s8414_s16, 16384, %s8412_s25, %s8421_s22, %s5970_s14, %s5970_s14, %s5971_s15  }
 0x454 PF: > { %p5358_p13 = scmp.ge.s32.totalorder %s5967_s21, 2  ;;  %s4378_s17 = sand.u32 1, %s5955_s18  }
 0x455   : > { %s4379_s23 = scalar_lea.sflag [#allocation3], %s4378_s17 }
 0x456   : > { %p5355_p0 = pnand %p5358_p13, %p6044_p6 }
 0x458   : > { %p5356_p1 = pneg %p5355_p0 }
 0x45a   : > { %5950 = dma.done.wait (%p5356_p1), %s4379_s23, 16384  }
 0x45b   : > { %5952 = vsyncadd (%p5356_p1), %s4379_s23, 4294950912  ;;  %p15_p2 = scmp.ge.s32.totalorder %s6027_s24, 4   ;;  %s8961_s18 = smov %s5959_s19 }
 0x45c   : > { %s8962_s19 = smov %s5963_s20  ;;  %s8963_s20 = smov %s6038_s27 }
 0x45d   : > { %s8964_s21 = smov %s6027_s24  ;;  %17 = sbr.rel (!%p15_p2) target bundleno = 3 (0x3), region = 75 }
 0x462   :  { %4384 = vsyncpa [#allocation3], 1 }
 0x463   :  { %4386 = vsyncpa [#allocation3 + $0x1], 1 }

</bundles_post_ra>
